<compile_context>
chip_gen: v7x
topology: tpu7x:2x2x1
jax: 0.10.0
libtpu: 0.0.40
codegen_flags: <defaults>
</compile_context>

<pallas_src>
import functools
import math

import jax
import jax.numpy as jnp
from jax import lax
from jax.experimental import pallas as pl
from jax.experimental.pallas import tpu as pltpu

_INV_SQRT2 = 1.0 / math.sqrt(2.0)
_LN_EPS = 1e-5  # torch.nn.LayerNorm default


def _gelu_exact_f32(x):
    # nn.GELU() default = exact erf formulation, computed in f32.
    return 0.5 * x * (1.0 + lax.erf(x * _INV_SQRT2))


def _layernorm_f32(x, gamma, beta):
    mu = jnp.mean(x, axis=-1, keepdims=True)
    xc = x - mu
    var = jnp.mean(xc * xc, axis=-1, keepdims=True)
    return xc * lax.rsqrt(var + _LN_EPS) * gamma + beta


def _encoder_block_kernel(x_ref, ln1_g_ref, ln1_b_ref, wqkv_ref, wproj_ref,
                          bproj_ref, ln2_g_ref, ln2_b_ref, w1_ref, b1_ref,
                          w2_ref, b2_ref, o_ref, *, num_heads, operand_dtype):
    """One batch element (seq, dim) through the full encoder block.

    Matmul operands are `operand_dtype` (bf16 for native MXU rate, or f32);
    accumulation is always f32 (preferred_element_type).  LayerNorm / softmax /
    GELU / bias / residual math runs in f32 on the VPU/EUP (v5e-safe).
    """
    f32 = jnp.float32
    seq, dim = x_ref.shape
    head_dim = dim // num_heads
    scale = head_dim ** -0.5

    x = x_ref[...].astype(f32)                                     # (S, D)

    # ---- LayerNorm 1 ----
    xn = _layernorm_f32(x, ln1_g_ref[...].astype(f32), ln1_b_ref[...].astype(f32))

    # ---- Attention (qkv_bias=False; attn_drop / proj_drop are eval-mode identity) ----
    qkv = jnp.dot(xn.astype(operand_dtype), wqkv_ref[...].astype(operand_dtype),
                  preferred_element_type=f32)                      # (S, 3D)
    q = qkv[:, 0:dim]
    k = qkv[:, dim:2 * dim]
    v = qkv[:, 2 * dim:3 * dim]
    wproj = wproj_ref[...].astype(operand_dtype)

    # Heads occupy disjoint lane ranges; accumulating each head's slice of the
    # output projection (o_h @ Wproj[h*hd:(h+1)*hd]) is mathematically identical
    # to concat(heads) @ Wproj and avoids any cross-lane concatenation.
    attn_proj = jnp.zeros((seq, dim), f32)
    for h in range(num_heads):                                     # static unroll
        sl = slice(h * head_dim, (h + 1) * head_dim)
        qh = q[:, sl].astype(operand_dtype)
        kh = k[:, sl].astype(operand_dtype)
        vh = v[:, sl].astype(operand_dtype)
        s = lax.dot_general(qh, kh, (((1,), (1,)), ((), ())),
                            preferred_element_type=f32) * scale    # (S, S)
        s = s - jnp.max(s, axis=-1, keepdims=True)
        p = jnp.exp(s)
        p = p / jnp.sum(p, axis=-1, keepdims=True)
        oh = jnp.dot(p.astype(operand_dtype), vh,
                     preferred_element_type=f32)                   # (S, head_dim)
        attn_proj = attn_proj + jnp.dot(oh.astype(operand_dtype), wproj[sl, :],
                                        preferred_element_type=f32)
    a = attn_proj + bproj_ref[...].astype(f32) + xn                # Residual(Attention)

    # ---- LayerNorm 2 ----
    x2 = _layernorm_f32(a, ln2_g_ref[...].astype(f32), ln2_b_ref[...].astype(f32))

    # ---- MLP: fc1 -> exact GELU -> fc2 (+ residual) ----
    # TODO(synk): training-mode Dropout / DropPath would need pltpu.prng_*; the
    # inference forward (identity) is implemented here.
    h1 = jnp.dot(x2.astype(operand_dtype), w1_ref[...].astype(operand_dtype),
                 preferred_element_type=f32) + b1_ref[...].astype(f32)
    h1 = _gelu_exact_f32(h1)
    # NOTE: at hidden=512 the (seq, hidden) activation is tiny; for ViT-B/L
    # (3072/4096) tile the hidden dimension here instead of materializing it.
    y = jnp.dot(h1.astype(operand_dtype), w2_ref[...].astype(operand_dtype),
                preferred_element_type=f32) + b2_ref[...].astype(f32)
    y = y + x2                                                     # Residual(MLP)

    o_ref[...] = y.astype(o_ref.dtype)


_PARAM_NAMES = ("ln1_g", "ln1_b", "wqkv", "wproj", "bproj",
                "ln2_g", "ln2_b", "w1", "b1", "w2", "b2")


def _vmem_limit_bytes(param_bytes, io_tile_bytes):
    """Chip-aware scoped-VMEM limit: footprint-based, capped below physical VMEM."""
    try:
        cap = int(getattr(pltpu.get_tpu_info(), "vmem_capacity_bytes", 64 << 20))
    except Exception:
        cap = 64 << 20                 # v7x has the smallest per-core VMEM (64 MiB)
    want = 4 * (param_bytes + 2 * io_tile_bytes) + (8 << 20)   # generous margin
    want = max(want, 32 << 20)                                 # never below the safe default
    return int(min(want, int(0.85 * cap)))                     # headroom for compiler scratch


def encoder_block_pallas(x, params, *, num_heads, bf16_matmul=False):
    """Fused TransformerEncoderBlock forward (eval mode).

    x: (batch, seq, dim).  Weights are in JAX layout (transposed vs nn.Linear):
      wqkv (dim, 3*dim), wproj (dim, dim), w1 (dim, hidden), w2 (hidden, dim);
      biases and LayerNorm affine params are (1, n) rows.
    """
    batch, seq, dim = x.shape
    assert dim % num_heads == 0, "dim must be divisible by num_heads"
    for name in _PARAM_NAMES:
        assert params[name].dtype == x.dtype, (
            f"param {name} dtype {params[name].dtype} != activation dtype {x.dtype}; "
            "mixed dtypes would silently promote inside the matmuls")

    operand_dtype = (jnp.bfloat16 if (bf16_matmul and x.dtype == jnp.float32)
                     else x.dtype)

    kernel = functools.partial(_encoder_block_kernel, num_heads=num_heads,
                               operand_dtype=operand_dtype)

    # Whole-array, single-buffered VMEM residency for weights/biases/LN params
    # (constant across the grid: no per-step DMA, no double buffer).
    weight_spec = pl.BlockSpec(memory_space=pltpu.MemorySpace.VMEM)

    param_bytes = sum(int(params[n].size) * params[n].dtype.itemsize
                      for n in _PARAM_NAMES)
    io_tile_bytes = seq * dim * x.dtype.itemsize

    return pl.pallas_call(
        kernel,
        out_shape=jax.ShapeDtypeStruct((batch, seq, dim), x.dtype),
        grid=(batch,),
        in_specs=[pl.BlockSpec((None, seq, dim), lambda b: (b, 0, 0))]
                 + [weight_spec] * len(_PARAM_NAMES),
        out_specs=pl.BlockSpec((None, seq, dim), lambda b: (b, 0, 0)),
        compiler_params=pltpu.CompilerParams(
            # Independent batch rows -> v7x megacore sharding across both TCs.
            dimension_semantics=("parallel",),
            vmem_limit_bytes=_vmem_limit_bytes(param_bytes, io_tile_bytes),
        ),
    )(x, *(params[n] for n in _PARAM_NAMES))


def encoder_block_reference(x, params, *, num_heads):
    """Pure-JAX f32 reference (HIGHEST-precision matmuls) of the same block."""
    f32 = jnp.float32
    hi = lax.Precision.HIGHEST
    batch, seq, dim = x.shape
    head_dim = dim // num_heads
    p = {k: v.astype(f32) for k, v in params.items()}
    x = x.astype(f32)

    def ln(v, g, b):
        mu = jnp.mean(v, axis=-1, keepdims=True)
        var = jnp.mean((v - mu) ** 2, axis=-1, keepdims=True)
        return (v - mu) * lax.rsqrt(var + _LN_EPS) * g.reshape(-1) + b.reshape(-1)

    xn = ln(x, p["ln1_g"], p["ln1_b"])
    qkv = jnp.einsum("bsd,df->bsf", xn, p["wqkv"], precision=hi)
    qkv = qkv.reshape(batch, seq, 3, num_heads, head_dim)
    q, k, v = qkv[:, :, 0], qkv[:, :, 1], qkv[:, :, 2]
    s = jnp.einsum("bshd,bthd->bhst", q, k, precision=hi) * (head_dim ** -0.5)
    attn = jax.nn.softmax(s, axis=-1)
    o = jnp.einsum("bhst,bthd->bshd", attn, v, precision=hi).reshape(batch, seq, dim)
    o = jnp.einsum("bsd,de->bse", o, p["wproj"], precision=hi) + p["bproj"].reshape(-1)
    a = o + xn
    x2 = ln(a, p["ln2_g"], p["ln2_b"])
    h = jnp.einsum("bsd,dh->bsh", x2, p["w1"], precision=hi) + p["b1"].reshape(-1)
    h = 0.5 * h * (1.0 + lax.erf(h * _INV_SQRT2))
    y = jnp.einsum("bsh,hd->bsd", h, p["w2"], precision=hi) + p["b2"].reshape(-1)
    return y + x2


def init_block_params(key, dim, hidden, dtype):
    """nn.Linear-style uniform init; LN affine perturbed so that path is exercised."""
    ks = jax.random.split(key, 11)
    bd = 1.0 / math.sqrt(dim)
    bh = 1.0 / math.sqrt(hidden)

    def uni(k, shape, bound):
        return jax.random.uniform(k, shape, minval=-bound, maxval=bound,
                                  dtype=jnp.float32)

    p = {
        "ln1_g": 1.0 + 0.1 * jax.random.normal(ks[0], (1, dim), dtype=jnp.float32),
        "ln1_b": 0.1 * jax.random.normal(ks[1], (1, dim), dtype=jnp.float32),
        "wqkv": uni(ks[2], (dim, 3 * dim), bd),            # qkv_bias=False in the module
        "wproj": uni(ks[3], (dim, dim), bd),
        "bproj": uni(ks[4], (1, dim), bd),
        "ln2_g": 1.0 + 0.1 * jax.random.normal(ks[5], (1, dim), dtype=jnp.float32),
        "ln2_b": 0.1 * jax.random.normal(ks[6], (1, dim), dtype=jnp.float32),
        "w1": uni(ks[7], (dim, hidden), bd),
        "b1": uni(ks[8], (1, hidden), bd),
        "w2": uni(ks[9], (hidden, dim), bh),
        "b2": uni(ks[10], (1, dim), bh),
    }
    return {k: v.astype(dtype) for k, v in p.items()}


if __name__ == "__main__":
    # ViT-consistent dims: embed_dim=128, num_heads=4, mlp_ratio=4 -> hidden=512,
    # seq = num_patches + 1 = (5 // 4) * (9 // 4) + 1 = 3, num_encoders=4.
    batch = 16
    dim, num_heads, hidden = 128, 4, 512
    seq = (5 // 4) * (9 // 4) + 1
    num_layers = 4

    key = jax.random.PRNGKey(0)
    kx, kp = jax.random.split(key)
    x_f32 = jax.random.normal(kx, (batch, seq, dim), dtype=jnp.float32)
    layer_params = [init_block_params(k, dim, hidden, jnp.float32)
                    for k in jax.random.split(kp, num_layers)]

    # TODO(synk): the patch-embedding Conv2d, cls/pos tokens and policy/value
    # heads of the full ViT stay in plain JAX around this fused block kernel.

    @jax.jit
    def encoder_stack_pallas(x, params_list):
        for p in params_list:
            x = encoder_block_pallas(x, p, num_heads=num_heads)
        return x

    def encoder_stack_reference(x, params_list):
        for p in params_list:
            x = encoder_block_reference(x, p, num_heads=num_heads)
        return x

    # --- 1) f32 storage, f32 MXU operands: full 4-block encoder stack ---
    y = jax.block_until_ready(encoder_stack_pallas(x_f32, layer_params))
    y_ref = encoder_stack_reference(x_f32, layer_params)
    assert y.shape == (batch, seq, dim)
    assert jnp.allclose(y, y_ref, atol=3e-3, rtol=3e-3), "f32 encoder stack mismatch"

    # --- 2) bf16 storage (weights + activations), f32 accumulation: one block ---
    x_bf16 = x_f32.astype(jnp.bfloat16)
    p_bf16 = {k: v.astype(jnp.bfloat16) for k, v in layer_params[0].items()}
    y_b = jax.block_until_ready(
        encoder_block_pallas(x_bf16, p_bf16, num_heads=num_heads))
    y_b_ref = encoder_block_reference(x_bf16, p_bf16, num_heads=num_heads)
    assert y_b.dtype == jnp.bfloat16
    assert jnp.allclose(y_b.astype(jnp.float32), y_b_ref, atol=5e-2, rtol=5e-2), \
        "bf16 encoder block mismatch"

    # --- 3) f32 storage with bf16 MXU operands (v5e-friendly mixed precision) ---
    y_m = jax.block_until_ready(
        encoder_block_pallas(x_f32, layer_params[0], num_heads=num_heads,
                             bf16_matmul=True))
    y_m_ref = encoder_block_reference(x_f32, layer_params[0], num_heads=num_heads)
    assert jnp.allclose(y_m, y_m_ref, atol=5e-2, rtol=5e-2), \
        "bf16-operand encoder block mismatch"

    print("KERNEL_OK")
</pallas_src>

<mosaic_0001>
module attributes {stable_mosaic.version = 11 : i64} {
  func.func @_encoder_block_kernel(%arg0: i32, %arg1: memref<1x3x128xf32, #tpu.memory_space<vmem>>, %arg2: memref<1x128xf32, #tpu.memory_space<vmem>>, %arg3: memref<1x128xf32, #tpu.memory_space<vmem>>, %arg4: memref<128x384xf32, #tpu.memory_space<vmem>>, %arg5: memref<128x128xf32, #tpu.memory_space<vmem>>, %arg6: memref<1x128xf32, #tpu.memory_space<vmem>>, %arg7: memref<1x128xf32, #tpu.memory_space<vmem>>, %arg8: memref<1x128xf32, #tpu.memory_space<vmem>>, %arg9: memref<128x512xf32, #tpu.memory_space<vmem>>, %arg10: memref<1x512xf32, #tpu.memory_space<vmem>>, %arg11: memref<512x128xf32, #tpu.memory_space<vmem>>, %arg12: memref<1x128xf32, #tpu.memory_space<vmem>>, %arg13: memref<1x3x128xf32, #tpu.memory_space<vmem>>) attributes {dimension_semantics = [#tpu.dimension_semantics<parallel>], iteration_bounds = array<i64: 16>, scalar_prefetch = 0 : i64, scratch_operands = 0 : i64, tpu.core_type = #tpu.core_type<tc>, window_params = [{transform_indices = @transform_0, window_bounds = array<i64: 1, 3, 128>}, {pipeline_mode = #tpu.pipeline_mode<synchronous>, transform_indices = @transform_1, window_bounds = array<i64: 1, 128>}, {pipeline_mode = #tpu.pipeline_mode<synchronous>, transform_indices = @transform_2, window_bounds = array<i64: 1, 128>}, {pipeline_mode = #tpu.pipeline_mode<synchronous>, transform_indices = @transform_3, window_bounds = array<i64: 128, 384>}, {pipeline_mode = #tpu.pipeline_mode<synchronous>, transform_indices = @transform_4, window_bounds = array<i64: 128, 128>}, {pipeline_mode = #tpu.pipeline_mode<synchronous>, transform_indices = @transform_5, window_bounds = array<i64: 1, 128>}, {pipeline_mode = #tpu.pipeline_mode<synchronous>, transform_indices = @transform_6, window_bounds = array<i64: 1, 128>}, {pipeline_mode = #tpu.pipeline_mode<synchronous>, transform_indices = @transform_7, window_bounds = array<i64: 1, 128>}, {pipeline_mode = #tpu.pipeline_mode<synchronous>, transform_indices = @transform_8, window_bounds = array<i64: 128, 512>}, {pipeline_mode = #tpu.pipeline_mode<synchronous>, transform_indices = @transform_9, window_bounds = array<i64: 1, 512>}, {pipeline_mode = #tpu.pipeline_mode<synchronous>, transform_indices = @transform_10, window_bounds = array<i64: 512, 128>}, {pipeline_mode = #tpu.pipeline_mode<synchronous>, transform_indices = @transform_11, window_bounds = array<i64: 1, 128>}, {transform_indices = @transform_12, window_bounds = array<i64: 1, 3, 128>}]} {
    %c0 = arith.constant 0 : index
    %c0_0 = arith.constant 0 : index
    %c0_1 = arith.constant 0 : index
    %0 = vector.load %arg1[%c0, %c0_0, %c0_1] : memref<1x3x128xf32, #tpu.memory_space<vmem>>, vector<1x3x128xf32>
    %1 = vector.shape_cast %0 : vector<1x3x128xf32> to vector<3x128xf32>
    %c0_2 = arith.constant 0 : index
    %c0_3 = arith.constant 0 : index
    %2 = vector.load %arg2[%c0_2, %c0_3] : memref<1x128xf32, #tpu.memory_space<vmem>>, vector<1x128xf32>
    %c0_4 = arith.constant 0 : index
    %c0_5 = arith.constant 0 : index
    %3 = vector.load %arg3[%c0_4, %c0_5] : memref<1x128xf32, #tpu.memory_space<vmem>>, vector<1x128xf32>
    %cst = arith.constant dense<0.000000e+00> : vector<3xf32>
    %4 = vector.multi_reduction <add>, %1, %cst [1] : vector<3x128xf32> to vector<3xf32>
    %5 = vector.shape_cast %4 : vector<3xf32> to vector<3x1xf32>
    %cst_6 = arith.constant 1.280000e+02 : f32
    %6 = vector.broadcast %cst_6 : f32 to vector<3x1xf32>
    %7 = arith.divf %5, %6 : vector<3x1xf32>
    %8 = vector.broadcast %7 : vector<3x1xf32> to vector<3x128xf32>
    %9 = arith.subf %1, %8 : vector<3x128xf32>
    %10 = arith.mulf %9, %9 : vector<3x128xf32>
    %cst_7 = arith.constant dense<0.000000e+00> : vector<3xf32>
    %11 = vector.multi_reduction <add>, %10, %cst_7 [1] : vector<3x128xf32> to vector<3xf32>
    %12 = vector.shape_cast %11 : vector<3xf32> to vector<3x1xf32>
    %cst_8 = arith.constant 1.280000e+02 : f32
    %13 = vector.broadcast %cst_8 : f32 to vector<3x1xf32>
    %14 = arith.divf %12, %13 : vector<3x1xf32>
    %cst_9 = arith.constant 9.99999974E-6 : f32
    %15 = vector.broadcast %cst_9 : f32 to vector<3x1xf32>
    %16 = arith.addf %14, %15 : vector<3x1xf32>
    %17 = math.rsqrt %16 : vector<3x1xf32>
    %18 = vector.broadcast %17 : vector<3x1xf32> to vector<3x128xf32>
    %19 = arith.mulf %9, %18 : vector<3x128xf32>
    %20 = vector.broadcast %2 : vector<1x128xf32> to vector<3x128xf32>
    %21 = arith.mulf %19, %20 : vector<3x128xf32>
    %22 = vector.broadcast %3 : vector<1x128xf32> to vector<3x128xf32>
    %23 = arith.addf %21, %22 : vector<3x128xf32>
    %c0_10 = arith.constant 0 : index
    %c0_11 = arith.constant 0 : index
    %24 = vector.load %arg4[%c0_10, %c0_11] : memref<128x384xf32, #tpu.memory_space<vmem>>, vector<128x384xf32>
    %cst_12 = arith.constant dense<0.000000e+00> : vector<3x384xf32>
    %25 = tpu.matmul %23, %24, %cst_12 {dimension_numbers = #tpu.dot_dimension_numbers<[1], [0], [0], [1], [0, 0, 1, 1], [], []>} : vector<3x128xf32>, vector<128x384xf32>, vector<3x384xf32> -> vector<3x384xf32>
    %26 = vector.extract_strided_slice %25 {offsets = [0, 0], sizes = [3, 128], strides = [1, 1]} : vector<3x384xf32> to vector<3x128xf32>
    %27 = vector.extract_strided_slice %25 {offsets = [0, 128], sizes = [3, 128], strides = [1, 1]} : vector<3x384xf32> to vector<3x128xf32>
    %28 = vector.extract_strided_slice %25 {offsets = [0, 256], sizes = [3, 128], strides = [1, 1]} : vector<3x384xf32> to vector<3x128xf32>
    %c0_13 = arith.constant 0 : index
    %c0_14 = arith.constant 0 : index
    %29 = vector.load %arg5[%c0_13, %c0_14] : memref<128x128xf32, #tpu.memory_space<vmem>>, vector<128x128xf32>
    %cst_15 = arith.constant 0.000000e+00 : f32
    %30 = vector.broadcast %cst_15 : f32 to vector<3x128xf32>
    %31 = vector.extract_strided_slice %26 {offsets = [0, 0], sizes = [3, 32], strides = [1, 1]} : vector<3x128xf32> to vector<3x32xf32>
    %32 = vector.extract_strided_slice %27 {offsets = [0, 0], sizes = [3, 32], strides = [1, 1]} : vector<3x128xf32> to vector<3x32xf32>
    %33 = vector.extract_strided_slice %28 {offsets = [0, 0], sizes = [3, 32], strides = [1, 1]} : vector<3x128xf32> to vector<3x32xf32>
    %cst_16 = arith.constant dense<0.000000e+00> : vector<3x3xf32>
    %34 = tpu.matmul %31, %32, %cst_16 {dimension_numbers = #tpu.dot_dimension_numbers<[1], [1], [0], [0], [0, 0, 1, 0], [], []>} : vector<3x32xf32>, vector<3x32xf32>, vector<3x3xf32> -> vector<3x3xf32>
    %cst_17 = arith.constant 0.176776692 : f32
    %35 = vector.broadcast %cst_17 : f32 to vector<3x3xf32>
    %36 = arith.mulf %34, %35 : vector<3x3xf32>
    %cst_18 = arith.constant dense<0xFF800000> : vector<3xf32>
    %37 = vector.multi_reduction <maximumf>, %36, %cst_18 [1] : vector<3x3xf32> to vector<3xf32>
    %38 = vector.shape_cast %37 : vector<3xf32> to vector<3x1xf32>
    %39 = vector.broadcast %38 : vector<3x1xf32> to vector<3x3xf32>
    %40 = arith.subf %36, %39 : vector<3x3xf32>
    %41 = math.exp %40 : vector<3x3xf32>
    %cst_19 = arith.constant dense<0.000000e+00> : vector<3xf32>
    %42 = vector.multi_reduction <add>, %41, %cst_19 [1] : vector<3x3xf32> to vector<3xf32>
    %43 = vector.shape_cast %42 : vector<3xf32> to vector<3x1xf32>
    %44 = vector.broadcast %43 : vector<3x1xf32> to vector<3x3xf32>
    %45 = arith.divf %41, %44 : vector<3x3xf32>
    %cst_20 = arith.constant dense<0.000000e+00> : vector<3x32xf32>
    %46 = tpu.matmul %45, %33, %cst_20 {dimension_numbers = #tpu.dot_dimension_numbers<[1], [0], [0], [1], [0, 0, 1, 1], [], []>} : vector<3x3xf32>, vector<3x32xf32>, vector<3x32xf32> -> vector<3x32xf32>
    %47 = vector.extract_strided_slice %29 {offsets = [0, 0], sizes = [32, 128], strides = [1, 1]} : vector<128x128xf32> to vector<32x128xf32>
    %cst_21 = arith.constant dense<0.000000e+00> : vector<3x128xf32>
    %48 = tpu.matmul %46, %47, %cst_21 {dimension_numbers = #tpu.dot_dimension_numbers<[1], [0], [0], [1], [0, 0, 1, 1], [], []>} : vector<3x32xf32>, vector<32x128xf32>, vector<3x128xf32> -> vector<3x128xf32>
    %49 = arith.addf %30, %48 : vector<3x128xf32>
    %50 = vector.extract_strided_slice %26 {offsets = [0, 32], sizes = [3, 32], strides = [1, 1]} : vector<3x128xf32> to vector<3x32xf32>
    %51 = vector.extract_strided_slice %27 {offsets = [0, 32], sizes = [3, 32], strides = [1, 1]} : vector<3x128xf32> to vector<3x32xf32>
    %52 = vector.extract_strided_slice %28 {offsets = [0, 32], sizes = [3, 32], strides = [1, 1]} : vector<3x128xf32> to vector<3x32xf32>
    %cst_22 = arith.constant dense<0.000000e+00> : vector<3x3xf32>
    %53 = tpu.matmul %50, %51, %cst_22 {dimension_numbers = #tpu.dot_dimension_numbers<[1], [1], [0], [0], [0, 0, 1, 0], [], []>} : vector<3x32xf32>, vector<3x32xf32>, vector<3x3xf32> -> vector<3x3xf32>
    %cst_23 = arith.constant 0.176776692 : f32
    %54 = vector.broadcast %cst_23 : f32 to vector<3x3xf32>
    %55 = arith.mulf %53, %54 : vector<3x3xf32>
    %cst_24 = arith.constant dense<0xFF800000> : vector<3xf32>
    %56 = vector.multi_reduction <maximumf>, %55, %cst_24 [1] : vector<3x3xf32> to vector<3xf32>
    %57 = vector.shape_cast %56 : vector<3xf32> to vector<3x1xf32>
    %58 = vector.broadcast %57 : vector<3x1xf32> to vector<3x3xf32>
    %59 = arith.subf %55, %58 : vector<3x3xf32>
    %60 = math.exp %59 : vector<3x3xf32>
    %cst_25 = arith.constant dense<0.000000e+00> : vector<3xf32>
    %61 = vector.multi_reduction <add>, %60, %cst_25 [1] : vector<3x3xf32> to vector<3xf32>
    %62 = vector.shape_cast %61 : vector<3xf32> to vector<3x1xf32>
    %63 = vector.broadcast %62 : vector<3x1xf32> to vector<3x3xf32>
    %64 = arith.divf %60, %63 : vector<3x3xf32>
    %cst_26 = arith.constant dense<0.000000e+00> : vector<3x32xf32>
    %65 = tpu.matmul %64, %52, %cst_26 {dimension_numbers = #tpu.dot_dimension_numbers<[1], [0], [0], [1], [0, 0, 1, 1], [], []>} : vector<3x3xf32>, vector<3x32xf32>, vector<3x32xf32> -> vector<3x32xf32>
    %66 = vector.extract_strided_slice %29 {offsets = [32, 0], sizes = [32, 128], strides = [1, 1]} : vector<128x128xf32> to vector<32x128xf32>
    %cst_27 = arith.constant dense<0.000000e+00> : vector<3x128xf32>
    %67 = tpu.matmul %65, %66, %cst_27 {dimension_numbers = #tpu.dot_dimension_numbers<[1], [0], [0], [1], [0, 0, 1, 1], [], []>} : vector<3x32xf32>, vector<32x128xf32>, vector<3x128xf32> -> vector<3x128xf32>
    %68 = arith.addf %49, %67 : vector<3x128xf32>
    %69 = vector.extract_strided_slice %26 {offsets = [0, 64], sizes = [3, 32], strides = [1, 1]} : vector<3x128xf32> to vector<3x32xf32>
    %70 = vector.extract_strided_slice %27 {offsets = [0, 64], sizes = [3, 32], strides = [1, 1]} : vector<3x128xf32> to vector<3x32xf32>
    %71 = vector.extract_strided_slice %28 {offsets = [0, 64], sizes = [3, 32], strides = [1, 1]} : vector<3x128xf32> to vector<3x32xf32>
    %cst_28 = arith.constant dense<0.000000e+00> : vector<3x3xf32>
    %72 = tpu.matmul %69, %70, %cst_28 {dimension_numbers = #tpu.dot_dimension_numbers<[1], [1], [0], [0], [0, 0, 1, 0], [], []>} : vector<3x32xf32>, vector<3x32xf32>, vector<3x3xf32> -> vector<3x3xf32>
    %cst_29 = arith.constant 0.176776692 : f32
    %73 = vector.broadcast %cst_29 : f32 to vector<3x3xf32>
    %74 = arith.mulf %72, %73 : vector<3x3xf32>
    %cst_30 = arith.constant dense<0xFF800000> : vector<3xf32>
    %75 = vector.multi_reduction <maximumf>, %74, %cst_30 [1] : vector<3x3xf32> to vector<3xf32>
    %76 = vector.shape_cast %75 : vector<3xf32> to vector<3x1xf32>
    %77 = vector.broadcast %76 : vector<3x1xf32> to vector<3x3xf32>
    %78 = arith.subf %74, %77 : vector<3x3xf32>
    %79 = math.exp %78 : vector<3x3xf32>
    %cst_31 = arith.constant dense<0.000000e+00> : vector<3xf32>
    %80 = vector.multi_reduction <add>, %79, %cst_31 [1] : vector<3x3xf32> to vector<3xf32>
    %81 = vector.shape_cast %80 : vector<3xf32> to vector<3x1xf32>
    %82 = vector.broadcast %81 : vector<3x1xf32> to vector<3x3xf32>
    %83 = arith.divf %79, %82 : vector<3x3xf32>
    %cst_32 = arith.constant dense<0.000000e+00> : vector<3x32xf32>
    %84 = tpu.matmul %83, %71, %cst_32 {dimension_numbers = #tpu.dot_dimension_numbers<[1], [0], [0], [1], [0, 0, 1, 1], [], []>} : vector<3x3xf32>, vector<3x32xf32>, vector<3x32xf32> -> vector<3x32xf32>
    %85 = vector.extract_strided_slice %29 {offsets = [64, 0], sizes = [32, 128], strides = [1, 1]} : vector<128x128xf32> to vector<32x128xf32>
    %cst_33 = arith.constant dense<0.000000e+00> : vector<3x128xf32>
    %86 = tpu.matmul %84, %85, %cst_33 {dimension_numbers = #tpu.dot_dimension_numbers<[1], [0], [0], [1], [0, 0, 1, 1], [], []>} : vector<3x32xf32>, vector<32x128xf32>, vector<3x128xf32> -> vector<3x128xf32>
    %87 = arith.addf %68, %86 : vector<3x128xf32>
    %88 = vector.extract_strided_slice %26 {offsets = [0, 96], sizes = [3, 32], strides = [1, 1]} : vector<3x128xf32> to vector<3x32xf32>
    %89 = vector.extract_strided_slice %27 {offsets = [0, 96], sizes = [3, 32], strides = [1, 1]} : vector<3x128xf32> to vector<3x32xf32>
    %90 = vector.extract_strided_slice %28 {offsets = [0, 96], sizes = [3, 32], strides = [1, 1]} : vector<3x128xf32> to vector<3x32xf32>
    %cst_34 = arith.constant dense<0.000000e+00> : vector<3x3xf32>
    %91 = tpu.matmul %88, %89, %cst_34 {dimension_numbers = #tpu.dot_dimension_numbers<[1], [1], [0], [0], [0, 0, 1, 0], [], []>} : vector<3x32xf32>, vector<3x32xf32>, vector<3x3xf32> -> vector<3x3xf32>
    %cst_35 = arith.constant 0.176776692 : f32
    %92 = vector.broadcast %cst_35 : f32 to vector<3x3xf32>
    %93 = arith.mulf %91, %92 : vector<3x3xf32>
    %cst_36 = arith.constant dense<0xFF800000> : vector<3xf32>
    %94 = vector.multi_reduction <maximumf>, %93, %cst_36 [1] : vector<3x3xf32> to vector<3xf32>
    %95 = vector.shape_cast %94 : vector<3xf32> to vector<3x1xf32>
    %96 = vector.broadcast %95 : vector<3x1xf32> to vector<3x3xf32>
    %97 = arith.subf %93, %96 : vector<3x3xf32>
    %98 = math.exp %97 : vector<3x3xf32>
    %cst_37 = arith.constant dense<0.000000e+00> : vector<3xf32>
    %99 = vector.multi_reduction <add>, %98, %cst_37 [1] : vector<3x3xf32> to vector<3xf32>
    %100 = vector.shape_cast %99 : vector<3xf32> to vector<3x1xf32>
    %101 = vector.broadcast %100 : vector<3x1xf32> to vector<3x3xf32>
    %102 = arith.divf %98, %101 : vector<3x3xf32>
    %cst_38 = arith.constant dense<0.000000e+00> : vector<3x32xf32>
    %103 = tpu.matmul %102, %90, %cst_38 {dimension_numbers = #tpu.dot_dimension_numbers<[1], [0], [0], [1], [0, 0, 1, 1], [], []>} : vector<3x3xf32>, vector<3x32xf32>, vector<3x32xf32> -> vector<3x32xf32>
    %104 = vector.extract_strided_slice %29 {offsets = [96, 0], sizes = [32, 128], strides = [1, 1]} : vector<128x128xf32> to vector<32x128xf32>
    %cst_39 = arith.constant dense<0.000000e+00> : vector<3x128xf32>
    %105 = tpu.matmul %103, %104, %cst_39 {dimension_numbers = #tpu.dot_dimension_numbers<[1], [0], [0], [1], [0, 0, 1, 1], [], []>} : vector<3x32xf32>, vector<32x128xf32>, vector<3x128xf32> -> vector<3x128xf32>
    %106 = arith.addf %87, %105 : vector<3x128xf32>
    %c0_40 = arith.constant 0 : index
    %c0_41 = arith.constant 0 : index
    %107 = vector.load %arg6[%c0_40, %c0_41] : memref<1x128xf32, #tpu.memory_space<vmem>>, vector<1x128xf32>
    %108 = vector.broadcast %107 : vector<1x128xf32> to vector<3x128xf32>
    %109 = arith.addf %106, %108 : vector<3x128xf32>
    %110 = arith.addf %109, %23 : vector<3x128xf32>
    %c0_42 = arith.constant 0 : index
    %c0_43 = arith.constant 0 : index
    %111 = vector.load %arg7[%c0_42, %c0_43] : memref<1x128xf32, #tpu.memory_space<vmem>>, vector<1x128xf32>
    %c0_44 = arith.constant 0 : index
    %c0_45 = arith.constant 0 : index
    %112 = vector.load %arg8[%c0_44, %c0_45] : memref<1x128xf32, #tpu.memory_space<vmem>>, vector<1x128xf32>
    %cst_46 = arith.constant dense<0.000000e+00> : vector<3xf32>
    %113 = vector.multi_reduction <add>, %110, %cst_46 [1] : vector<3x128xf32> to vector<3xf32>
    %114 = vector.shape_cast %113 : vector<3xf32> to vector<3x1xf32>
    %cst_47 = arith.constant 1.280000e+02 : f32
    %115 = vector.broadcast %cst_47 : f32 to vector<3x1xf32>
    %116 = arith.divf %114, %115 : vector<3x1xf32>
    %117 = vector.broadcast %116 : vector<3x1xf32> to vector<3x128xf32>
    %118 = arith.subf %110, %117 : vector<3x128xf32>
    %119 = arith.mulf %118, %118 : vector<3x128xf32>
    %cst_48 = arith.constant dense<0.000000e+00> : vector<3xf32>
    %120 = vector.multi_reduction <add>, %119, %cst_48 [1] : vector<3x128xf32> to vector<3xf32>
    %121 = vector.shape_cast %120 : vector<3xf32> to vector<3x1xf32>
    %cst_49 = arith.constant 1.280000e+02 : f32
    %122 = vector.broadcast %cst_49 : f32 to vector<3x1xf32>
    %123 = arith.divf %121, %122 : vector<3x1xf32>
    %cst_50 = arith.constant 9.99999974E-6 : f32
    %124 = vector.broadcast %cst_50 : f32 to vector<3x1xf32>
    %125 = arith.addf %123, %124 : vector<3x1xf32>
    %126 = math.rsqrt %125 : vector<3x1xf32>
    %127 = vector.broadcast %126 : vector<3x1xf32> to vector<3x128xf32>
    %128 = arith.mulf %118, %127 : vector<3x128xf32>
    %129 = vector.broadcast %111 : vector<1x128xf32> to vector<3x128xf32>
    %130 = arith.mulf %128, %129 : vector<3x128xf32>
    %131 = vector.broadcast %112 : vector<1x128xf32> to vector<3x128xf32>
    %132 = arith.addf %130, %131 : vector<3x128xf32>
    %c0_51 = arith.constant 0 : index
    %c0_52 = arith.constant 0 : index
    %133 = vector.load %arg9[%c0_51, %c0_52] : memref<128x512xf32, #tpu.memory_space<vmem>>, vector<128x512xf32>
    %cst_53 = arith.constant dense<0.000000e+00> : vector<3x512xf32>
    %134 = tpu.matmul %132, %133, %cst_53 {dimension_numbers = #tpu.dot_dimension_numbers<[1], [0], [0], [1], [0, 0, 1, 1], [], []>} : vector<3x128xf32>, vector<128x512xf32>, vector<3x512xf32> -> vector<3x512xf32>
    %c0_54 = arith.constant 0 : index
    %c0_55 = arith.constant 0 : index
    %135 = vector.load %arg10[%c0_54, %c0_55] : memref<1x512xf32, #tpu.memory_space<vmem>>, vector<1x512xf32>
    %136 = vector.broadcast %135 : vector<1x512xf32> to vector<3x512xf32>
    %137 = arith.addf %134, %136 : vector<3x512xf32>
    %cst_56 = arith.constant 5.000000e-01 : f32
    %138 = vector.broadcast %cst_56 : f32 to vector<3x512xf32>
    %139 = arith.mulf %138, %137 : vector<3x512xf32>
    %cst_57 = arith.constant 0.707106769 : f32
    %140 = vector.broadcast %cst_57 : f32 to vector<3x512xf32>
    %141 = arith.mulf %137, %140 : vector<3x512xf32>
    %142 = math.erf %141 : vector<3x512xf32>
    %cst_58 = arith.constant 1.000000e+00 : f32
    %143 = vector.broadcast %cst_58 : f32 to vector<3x512xf32>
    %144 = arith.addf %143, %142 : vector<3x512xf32>
    %145 = arith.mulf %139, %144 : vector<3x512xf32>
    %c0_59 = arith.constant 0 : index
    %c0_60 = arith.constant 0 : index
    %146 = vector.load %arg11[%c0_59, %c0_60] : memref<512x128xf32, #tpu.memory_space<vmem>>, vector<512x128xf32>
    %cst_61 = arith.constant dense<0.000000e+00> : vector<3x128xf32>
    %147 = tpu.matmul %145, %146, %cst_61 {dimension_numbers = #tpu.dot_dimension_numbers<[1], [0], [0], [1], [0, 0, 1, 1], [], []>} : vector<3x512xf32>, vector<512x128xf32>, vector<3x128xf32> -> vector<3x128xf32>
    %c0_62 = arith.constant 0 : index
    %c0_63 = arith.constant 0 : index
    %148 = vector.load %arg12[%c0_62, %c0_63] : memref<1x128xf32, #tpu.memory_space<vmem>>, vector<1x128xf32>
    %149 = vector.broadcast %148 : vector<1x128xf32> to vector<3x128xf32>
    %150 = arith.addf %147, %149 : vector<3x128xf32>
    %151 = arith.addf %150, %132 : vector<3x128xf32>
    %c0_64 = arith.constant 0 : index
    %c0_65 = arith.constant 0 : index
    %c0_66 = arith.constant 0 : index
    %152 = vector.load %arg13[%c0_64, %c0_65, %c0_66] : memref<1x3x128xf32, #tpu.memory_space<vmem>>, vector<1x3x128xf32>
    %153 = vector.shape_cast %152 : vector<1x3x128xf32> to vector<3x128xf32>
    %154 = vector.shape_cast %151 : vector<3x128xf32> to vector<1x3x128xf32>
    tpu.vector_store %arg13[%c0_64, %c0_65, %c0_66], %154 {strides = array<i32>} : memref<1x3x128xf32, #tpu.memory_space<vmem>>, vector<1x3x128xf32>,
    return
  }
  func.func @transform_0(%arg0: i32) -> (i32, i32, i32) {
    %c0_i32 = arith.constant 0 : i32
    %c0_i32_0 = arith.constant 0 : i32
    %c0_i32_1 = arith.constant 0 : i32
    return %arg0, %c0_i32, %c0_i32_0 : i32, i32, i32
  }
  func.func @transform_1(%arg0: i32) -> (i32, i32) {
    %c0_i32 = arith.constant 0 : i32
    %c0_i32_0 = arith.constant 0 : i32
    %c0_i32_1 = arith.constant 0 : i32
    return %c0_i32, %c0_i32_0 : i32, i32
  }
  func.func @transform_2(%arg0: i32) -> (i32, i32) {
    %c0_i32 = arith.constant 0 : i32
    %c0_i32_0 = arith.constant 0 : i32
    %c0_i32_1 = arith.constant 0 : i32
    return %c0_i32, %c0_i32_0 : i32, i32
  }
  func.func @transform_3(%arg0: i32) -> (i32, i32) {
    %c0_i32 = arith.constant 0 : i32
    %c0_i32_0 = arith.constant 0 : i32
    %c0_i32_1 = arith.constant 0 : i32
    return %c0_i32, %c0_i32_0 : i32, i32
  }
  func.func @transform_4(%arg0: i32) -> (i32, i32) {
    %c0_i32 = arith.constant 0 : i32
    %c0_i32_0 = arith.constant 0 : i32
    %c0_i32_1 = arith.constant 0 : i32
    return %c0_i32, %c0_i32_0 : i32, i32
  }
  func.func @transform_5(%arg0: i32) -> (i32, i32) {
    %c0_i32 = arith.constant 0 : i32
    %c0_i32_0 = arith.constant 0 : i32
    %c0_i32_1 = arith.constant 0 : i32
    return %c0_i32, %c0_i32_0 : i32, i32
  }
  func.func @transform_6(%arg0: i32) -> (i32, i32) {
    %c0_i32 = arith.constant 0 : i32
    %c0_i32_0 = arith.constant 0 : i32
    %c0_i32_1 = arith.constant 0 : i32
    return %c0_i32, %c0_i32_0 : i32, i32
  }
  func.func @transform_7(%arg0: i32) -> (i32, i32) {
    %c0_i32 = arith.constant 0 : i32
    %c0_i32_0 = arith.constant 0 : i32
    %c0_i32_1 = arith.constant 0 : i32
    return %c0_i32, %c0_i32_0 : i32, i32
  }
  func.func @transform_8(%arg0: i32) -> (i32, i32) {
    %c0_i32 = arith.constant 0 : i32
    %c0_i32_0 = arith.constant 0 : i32
    %c0_i32_1 = arith.constant 0 : i32
    return %c0_i32, %c0_i32_0 : i32, i32
  }
  func.func @transform_9(%arg0: i32) -> (i32, i32) {
    %c0_i32 = arith.constant 0 : i32
    %c0_i32_0 = arith.constant 0 : i32
    %c0_i32_1 = arith.constant 0 : i32
    return %c0_i32, %c0_i32_0 : i32, i32
  }
  func.func @transform_10(%arg0: i32) -> (i32, i32) {
    %c0_i32 = arith.constant 0 : i32
    %c0_i32_0 = arith.constant 0 : i32
    %c0_i32_1 = arith.constant 0 : i32
    return %c0_i32, %c0_i32_0 : i32, i32
  }
  func.func @transform_11(%arg0: i32) -> (i32, i32) {
    %c0_i32 = arith.constant 0 : i32
    %c0_i32_0 = arith.constant 0 : i32
    %c0_i32_1 = arith.constant 0 : i32
    return %c0_i32, %c0_i32_0 : i32, i32
  }
  func.func @transform_12(%arg0: i32) -> (i32, i32, i32) {
    %c0_i32 = arith.constant 0 : i32
    %c0_i32_0 = arith.constant 0 : i32
    %c0_i32_1 = arith.constant 0 : i32
    return %arg0, %c0_i32, %c0_i32_0 : i32, i32, i32
  }
}

module attributes {stable_mosaic.version = 11 : i64} {
  func.func @_encoder_block_kernel(%arg0: i32, %arg1: memref<1x3x128xf32, #tpu.memory_space<vmem>>, %arg2: memref<1x128xf32, #tpu.memory_space<vmem>>, %arg3: memref<1x128xf32, #tpu.memory_space<vmem>>, %arg4: memref<128x384xf32, #tpu.memory_space<vmem>>, %arg5: memref<128x128xf32, #tpu.memory_space<vmem>>, %arg6: memref<1x128xf32, #tpu.memory_space<vmem>>, %arg7: memref<1x128xf32, #tpu.memory_space<vmem>>, %arg8: memref<1x128xf32, #tpu.memory_space<vmem>>, %arg9: memref<128x512xf32, #tpu.memory_space<vmem>>, %arg10: memref<1x512xf32, #tpu.memory_space<vmem>>, %arg11: memref<512x128xf32, #tpu.memory_space<vmem>>, %arg12: memref<1x128xf32, #tpu.memory_space<vmem>>, %arg13: memref<1x3x128xf32, #tpu.memory_space<vmem>>) attributes {dimension_semantics = [#tpu.dimension_semantics<parallel>], iteration_bounds = array<i64: 16>, scalar_prefetch = 0 : i64, scratch_operands = 0 : i64, tpu.core_type = #tpu.core_type<tc>, window_params = [{transform_indices = @transform_0, window_bounds = array<i64: 1, 3, 128>}, {pipeline_mode = #tpu.pipeline_mode<synchronous>, transform_indices = @transform_1, window_bounds = array<i64: 1, 128>}, {pipeline_mode = #tpu.pipeline_mode<synchronous>, transform_indices = @transform_2, window_bounds = array<i64: 1, 128>}, {pipeline_mode = #tpu.pipeline_mode<synchronous>, transform_indices = @transform_3, window_bounds = array<i64: 128, 384>}, {pipeline_mode = #tpu.pipeline_mode<synchronous>, transform_indices = @transform_4, window_bounds = array<i64: 128, 128>}, {pipeline_mode = #tpu.pipeline_mode<synchronous>, transform_indices = @transform_5, window_bounds = array<i64: 1, 128>}, {pipeline_mode = #tpu.pipeline_mode<synchronous>, transform_indices = @transform_6, window_bounds = array<i64: 1, 128>}, {pipeline_mode = #tpu.pipeline_mode<synchronous>, transform_indices = @transform_7, window_bounds = array<i64: 1, 128>}, {pipeline_mode = #tpu.pipeline_mode<synchronous>, transform_indices = @transform_8, window_bounds = array<i64: 128, 512>}, {pipeline_mode = #tpu.pipeline_mode<synchronous>, transform_indices = @transform_9, window_bounds = array<i64: 1, 512>}, {pipeline_mode = #tpu.pipeline_mode<synchronous>, transform_indices = @transform_10, window_bounds = array<i64: 512, 128>}, {pipeline_mode = #tpu.pipeline_mode<synchronous>, transform_indices = @transform_11, window_bounds = array<i64: 1, 128>}, {transform_indices = @transform_12, window_bounds = array<i64: 1, 3, 128>}]} {
    %c0 = arith.constant 0 : index
    %c0_0 = arith.constant 0 : index
    %c0_1 = arith.constant 0 : index
    %0 = vector.load %arg1[%c0, %c0_0, %c0_1] : memref<1x3x128xf32, #tpu.memory_space<vmem>>, vector<1x3x128xf32>
    %1 = vector.shape_cast %0 : vector<1x3x128xf32> to vector<3x128xf32>
    %c0_2 = arith.constant 0 : index
    %c0_3 = arith.constant 0 : index
    %2 = vector.load %arg2[%c0_2, %c0_3] : memref<1x128xf32, #tpu.memory_space<vmem>>, vector<1x128xf32>
    %c0_4 = arith.constant 0 : index
    %c0_5 = arith.constant 0 : index
    %3 = vector.load %arg3[%c0_4, %c0_5] : memref<1x128xf32, #tpu.memory_space<vmem>>, vector<1x128xf32>
    %cst = arith.constant dense<0.000000e+00> : vector<3xf32>
    %4 = vector.multi_reduction <add>, %1, %cst [1] : vector<3x128xf32> to vector<3xf32>
    %5 = vector.shape_cast %4 : vector<3xf32> to vector<3x1xf32>
    %cst_6 = arith.constant 1.280000e+02 : f32
    %6 = vector.broadcast %cst_6 : f32 to vector<3x1xf32>
    %7 = arith.divf %5, %6 : vector<3x1xf32>
    %8 = vector.broadcast %7 : vector<3x1xf32> to vector<3x128xf32>
    %9 = arith.subf %1, %8 : vector<3x128xf32>
    %10 = arith.mulf %9, %9 : vector<3x128xf32>
    %cst_7 = arith.constant dense<0.000000e+00> : vector<3xf32>
    %11 = vector.multi_reduction <add>, %10, %cst_7 [1] : vector<3x128xf32> to vector<3xf32>
    %12 = vector.shape_cast %11 : vector<3xf32> to vector<3x1xf32>
    %cst_8 = arith.constant 1.280000e+02 : f32
    %13 = vector.broadcast %cst_8 : f32 to vector<3x1xf32>
    %14 = arith.divf %12, %13 : vector<3x1xf32>
    %cst_9 = arith.constant 9.99999974E-6 : f32
    %15 = vector.broadcast %cst_9 : f32 to vector<3x1xf32>
    %16 = arith.addf %14, %15 : vector<3x1xf32>
    %17 = math.rsqrt %16 : vector<3x1xf32>
    %18 = vector.broadcast %17 : vector<3x1xf32> to vector<3x128xf32>
    %19 = arith.mulf %9, %18 : vector<3x128xf32>
    %20 = vector.broadcast %2 : vector<1x128xf32> to vector<3x128xf32>
    %21 = arith.mulf %19, %20 : vector<3x128xf32>
    %22 = vector.broadcast %3 : vector<1x128xf32> to vector<3x128xf32>
    %23 = arith.addf %21, %22 : vector<3x128xf32>
    %c0_10 = arith.constant 0 : index
    %c0_11 = arith.constant 0 : index
    %24 = vector.load %arg4[%c0_10, %c0_11] : memref<128x384xf32, #tpu.memory_space<vmem>>, vector<128x384xf32>
    %cst_12 = arith.constant dense<0.000000e+00> : vector<3x384xf32>
    %25 = tpu.matmul %23, %24, %cst_12 {dimension_numbers = #tpu.dot_dimension_numbers<[1], [0], [0], [1], [0, 0, 1, 1], [], []>} : vector<3x128xf32>, vector<128x384xf32>, vector<3x384xf32> -> vector<3x384xf32>
    %26 = vector.extract_strided_slice %25 {offsets = [0, 0], sizes = [3, 128], strides = [1, 1]} : vector<3x384xf32> to vector<3x128xf32>
    %27 = vector.extract_strided_slice %25 {offsets = [0, 128], sizes = [3, 128], strides = [1, 1]} : vector<3x384xf32> to vector<3x128xf32>
    %28 = vector.extract_strided_slice %25 {offsets = [0, 256], sizes = [3, 128], strides = [1, 1]} : vector<3x384xf32> to vector<3x128xf32>
    %c0_13 = arith.constant 0 : index
    %c0_14 = arith.constant 0 : index
    %29 = vector.load %arg5[%c0_13, %c0_14] : memref<128x128xf32, #tpu.memory_space<vmem>>, vector<128x128xf32>
    %cst_15 = arith.constant 0.000000e+00 : f32
    %30 = vector.broadcast %cst_15 : f32 to vector<3x128xf32>
    %31 = vector.extract_strided_slice %26 {offsets = [0, 0], sizes = [3, 32], strides = [1, 1]} : vector<3x128xf32> to vector<3x32xf32>
    %32 = vector.extract_strided_slice %27 {offsets = [0, 0], sizes = [3, 32], strides = [1, 1]} : vector<3x128xf32> to vector<3x32xf32>
    %33 = vector.extract_strided_slice %28 {offsets = [0, 0], sizes = [3, 32], strides = [1, 1]} : vector<3x128xf32> to vector<3x32xf32>
    %cst_16 = arith.constant dense<0.000000e+00> : vector<3x3xf32>
    %34 = tpu.matmul %31, %32, %cst_16 {dimension_numbers = #tpu.dot_dimension_numbers<[1], [1], [0], [0], [0, 0, 1, 0], [], []>} : vector<3x32xf32>, vector<3x32xf32>, vector<3x3xf32> -> vector<3x3xf32>
    %cst_17 = arith.constant 0.176776692 : f32
    %35 = vector.broadcast %cst_17 : f32 to vector<3x3xf32>
    %36 = arith.mulf %34, %35 : vector<3x3xf32>
    %cst_18 = arith.constant dense<0xFF800000> : vector<3xf32>
    %37 = vector.multi_reduction <maximumf>, %36, %cst_18 [1] : vector<3x3xf32> to vector<3xf32>
    %38 = vector.shape_cast %37 : vector<3xf32> to vector<3x1xf32>
    %39 = vector.broadcast %38 : vector<3x1xf32> to vector<3x3xf32>
    %40 = arith.subf %36, %39 : vector<3x3xf32>
    %41 = math.exp %40 : vector<3x3xf32>
    %cst_19 = arith.constant dense<0.000000e+00> : vector<3xf32>
    %42 = vector.multi_reduction <add>, %41, %cst_19 [1] : vector<3x3xf32> to vector<3xf32>
    %43 = vector.shape_cast %42 : vector<3xf32> to vector<3x1xf32>
    %44 = vector.broadcast %43 : vector<3x1xf32> to vector<3x3xf32>
    %45 = arith.divf %41, %44 : vector<3x3xf32>
    %cst_20 = arith.constant dense<0.000000e+00> : vector<3x32xf32>
    %46 = tpu.matmul %45, %33, %cst_20 {dimension_numbers = #tpu.dot_dimension_numbers<[1], [0], [0], [1], [0, 0, 1, 1], [], []>} : vector<3x3xf32>, vector<3x32xf32>, vector<3x32xf32> -> vector<3x32xf32>
    %47 = vector.extract_strided_slice %29 {offsets = [0, 0], sizes = [32, 128], strides = [1, 1]} : vector<128x128xf32> to vector<32x128xf32>
    %cst_21 = arith.constant dense<0.000000e+00> : vector<3x128xf32>
    %48 = tpu.matmul %46, %47, %cst_21 {dimension_numbers = #tpu.dot_dimension_numbers<[1], [0], [0], [1], [0, 0, 1, 1], [], []>} : vector<3x32xf32>, vector<32x128xf32>, vector<3x128xf32> -> vector<3x128xf32>
    %49 = arith.addf %30, %48 : vector<3x128xf32>
    %50 = vector.extract_strided_slice %26 {offsets = [0, 32], sizes = [3, 32], strides = [1, 1]} : vector<3x128xf32> to vector<3x32xf32>
    %51 = vector.extract_strided_slice %27 {offsets = [0, 32], sizes = [3, 32], strides = [1, 1]} : vector<3x128xf32> to vector<3x32xf32>
    %52 = vector.extract_strided_slice %28 {offsets = [0, 32], sizes = [3, 32], strides = [1, 1]} : vector<3x128xf32> to vector<3x32xf32>
    %cst_22 = arith.constant dense<0.000000e+00> : vector<3x3xf32>
    %53 = tpu.matmul %50, %51, %cst_22 {dimension_numbers = #tpu.dot_dimension_numbers<[1], [1], [0], [0], [0, 0, 1, 0], [], []>} : vector<3x32xf32>, vector<3x32xf32>, vector<3x3xf32> -> vector<3x3xf32>
    %cst_23 = arith.constant 0.176776692 : f32
    %54 = vector.broadcast %cst_23 : f32 to vector<3x3xf32>
    %55 = arith.mulf %53, %54 : vector<3x3xf32>
    %cst_24 = arith.constant dense<0xFF800000> : vector<3xf32>
    %56 = vector.multi_reduction <maximumf>, %55, %cst_24 [1] : vector<3x3xf32> to vector<3xf32>
    %57 = vector.shape_cast %56 : vector<3xf32> to vector<3x1xf32>
    %58 = vector.broadcast %57 : vector<3x1xf32> to vector<3x3xf32>
    %59 = arith.subf %55, %58 : vector<3x3xf32>
    %60 = math.exp %59 : vector<3x3xf32>
    %cst_25 = arith.constant dense<0.000000e+00> : vector<3xf32>
    %61 = vector.multi_reduction <add>, %60, %cst_25 [1] : vector<3x3xf32> to vector<3xf32>
    %62 = vector.shape_cast %61 : vector<3xf32> to vector<3x1xf32>
    %63 = vector.broadcast %62 : vector<3x1xf32> to vector<3x3xf32>
    %64 = arith.divf %60, %63 : vector<3x3xf32>
    %cst_26 = arith.constant dense<0.000000e+00> : vector<3x32xf32>
    %65 = tpu.matmul %64, %52, %cst_26 {dimension_numbers = #tpu.dot_dimension_numbers<[1], [0], [0], [1], [0, 0, 1, 1], [], []>} : vector<3x3xf32>, vector<3x32xf32>, vector<3x32xf32> -> vector<3x32xf32>
    %66 = vector.extract_strided_slice %29 {offsets = [32, 0], sizes = [32, 128], strides = [1, 1]} : vector<128x128xf32> to vector<32x128xf32>
    %cst_27 = arith.constant dense<0.000000e+00> : vector<3x128xf32>
    %67 = tpu.matmul %65, %66, %cst_27 {dimension_numbers = #tpu.dot_dimension_numbers<[1], [0], [0], [1], [0, 0, 1, 1], [], []>} : vector<3x32xf32>, vector<32x128xf32>, vector<3x128xf32> -> vector<3x128xf32>
    %68 = arith.addf %49, %67 : vector<3x128xf32>
    %69 = vector.extract_strided_slice %26 {offsets = [0, 64], sizes = [3, 32], strides = [1, 1]} : vector<3x128xf32> to vector<3x32xf32>
    %70 = vector.extract_strided_slice %27 {offsets = [0, 64], sizes = [3, 32], strides = [1, 1]} : vector<3x128xf32> to vector<3x32xf32>
    %71 = vector.extract_strided_slice %28 {offsets = [0, 64], sizes = [3, 32], strides = [1, 1]} : vector<3x128xf32> to vector<3x32xf32>
    %cst_28 = arith.constant dense<0.000000e+00> : vector<3x3xf32>
    %72 = tpu.matmul %69, %70, %cst_28 {dimension_numbers = #tpu.dot_dimension_numbers<[1], [1], [0], [0], [0, 0, 1, 0], [], []>} : vector<3x32xf32>, vector<3x32xf32>, vector<3x3xf32> -> vector<3x3xf32>
    %cst_29 = arith.constant 0.176776692 : f32
    %73 = vector.broadcast %cst_29 : f32 to vector<3x3xf32>
    %74 = arith.mulf %72, %73 : vector<3x3xf32>
    %cst_30 = arith.constant dense<0xFF800000> : vector<3xf32>
    %75 = vector.multi_reduction <maximumf>, %74, %cst_30 [1] : vector<3x3xf32> to vector<3xf32>
    %76 = vector.shape_cast %75 : vector<3xf32> to vector<3x1xf32>
    %77 = vector.broadcast %76 : vector<3x1xf32> to vector<3x3xf32>
    %78 = arith.subf %74, %77 : vector<3x3xf32>
    %79 = math.exp %78 : vector<3x3xf32>
    %cst_31 = arith.constant dense<0.000000e+00> : vector<3xf32>
    %80 = vector.multi_reduction <add>, %79, %cst_31 [1] : vector<3x3xf32> to vector<3xf32>
    %81 = vector.shape_cast %80 : vector<3xf32> to vector<3x1xf32>
    %82 = vector.broadcast %81 : vector<3x1xf32> to vector<3x3xf32>
    %83 = arith.divf %79, %82 : vector<3x3xf32>
    %cst_32 = arith.constant dense<0.000000e+00> : vector<3x32xf32>
    %84 = tpu.matmul %83, %71, %cst_32 {dimension_numbers = #tpu.dot_dimension_numbers<[1], [0], [0], [1], [0, 0, 1, 1], [], []>} : vector<3x3xf32>, vector<3x32xf32>, vector<3x32xf32> -> vector<3x32xf32>
    %85 = vector.extract_strided_slice %29 {offsets = [64, 0], sizes = [32, 128], strides = [1, 1]} : vector<128x128xf32> to vector<32x128xf32>
    %cst_33 = arith.constant dense<0.000000e+00> : vector<3x128xf32>
    %86 = tpu.matmul %84, %85, %cst_33 {dimension_numbers = #tpu.dot_dimension_numbers<[1], [0], [0], [1], [0, 0, 1, 1], [], []>} : vector<3x32xf32>, vector<32x128xf32>, vector<3x128xf32> -> vector<3x128xf32>
    %87 = arith.addf %68, %86 : vector<3x128xf32>
    %88 = vector.extract_strided_slice %26 {offsets = [0, 96], sizes = [3, 32], strides = [1, 1]} : vector<3x128xf32> to vector<3x32xf32>
    %89 = vector.extract_strided_slice %27 {offsets = [0, 96], sizes = [3, 32], strides = [1, 1]} : vector<3x128xf32> to vector<3x32xf32>
    %90 = vector.extract_strided_slice %28 {offsets = [0, 96], sizes = [3, 32], strides = [1, 1]} : vector<3x128xf32> to vector<3x32xf32>
    %cst_34 = arith.constant dense<0.000000e+00> : vector<3x3xf32>
    %91 = tpu.matmul %88, %89, %cst_34 {dimension_numbers = #tpu.dot_dimension_numbers<[1], [1], [0], [0], [0, 0, 1, 0], [], []>} : vector<3x32xf32>, vector<3x32xf32>, vector<3x3xf32> -> vector<3x3xf32>
    %cst_35 = arith.constant 0.176776692 : f32
    %92 = vector.broadcast %cst_35 : f32 to vector<3x3xf32>
    %93 = arith.mulf %91, %92 : vector<3x3xf32>
    %cst_36 = arith.constant dense<0xFF800000> : vector<3xf32>
    %94 = vector.multi_reduction <maximumf>, %93, %cst_36 [1] : vector<3x3xf32> to vector<3xf32>
    %95 = vector.shape_cast %94 : vector<3xf32> to vector<3x1xf32>
    %96 = vector.broadcast %95 : vector<3x1xf32> to vector<3x3xf32>
    %97 = arith.subf %93, %96 : vector<3x3xf32>
    %98 = math.exp %97 : vector<3x3xf32>
    %cst_37 = arith.constant dense<0.000000e+00> : vector<3xf32>
    %99 = vector.multi_reduction <add>, %98, %cst_37 [1] : vector<3x3xf32> to vector<3xf32>
    %100 = vector.shape_cast %99 : vector<3xf32> to vector<3x1xf32>
    %101 = vector.broadcast %100 : vector<3x1xf32> to vector<3x3xf32>
    %102 = arith.divf %98, %101 : vector<3x3xf32>
    %cst_38 = arith.constant dense<0.000000e+00> : vector<3x32xf32>
    %103 = tpu.matmul %102, %90, %cst_38 {dimension_numbers = #tpu.dot_dimension_numbers<[1], [0], [0], [1], [0, 0, 1, 1], [], []>} : vector<3x3xf32>, vector<3x32xf32>, vector<3x32xf32> -> vector<3x32xf32>
    %104 = vector.extract_strided_slice %29 {offsets = [96, 0], sizes = [32, 128], strides = [1, 1]} : vector<128x128xf32> to vector<32x128xf32>
    %cst_39 = arith.constant dense<0.000000e+00> : vector<3x128xf32>
    %105 = tpu.matmul %103, %104, %cst_39 {dimension_numbers = #tpu.dot_dimension_numbers<[1], [0], [0], [1], [0, 0, 1, 1], [], []>} : vector<3x32xf32>, vector<32x128xf32>, vector<3x128xf32> -> vector<3x128xf32>
    %106 = arith.addf %87, %105 : vector<3x128xf32>
    %c0_40 = arith.constant 0 : index
    %c0_41 = arith.constant 0 : index
    %107 = vector.load %arg6[%c0_40, %c0_41] : memref<1x128xf32, #tpu.memory_space<vmem>>, vector<1x128xf32>
    %108 = vector.broadcast %107 : vector<1x128xf32> to vector<3x128xf32>
    %109 = arith.addf %106, %108 : vector<3x128xf32>
    %110 = arith.addf %109, %23 : vector<3x128xf32>
    %c0_42 = arith.constant 0 : index
    %c0_43 = arith.constant 0 : index
    %111 = vector.load %arg7[%c0_42, %c0_43] : memref<1x128xf32, #tpu.memory_space<vmem>>, vector<1x128xf32>
    %c0_44 = arith.constant 0 : index
    %c0_45 = arith.constant 0 : index
    %112 = vector.load %arg8[%c0_44, %c0_45] : memref<1x128xf32, #tpu.memory_space<vmem>>, vector<1x128xf32>
    %cst_46 = arith.constant dense<0.000000e+00> : vector<3xf32>
    %113 = vector.multi_reduction <add>, %110, %cst_46 [1] : vector<3x128xf32> to vector<3xf32>
    %114 = vector.shape_cast %113 : vector<3xf32> to vector<3x1xf32>
    %cst_47 = arith.constant 1.280000e+02 : f32
    %115 = vector.broadcast %cst_47 : f32 to vector<3x1xf32>
    %116 = arith.divf %114, %115 : vector<3x1xf32>
    %117 = vector.broadcast %116 : vector<3x1xf32> to vector<3x128xf32>
    %118 = arith.subf %110, %117 : vector<3x128xf32>
    %119 = arith.mulf %118, %118 : vector<3x128xf32>
    %cst_48 = arith.constant dense<0.000000e+00> : vector<3xf32>
    %120 = vector.multi_reduction <add>, %119, %cst_48 [1] : vector<3x128xf32> to vector<3xf32>
    %121 = vector.shape_cast %120 : vector<3xf32> to vector<3x1xf32>
    %cst_49 = arith.constant 1.280000e+02 : f32
    %122 = vector.broadcast %cst_49 : f32 to vector<3x1xf32>
    %123 = arith.divf %121, %122 : vector<3x1xf32>
    %cst_50 = arith.constant 9.99999974E-6 : f32
    %124 = vector.broadcast %cst_50 : f32 to vector<3x1xf32>
    %125 = arith.addf %123, %124 : vector<3x1xf32>
    %126 = math.rsqrt %125 : vector<3x1xf32>
    %127 = vector.broadcast %126 : vector<3x1xf32> to vector<3x128xf32>
    %128 = arith.mulf %118, %127 : vector<3x128xf32>
    %129 = vector.broadcast %111 : vector<1x128xf32> to vector<3x128xf32>
    %130 = arith.mulf %128, %129 : vector<3x128xf32>
    %131 = vector.broadcast %112 : vector<1x128xf32> to vector<3x128xf32>
    %132 = arith.addf %130, %131 : vector<3x128xf32>
    %c0_51 = arith.constant 0 : index
    %c0_52 = arith.constant 0 : index
    %133 = vector.load %arg9[%c0_51, %c0_52] : memref<128x512xf32, #tpu.memory_space<vmem>>, vector<128x512xf32>
    %cst_53 = arith.constant dense<0.000000e+00> : vector<3x512xf32>
    %134 = tpu.matmul %132, %133, %cst_53 {dimension_numbers = #tpu.dot_dimension_numbers<[1], [0], [0], [1], [0, 0, 1, 1], [], []>} : vector<3x128xf32>, vector<128x512xf32>, vector<3x512xf32> -> vector<3x512xf32>
    %c0_54 = arith.constant 0 : index
    %c0_55 = arith.constant 0 : index
    %135 = vector.load %arg10[%c0_54, %c0_55] : memref<1x512xf32, #tpu.memory_space<vmem>>, vector<1x512xf32>
    %136 = vector.broadcast %135 : vector<1x512xf32> to vector<3x512xf32>
    %137 = arith.addf %134, %136 : vector<3x512xf32>
    %cst_56 = arith.constant 5.000000e-01 : f32
    %138 = vector.broadcast %cst_56 : f32 to vector<3x512xf32>
    %139 = arith.mulf %138, %137 : vector<3x512xf32>
    %cst_57 = arith.constant 0.707106769 : f32
    %140 = vector.broadcast %cst_57 : f32 to vector<3x512xf32>
    %141 = arith.mulf %137, %140 : vector<3x512xf32>
    %142 = math.erf %141 : vector<3x512xf32>
    %cst_58 = arith.constant 1.000000e+00 : f32
    %143 = vector.broadcast %cst_58 : f32 to vector<3x512xf32>
    %144 = arith.addf %143, %142 : vector<3x512xf32>
    %145 = arith.mulf %139, %144 : vector<3x512xf32>
    %c0_59 = arith.constant 0 : index
    %c0_60 = arith.constant 0 : index
    %146 = vector.load %arg11[%c0_59, %c0_60] : memref<512x128xf32, #tpu.memory_space<vmem>>, vector<512x128xf32>
    %cst_61 = arith.constant dense<0.000000e+00> : vector<3x128xf32>
    %147 = tpu.matmul %145, %146, %cst_61 {dimension_numbers = #tpu.dot_dimension_numbers<[1], [0], [0], [1], [0, 0, 1, 1], [], []>} : vector<3x512xf32>, vector<512x128xf32>, vector<3x128xf32> -> vector<3x128xf32>
    %c0_62 = arith.constant 0 : index
    %c0_63 = arith.constant 0 : index
    %148 = vector.load %arg12[%c0_62, %c0_63] : memref<1x128xf32, #tpu.memory_space<vmem>>, vector<1x128xf32>
    %149 = vector.broadcast %148 : vector<1x128xf32> to vector<3x128xf32>
    %150 = arith.addf %147, %149 : vector<3x128xf32>
    %151 = arith.addf %150, %132 : vector<3x128xf32>
    %c0_64 = arith.constant 0 : index
    %c0_65 = arith.constant 0 : index
    %c0_66 = arith.constant 0 : index
    %152 = vector.load %arg13[%c0_64, %c0_65, %c0_66] : memref<1x3x128xf32, #tpu.memory_space<vmem>>, vector<1x3x128xf32>
    %153 = vector.shape_cast %152 : vector<1x3x128xf32> to vector<3x128xf32>
    %154 = vector.shape_cast %151 : vector<3x128xf32> to vector<1x3x128xf32>
    tpu.vector_store %arg13[%c0_64, %c0_65, %c0_66], %154 {strides = array<i32>} : memref<1x3x128xf32, #tpu.memory_space<vmem>>, vector<1x3x128xf32>,
    return
  }
  func.func @transform_0(%arg0: i32) -> (i32, i32, i32) {
    %c0_i32 = arith.constant 0 : i32
    %c0_i32_0 = arith.constant 0 : i32
    %c0_i32_1 = arith.constant 0 : i32
    return %arg0, %c0_i32, %c0_i32_0 : i32, i32, i32
  }
  func.func @transform_1(%arg0: i32) -> (i32, i32) {
    %c0_i32 = arith.constant 0 : i32
    %c0_i32_0 = arith.constant 0 : i32
    %c0_i32_1 = arith.constant 0 : i32
    return %c0_i32, %c0_i32_0 : i32, i32
  }
  func.func @transform_2(%arg0: i32) -> (i32, i32) {
    %c0_i32 = arith.constant 0 : i32
    %c0_i32_0 = arith.constant 0 : i32
    %c0_i32_1 = arith.constant 0 : i32
    return %c0_i32, %c0_i32_0 : i32, i32
  }
  func.func @transform_3(%arg0: i32) -> (i32, i32) {
    %c0_i32 = arith.constant 0 : i32
    %c0_i32_0 = arith.constant 0 : i32
    %c0_i32_1 = arith.constant 0 : i32
    return %c0_i32, %c0_i32_0 : i32, i32
  }
  func.func @transform_4(%arg0: i32) -> (i32, i32) {
    %c0_i32 = arith.constant 0 : i32
    %c0_i32_0 = arith.constant 0 : i32
    %c0_i32_1 = arith.constant 0 : i32
    return %c0_i32, %c0_i32_0 : i32, i32
  }
  func.func @transform_5(%arg0: i32) -> (i32, i32) {
    %c0_i32 = arith.constant 0 : i32
    %c0_i32_0 = arith.constant 0 : i32
    %c0_i32_1 = arith.constant 0 : i32
    return %c0_i32, %c0_i32_0 : i32, i32
  }
  func.func @transform_6(%arg0: i32) -> (i32, i32) {
    %c0_i32 = arith.constant 0 : i32
    %c0_i32_0 = arith.constant 0 : i32
    %c0_i32_1 = arith.constant 0 : i32
    return %c0_i32, %c0_i32_0 : i32, i32
  }
  func.func @transform_7(%arg0: i32) -> (i32, i32) {
    %c0_i32 = arith.constant 0 : i32
    %c0_i32_0 = arith.constant 0 : i32
    %c0_i32_1 = arith.constant 0 : i32
    return %c0_i32, %c0_i32_0 : i32, i32
  }
  func.func @transform_8(%arg0: i32) -> (i32, i32) {
    %c0_i32 = arith.constant 0 : i32
    %c0_i32_0 = arith.constant 0 : i32
    %c0_i32_1 = arith.constant 0 : i32
    return %c0_i32, %c0_i32_0 : i32, i32
  }
  func.func @transform_9(%arg0: i32) -> (i32, i32) {
    %c0_i32 = arith.constant 0 : i32
    %c0_i32_0 = arith.constant 0 : i32
    %c0_i32_1 = arith.constant 0 : i32
    return %c0_i32, %c0_i32_0 : i32, i32
  }
  func.func @transform_10(%arg0: i32) -> (i32, i32) {
    %c0_i32 = arith.constant 0 : i32
    %c0_i32_0 = arith.constant 0 : i32
    %c0_i32_1 = arith.constant 0 : i32
    return %c0_i32, %c0_i32_0 : i32, i32
  }
  func.func @transform_11(%arg0: i32) -> (i32, i32) {
    %c0_i32 = arith.constant 0 : i32
    %c0_i32_0 = arith.constant 0 : i32
    %c0_i32_1 = arith.constant 0 : i32
    return %c0_i32, %c0_i32_0 : i32, i32
  }
  func.func @transform_12(%arg0: i32) -> (i32, i32, i32) {
    %c0_i32 = arith.constant 0 : i32
    %c0_i32_0 = arith.constant 0 : i32
    %c0_i32_1 = arith.constant 0 : i32
    return %arg0, %c0_i32, %c0_i32_0 : i32, i32, i32
  }
}

</mosaic_0001>

<bundles_post_ra>
// kernel: encoder_stack_pallas.4
= control target key start
LH: loop header
LB: loop body
LE: loop exit
PB: predicated region body
PF: predicated region fallthrough
CT: control target
= control target key end

     0   :  { %17 = vsyncpa [#allocation3], 0  ;;  %s3317_s0 = inlined_call_operand.vmem [shape: f32[16,3,128], index: 0, kind: input, shape index: {}]   ;;  %s3318_s1 = inlined_call_operand.vmem [shape: f32[1,128], index: 1, kind: input, shape index: {}]   ;;  %s3319_s2 = inlined_call_operand.vmem [shape: f32[1,128], index: 2, kind: input, shape index: {}]   ;;  %s3320_s3 = inlined_call_operand.hbm [shape: f32[128,384], index: 3, kind: input, shape index: {}]   ;;  %s3321_s4 = inlined_call_operand.vmem [shape: f32[128,128], index: 4, kind: input, shape index: {}]   ;;  %s3322_s5 = inlined_call_operand.vmem [shape: f32[1,128], index: 5, kind: input, shape index: {}]   ;;  %s3323_s6 = inlined_call_operand.vmem [shape: f32[1,128], index: 6, kind: input, shape index: {}]   ;;  %s3324_s7 = inlined_call_operand.vmem [shape: f32[1,128], index: 7, kind: input, shape index: {}]   ;;  %s3325_s8 = inlined_call_operand.hbm [shape: f32[128,512], index: 8, kind: input, shape index: {}]   ;;  %s3326_s9 = inlined_call_operand.vmem [shape: f32[1,512], index: 9, kind: input, shape index: {}]   ;;  %s3327_s10 = inlined_call_operand.hbm [shape: f32[512,128], index: 10, kind: input, shape index: {}]   ;;  %s3328_s11 = inlined_call_operand.vmem [shape: f32[1,128], index: 11, kind: input, shape index: {}]   ;;  %s3329_s12 = inlined_call_operand.vmem [shape: f32[16,3,128], index: 12, kind: output, shape index: {}]  }
   0x1   :  { %18 = vsyncpa [#allocation5], 0  ;;  %s2985_s21 = smov 0  }
   0x2 LB: > { %3333 = sst [smem:[#allocation9_spill]] %s2903_s21  ;;  %s2905_s22 = smov [#allocation4]   ;;  %s2903_s21 = sphi %s2985_s21, %s24_s21  }
   0x3   : > { %s355_s23 = sshll.u32 %s2905_s22, 4  ;;  %s2991_s24 = sadd.s32 4294967295, %s2903_s21   ;;  %s2996_s23 = int_to_ptr.vmem [resolvable:$true] %s355_s23 }
   0x4   : > { %p2237_p0 = scmp.ge.s32.totalorder %s2903_s21, 1  ;;  %p312_p1 = scmp.lt.s32.totalorder %s2903_s21, 17 }
   0x5   : > { %p3331_p2 = scmp.eq.s32.totalorder %s2991_s24, 0  ;;  %s2906_s26 = smov [#allocation2]  }
   0x6   : > { %p2998_p3 = pnand %p2237_p0, %p312_p1  ;;  %s330_s27 = sshll.u32 %s2906_s26, 4  ;;  %s3004_s27 = int_to_ptr.vmem [resolvable:$true] %s330_s27 }
   0x7   : > { %s2907_s29 = smov [#allocation6]   ;;  %s2805_s15 = scalar_lea.hbm %s3325_s8, 8192 }
   0x8   : > { %s3334_s25 = scalar_select %p2998_p3, 1, 0 }
   0x9   : > { %p2738_p4 = pneg %p2998_p3  ;;  %s3012_s30 = sshll.u32 %s2907_s29, 4  ;;  %s372_s30 = int_to_ptr.vmem [resolvable:$true] %s3012_s30 }
   0xa   : > { %p2806_p6 = scmp.ne.s32.totalorder %s3325_s8, %s2805_s15  ;;  %p2812_p10 = scmp.lt.u32.totalorder %s2805_s15, %s3325_s8 }
   0xb   : > { %p3008_p5 = pnand %p3331_p2, %p2738_p4 }
   0xd   : > { %p3022_p7 = pneg %p3008_p5 }
   0xf   : > { %p2808_p8 = pnand %p3022_p7, %p2806_p6 }
  0x11   : > { %p2809_p9 = pneg %p2808_p8 }
  0x13   : > { %p2814_p11 = pnand %p2812_p10, %p2809_p9 }
  0x15   : > { %2817 = shalt.err (!%p2814_p11)
}
  0x16   : > { %s2818_s22 = scalar_lea.vmem %s2996_s23, 8192  ;;  %p2826_p1 = scmp.lt.s32.totalorder %s2996_s23, %s2996_s23 }
  0x17   : > { %p2819_p12 = scmp.ne.s32.totalorder %s2996_s23, %s2818_s22  ;;  %p2827_p4 = scmp.lt.s32.totalorder %s2818_s22, %s2818_s22 }
  0x19   : > { %p2821_p13 = pnand %p2819_p12, %p3022_p7  ;;  %p2828_p6 = por %p2827_p4, %p2826_p1 }
  0x1b   : > { %p2822_p0 = pneg %p2821_p13 }
  0x1d   : > { %p2829_p8 = pnand %p2828_p6, %p2822_p0 }
  0x1f   : > { %2832 = shalt.err (!%p2829_p8)
}
  0x20   : > { %s2908_s26 = smov 512   ;;  %s2909_s29 = smov 32  }
  0x21   : > { %2744 = dma.hbm_to_vmem [thread:$0]  (!%p3008_p5), %s3325_s8, 8192, %s2996_s23, [#allocation5], %s2908_s26, %s2908_s26, %s2909_s29  }
  0x22   : > { %s2833_s17 = scalar_lea.hbm %s3320_s3, 6144 }
  0x23   : > { %p2834_p9 = scmp.ne.s32.totalorder %s3320_s3, %s2833_s17  ;;  %p2840_p12 = scmp.lt.u32.totalorder %s2833_s17, %s3320_s3 }
  0x25   : > { %p2836_p10 = pnand %p2834_p9, %p3022_p7 }
  0x27   : > { %p2837_p11 = pneg %p2836_p10 }
  0x29   : > { %p2842_p13 = pnand %p2840_p12, %p2837_p11 }
  0x2b   : > { %2845 = shalt.err (!%p2842_p13)
}
  0x2c   : > { %s2846_s23 = scalar_lea.vmem %s3004_s27, 6144  ;;  %p2854_p6 = scmp.lt.s32.totalorder %s3004_s27, %s3004_s27 }
  0x2d   : > { %p2847_p0 = scmp.ne.s32.totalorder %s3004_s27, %s2846_s23  ;;  %p2855_p8 = scmp.lt.s32.totalorder %s2846_s23, %s2846_s23 }
  0x2f   : > { %p2849_p1 = pnand %p2847_p0, %p3022_p7  ;;  %p2856_p9 = por %p2855_p8, %p2854_p6 }
  0x31   : > { %p2850_p4 = pneg %p2849_p1 }
  0x33   : > { %p2857_p10 = pnand %p2856_p9, %p2850_p4 }
  0x35   : > { %2860 = shalt.err (!%p2857_p10)
}
  0x36   : > { %s2910_s26 = smov 384   ;;  %s2911_s21 = smov 24  }
  0x37   : > { %2741 = dma.hbm_to_vmem [thread:$0]  (!%p3008_p5), %s3320_s3, 6144, %s3004_s27, [#allocation3], %s2910_s26, %s2910_s26, %s2911_s21  }
  0x38   : > { %s2861_s16 = scalar_lea.hbm %s3327_s10, 8192 }
  0x39   : > { %p2862_p11 = scmp.ne.s32.totalorder %s3327_s10, %s2861_s16  ;;  %p2868_p0 = scmp.lt.u32.totalorder %s2861_s16, %s3327_s10 }
  0x3b   : > { %p2864_p12 = pnand %p2862_p11, %p3022_p7 }
  0x3d   : > { %p2865_p13 = pneg %p2864_p12 }
  0x3f   : > { %p2870_p1 = pnand %p2868_p0, %p2865_p13 }
  0x41   : > { %2873 = shalt.err (!%p2870_p1)
}
  0x42   : > { %s2874_s23 = scalar_lea.vmem %s372_s30, 8192  ;;  %p2882_p9 = scmp.lt.s32.totalorder %s372_s30, %s372_s30 }
  0x43   : > { %p2875_p4 = scmp.ne.s32.totalorder %s372_s30, %s2874_s23  ;;  %p2883_p10 = scmp.lt.s32.totalorder %s2874_s23, %s2874_s23 }
  0x45   : > { %p2877_p6 = pnand %p2875_p4, %p3022_p7  ;;  %p2884_p2 = por %p2883_p10, %p2882_p9 }
  0x47   : > { %p2878_p8 = pneg %p2877_p6 }
  0x49   : > { %p2885_p3 = pnand %p2884_p2, %p2878_p8 }
  0x4b   : > { %2888 = shalt.err (!%p2885_p3)
}
  0x4c   : > { %s2912_s27 = smov 128   ;;  %s2913_s26 = smov 8  }
  0x4d   : > { %2747 = dma.hbm_to_vmem [thread:$0]  (!%p3008_p5), %s3327_s10, 8192, %s372_s30, [#allocation5], %s2912_s27, %s2912_s27, %s2913_s26  }
  0x4e   : > { %p3337_p11 = scmp.ne.s32.totalorder %s3334_s25, 0 }
  0x4f   : > { %p3338_p12 = scmp.eq.s32.totalorder (!%p3337_p11), %s2991_s24, 0 }
  0x50   : > { %397 = sbr.rel (%p3337_p11) target bundleno = 3746 (0xea2), region = 68 }
  0x57   : > { %2894 = dma.done.wait (%p3338_p12), [#allocation3], 6144   ;;  %p3339_p7 = pmov %p3338_p12 }
  0x59   : > { %2896 = vsyncadd (%p3339_p7), [#allocation3], 4294961152  ;;  %p3340_p2 = pmov %p3339_p7 }
  0x5b   : > { %2898 = dma.done.wait (%p3340_p2), [#allocation5], 16384   ;;  %p3341_p3 = pmov %p3340_p2 }
  0x5c   : > { %p445_p13 = scmp.lt.s32.totalorder %s2991_s24, 15  ;;  %vm456_vm0 = vcmask 1042432   ;;  %v486_v2 = vld [vmem:[#allocation2 + $0x8] sm:$0xff]  ;;  %v489_v3 = vld [vmem:[#allocation2 + $0x20] sm:$0xff]  ;;  %v2914_v6 = vmov 0.0|0.0   ;;  %v488_v7 = vld [vmem:[#allocation2 + $0x18] sm:$0xff] }
  0x5d   : > { %2900 = vsyncadd (%p3341_p3), [#allocation5], 4294950912  ;;  %v485_v4 = vld [vmem:[#allocation2] sm:$0xff]  ;;  %v2518_v5 = vpack.c.bf16 %v489_v3, %v486_v2  ;;  %2550 = vmatprep.subr.bf16.mxu1 %v2914_v6  ;;  %v487_v8 = vld [vmem:[#allocation2 + $0x10] sm:$0xff]  ;;  %v2915_v59 = vmov 0.0   ;;  %vm2916_vm1 = vmmov 0  }
  0x5e   : > { %s3344_s24 = smov (!%p445_p13, %s2991_s24), 15  ;;  %v490_v9 = vld [vmem:[#allocation2 + $0x28] sm:$0xff]  ;;  %v2520_v10 = vpack.c.bf16 %v488_v7, %v485_v4  ;;  %v492_v12 = vld [vmem:[#allocation2 + $0x38] sm:$0xff]  ;;  %v495_v13 = vld [vmem:[#allocation2 + $0x50] sm:$0xff]  ;;  %597 = vmatprep.mubr.f32.mxu0 %v2915_v59  ;;  %2431 = vmatprep.mubr.msk.f32.mxu1 %vm2916_vm1, %v2915_v59  ;;  %vm690_vm2 = vcmask 261120   ;;  %s2917_s17 = smov 96  }
  0x5f   : > { %s2246_s25 = sshll.u32 %s3344_s24, 2  ;;  %v2551_v11 = vpack.c.bf16 %v490_v9, %v487_v8  ;;  %v491_v14 = vld [vmem:[#allocation2 + $0x30] sm:$0xff]  ;;  %2519 = vmatprep.subr.bf16.mxu0 %v2518_v5  ;;  %v2522_v15 = vpack.c.bf16 %v495_v13, %v492_v12  ;;  %v494_v16 = vld [vmem:[#allocation2 + $0x48] sm:$0xff]  ;;  %v493_v17 = vld [vmem:[#allocation2 + $0x40] sm:$0xff]  ;;  %vm768_vm3 = vcmask 18432   ;;  %s2918_s19 = smov 64  }
  0x60   : > { %s448_s18 = scalar_lea.vmem %s3317_s0, %s2246_s25  ;;  %v496_v18 = vld [vmem:[#allocation2 + $0x58] sm:$0xff]  ;;  %2521 = vmatpush1.bf16.msra.mxu0 %v2520_v10  ;;  %v2524_v19 = vpack.c.bf16 %v494_v16, %v491_v14  ;;  %v498_v21 = vld [vmem:[#allocation2 + $0x68] sm:$0xff]  ;;  %v501_v22 = vld [vmem:[#allocation2 + $0x80] sm:$0xff]  ;;  %vm780_vm4 = vcmask 23552   ;;  %s2919_s22 = smov 32  }
  0x61   : > { %v453_v0 = vld [vmem:[%s448_s18] sm:$0x7]  ;;  %2552 = vmatpush3.bf16.msra.mxu1 %v2551_v11  ;;  %v2554_v20 = vpack.c.bf16 %v496_v18, %v493_v17  ;;  %2523 = vmatprep.subr.bf16.mxu0 %v2522_v15  ;;  %v2526_v24 = vpack.c.bf16 %v501_v22, %v498_v21  ;;  %v500_v25 = vld [vmem:[#allocation2 + $0x78] sm:$0xff]  ;;  %v499_v26 = vld [vmem:[#allocation2 + $0x70] sm:$0xff]  ;;  %s452_s16 = scalar_lea.vmem %s3329_s12, %s2246_s25 }
  0x62   : > { %v457_v1 = vsel %vm456_vm0, %v453_v0, 0.0  ;;  %v497_v23 = vld [vmem:[#allocation2 + $0x60] sm:$0xff]  ;;  %2553 = vmatprep.subr.bf16.mxu1 %v2914_v6  ;;  %v502_v27 = vld [vmem:[#allocation2 + $0x88] sm:$0xff]  ;;  %v504_v35 = vld [vmem:[#allocation2 + $0x98] sm:$0xff] }
  0x63   : > { %458 = vadd.xlane.f32.xlu0 %v457_v1  ;;  %v2528_v28 = vpack.c.bf16 %v500_v25, %v497_v23  ;;  %v2557_v29 = vpack.c.bf16 %v502_v27, %v499_v26  ;;  %v507_v36 = vld [vmem:[#allocation2 + $0xb0] sm:$0xff]  ;;  %v506_v39 = vld [vmem:[#allocation2 + $0xa8] sm:$0xff]  ;;  %v505_v40 = vld [vmem:[#allocation2 + $0xa0] sm:$0xff] }
  0x64   : > { %2525 = vmatpush1.bf16.msra.mxu0 %v2524_v19  ;;  %v2530_v37 = vpack.c.bf16 %v507_v36, %v504_v35  ;;  %v503_v38 = vld [vmem:[#allocation2 + $0x90] sm:$0xff]  ;;  %v508_v42 = vld [vmem:[#allocation2 + $0xb8] sm:$0xff]  ;;  %v510_v44 = vld [vmem:[#allocation2 + $0xc8] sm:$0xff] }
  0x65   : > { %2555 = vmatpush3.bf16.msra.mxu1 %v2554_v20  ;;  %2527 = vmatprep.subr.bf16.mxu0 %v2526_v24  ;;  %v2532_v41 = vpack.c.bf16 %v506_v39, %v503_v38  ;;  %v2560_v43 = vpack.c.bf16 %v508_v42, %v505_v40  ;;  %v513_v45 = vld [vmem:[#allocation2 + $0xe0] sm:$0xff]  ;;  %v512_v48 = vld [vmem:[#allocation2 + $0xd8] sm:$0xff]  ;;  %v511_v49 = vld [vmem:[#allocation2 + $0xd0] sm:$0xff] }
  0x66   : > { %2556 = vmatprep.subr.bf16.mxu1 %v2914_v6  ;;  %v2534_v46 = vpack.c.bf16 %v513_v45, %v510_v44  ;;  %v509_v47 = vld [vmem:[#allocation2 + $0xc0] sm:$0xff]  ;;  %v514_v51 = vld [vmem:[#allocation2 + $0xe8] sm:$0xff]  ;;  %v516_v52 = vld [vmem:[#allocation2 + $0xf8] sm:$0xff] }
  0x67   : > { %v2536_v50 = vpack.c.bf16 %v512_v48, %v509_v47  ;;  %v519_v53 = vld [vmem:[#allocation2 + $0x110] sm:$0xff]  ;;  %v2563_v54 = vpack.c.bf16 %v514_v51, %v511_v49  ;;  %v518_v57 = vld [vmem:[#allocation2 + $0x108] sm:$0xff]  ;;  %v517_v58 = vld [vmem:[#allocation2 + $0x100] sm:$0xff] }
  0x68   : > { %2529 = vmatpush1.bf16.msra.mxu0 %v2528_v28  ;;  %v2538_v55 = vpack.c.bf16 %v519_v53, %v516_v52  ;;  %v515_v56 = vld [vmem:[#allocation2 + $0xf0] sm:$0xff]  ;;  %v520_v61 = vld [vmem:[#allocation2 + $0x118] sm:$0xff]  ;;  %v522_v62 = vld [vmem:[#allocation2 + $0x128] sm:$0xff] }
  0x69   : > { %2558 = vmatpush3.bf16.msra.mxu1 %v2557_v29  ;;  %2531 = vmatprep.subr.bf16.mxu0 %v2530_v37  ;;  %v2540_v60 = vpack.c.bf16 %v518_v57, %v515_v56  ;;  %v525_v63 = vld [vmem:[#allocation2 + $0x140] sm:$0xff]  ;;  %v524_v3 = vld [vmem:[#allocation2 + $0x138] sm:$0xff]  ;;  %v523_v4 = vld [vmem:[#allocation2 + $0x130] sm:$0xff] }
  0x6a   : > { %2559 = vmatprep.subr.bf16.mxu1 %v2914_v6  ;;  %v2542_v1 = vpack.c.bf16 %v525_v63, %v522_v62  ;;  %v521_v2 = vld [vmem:[#allocation2 + $0x120] sm:$0xff]  ;;  %v526_v5 = vld [vmem:[#allocation2 + $0x148] sm:$0xff]  ;;  %v528_v7 = vld [vmem:[#allocation2 + $0x158] sm:$0xff] }
  0x6b   : > { %v531_v8 = vld [vmem:[#allocation2 + $0x170] sm:$0xff]  ;;  %v2544_v9 = vpack.c.bf16 %v524_v3, %v521_v2  ;;  %v2569_v10 = vpack.c.bf16 %v526_v5, %v523_v4  ;;  %v530_v13 = vld [vmem:[#allocation2 + $0x168] sm:$0xff]  ;;  %v529_v14 = vld [vmem:[#allocation2 + $0x160] sm:$0xff] }
  0x6c   : > { %2533 = vmatpush1.bf16.msra.mxu0 %v2532_v41  ;;  %v2546_v11 = vpack.c.bf16 %v531_v8, %v528_v7  ;;  %v527_v12 = vld [vmem:[#allocation2 + $0x150] sm:$0xff]  ;;  %v532_v15 = vld [vmem:[#allocation2 + $0x178] sm:$0xff]  ;;  %v2248_v22 = vld [vmem:[%s3318_s1] ss:$0 sm:$0xff] }
  0x6d   : > { %2561 = vmatpush3.bf16.msra.mxu1 %v2560_v43  ;;  %2535 = vmatprep.subr.bf16.mxu0 %v2534_v46  ;;  %v2548_v16 = vpack.c.bf16 %v530_v13, %v527_v12  ;;  %v2572_v17 = vpack.c.bf16 %v532_v15, %v529_v14  ;;  %v2249_v24 = vld [vmem:[%s3319_s2] ss:$0 sm:$0xff]  ;;  %v680_v56 = vld [vmem:[%s3321_s4 + $0x30] sm:$0xff]  ;;  %v677_v5 = vld [vmem:[%s3321_s4 + $0x18] sm:$0xff] }
  0x6e   : > { %2562 = vmatprep.subr.bf16.mxu1 %v2914_v6  ;;  %v674_v63 = vld [vmem:[%s3321_s4] sm:$0xff]  ;;  %v676_v4 = vld [vmem:[%s3321_s4 + $0x10] sm:$0xff] }
  0x6f   : > { %v2584_v7 = vpack.c.bf16 %v677_v5, %v676_v4  ;;  %v2270_v4 = vld [vmem:[%s3322_s5] ss:$0 sm:$0xff] }
  0x70   : > { %2537 = vmatpush1.bf16.msra.mxu0 %v2536_v50 }
  0x71   : > { %2564 = vmatpush3.bf16.msra.mxu1 %v2563_v54  ;;  %2539 = vmatprep.subr.bf16.mxu0 %v2538_v55  ;;  %v678_v54 = vld [vmem:[%s3321_s4 + $0x20] sm:$0xff]  ;;  %v679_v55 = vld [vmem:[%s3321_s4 + $0x28] sm:$0xff] }
  0x72   : > { %2565 = vmatprep.subr.bf16.mxu1 %v2914_v6  ;;  %v2575_v57 = vpack.c.bf16 %v679_v55, %v678_v54  ;;  %v686_v54 = vld [vmem:[%s3321_s4 + $0x60] sm:$0xff]  ;;  %v687_v55 = vld [vmem:[%s3321_s4 + $0x68] sm:$0xff] }
  0x74   : > { %2541 = vmatpush1.bf16.msra.mxu0 %v2540_v60 }
  0x75   : > { %2543 = vmatprep.subr.bf16.mxu0 %v2542_v1 }
  0x78   : > { %2545 = vmatpush1.bf16.msra.mxu0 %v2544_v9 }
  0x79   : > { %2547 = vmatprep.subr.bf16.mxu0 %v2546_v11 }
  0x7c   : > { %2549 = vmatpush1.bf16.msra.mxu0 %v2548_v16 }
  0x7d   : > { %2444 = vmatprep.subr.mxu0 %v2915_v59 }
  0xf0   : > { %v459_v30 = vpop.xlane.xlu0 %458 }
  0xf1   : > { %v461_v31 = vmul.f32 0.0078125, %v459_v30 }
  0xf3   : > { %v3110_v32 = vsub.f32 %v453_v0, %v461_v31  ;;  %v2566_v0 = vpack.c.bf16 %v520_v61, %v517_v58  ;;  %v681_v58 = vld [vmem:[%s3321_s4 + $0x38] sm:$0xff] }
  0xf4   : > { %v2578_v60 = vpack.c.bf16 %v681_v58, %v680_v56  ;;  %v2593_v56 = vpack.c.bf16 %v687_v55, %v686_v54  ;;  %v1717_v54 = vld [vmem:[#allocation4 + $0xd8] sm:$0xff] }
  0xf5   : > { %v463_v33 = vmul.f32 %v3110_v32, %v3110_v32  ;;  %2567 = vmatpush3.bf16.msra.mxu1 %v2566_v0  ;;  %v675_v0 = vld [vmem:[%s3321_s4 + $0x8] sm:$0xff] }
  0xf6   : > { %2568 = vmatprep.subr.bf16.mxu1 %v2914_v6  ;;  %v2581_v2 = vpack.c.bf16 %v675_v0, %v674_v63 }
  0xf7   : > { %v464_v34 = vsel %vm456_vm0, %v463_v33, 0.0 }
  0xf8   : > { %465 = vadd.xlane.f32.xlu0 %v464_v34 }
  0xf9   : > { %2570 = vmatpush3.bf16.msra.mxu1 %v2569_v10 }
  0xfa   : > { %2571 = vmatprep.subr.bf16.mxu1 %v2914_v6 }
  0xfd   : > { %2573 = vmatpush3.bf16.msra.mxu1 %v2572_v17 }
  0xfe   : > { %2434 = vmatprep.subr.mxu1 %v2915_v59 }
 0x185   : > { %v466_v18 = vpop.xlane.xlu0 %465 }
 0x186   : > { %v467_v19 = vmul.f32 0.0078125, %v466_v18 }
 0x188   : > { %v468_v20 = vadd.f32 1e-05, %v467_v19 }
 0x18a   : > { %2777 = vrsqrt.f32 %v468_v20 }
 0x194   : > { %v2778_v21 = vpop.eup %2777 }
 0x195   : > { %v470_v23 = vmul.f32 %v2778_v21, %v3110_v32 }
 0x197   : > { %v477_v25 = vmul.f32 %v2248_v22, %v470_v23 }
 0x199   : > { %v3131_v26 = vadd.f32 %v2249_v24, %v477_v25 }
 0x19b   : > { %598 = vmatmul.mubr.f32.vlgmr.msra.gmra.mrb[0].mxu0 %v3131_v26  ;;  %2432 = vmatmul.mubr.f32.vlgmr.msra.gmra.mrb[0].mxu1 %v3131_v26 }
 0x19c   : > { %2436 = vmatprep.mubr.msk.f32.mxu1 %vm2916_vm1, %v2915_v59  ;;  %2446 = vmatprep.mubr.msk.f32.mxu0 %vm2916_vm1, %v2915_v59 }
 0x26e   : > { %v3139_v27 = vpop.f32.mrb[0].mxu0  ;;  %v3141_v28 = vpop.f32.mrb[0].mxu1 }
 0x26f   : > { %v3143_v29 = vpop.f32.mrb[1].mxu0  ;;  %v2433_v30 = vpop.f32.mrb[1].mxu1 }
 0x270   : > { %859 = vrot.lane.b32.xlu1 %v3143_v29, %s2917_s17  ;;  %2435 = vmatpush3.xpose.msk.msra.mxu1 %vm690_vm2, %v3143_v29 }
 0x271   : > { %2439 = vmatprep.subr.mxu1 %v2915_v59 }
 0x273   : > { %2437 = vmatmul.mubr.msk.f32.vlgmr.msra.gmra.mrb[2].mxu1 %vm690_vm2, %v3139_v27 }
 0x274   : > { %857 = vrot.lane.b32.xlu1 %v3139_v27, %s2917_s17  ;;  %2440 = vmatpush3.msk.msra.mxu1 %vm456_vm0, %v3141_v28 }
 0x275   : > { %2441 = vmatprep.mubr.msk.f32.mxu1 %vm2916_vm1, %v2915_v59  ;;  %2449 = vmatprep.subr.mxu1 %v2915_v59 }
 0x2e2   : > { %v860_v31 = vpop.permute.xlu1 %859 }
 0x2e3   : > { %2445 = vmatpush3.xpose.msk.msra.mxu0 %vm690_vm2, %v860_v31 }
 0x2e4   : > { %2574 = vmatprep.subr.bf16.mxu0 %v2914_v6 }
 0x2e6   : > { %v858_v32 = vpop.permute.xlu1 %857 }
 0x2e7   : > { %2447 = vmatmul.mubr.msk.f32.vlgmr.msra.gmra.mrb[2].mxu0 %vm690_vm2, %v858_v32 }
 0x2e8   : > { %2462 = vmatprep.mubr.msk.f32.mxu0 %vm2916_vm1, %v2915_v59  ;;  %2576 = vmatpush3.bf16.msra.mxu0 %v2575_v57  ;;  %v689_v57 = vld [vmem:[%s3321_s4 + $0x78] sm:$0xff] }
 0x2e9   : > { %2577 = vmatprep.subr.bf16.mxu0 %v2914_v6 }
 0x2ec   : > { %2579 = vmatpush3.bf16.msra.mxu0 %v2578_v60 }
 0x2ed   : > { %2476 = vmatprep.subr.mxu0 %v2915_v59 }
 0x346   : > { %v763_v33 = vpop.f32.mrb[2].mxu1 }
 0x347   : > { %v767_v34 = vmul.f32 0.17677669, %v763_v33  ;;  %v2438_v35 = vpop.f32.mrb[3].mxu1  ;;  %v683_v33 = vld [vmem:[%s3321_s4 + $0x48] sm:$0xff] }
 0x349   : > { %v769_v36 = vsel %vm768_vm3, %v767_v34, -inf }
 0x34a   : > { %770 = vmax.xlane.f32.xlu0 %v769_v36  ;;  %v685_v36 = vld [vmem:[%s3321_s4 + $0x58] sm:$0xff] }
 0x3ba   : > { %v931_v37 = vpop.f32.mrb[2].mxu0 }
 0x3bb   : > { %v935_v38 = vmul.f32 0.17677669, %v931_v37  ;;  %v2448_v39 = vpop.f32.mrb[3].mxu0 }
 0x3bd   : > { %v936_v40 = vsel %vm768_vm3, %v935_v38, -inf }
 0x3be   : > { %937 = vmax.xlane.f32.xlu1 %v936_v40 }
 0x3cf   : > { %1170 = vrot.lane.b32.xlu1 %v3139_v27, %s2918_s19 }
 0x3d7   : > { %v771_v41 = vpop.xlane.xlu0 %770 }
 0x3d8   : > { %v772_v42 = vsub.f32 %v767_v34, %v771_v41  ;;  %v684_v34 = vld [vmem:[%s3321_s4 + $0x50] sm:$0xff] }
 0x3d9   : > { %v2590_v37 = vpack.c.bf16 %v685_v36, %v684_v34  ;;  %v1704_v34 = vld [vmem:[#allocation4 + $0x70] sm:$0xff]  ;;  %v1711_v36 = vld [vmem:[#allocation4 + $0xa8] sm:$0xff] }
 0x3da   : > { %v773_v43 = vmul.f32 1.442695, %v772_v42 }
 0x3dc   : > { %2779 = vpow2.f32 %v773_v43 }
 0x3e6   : > { %v2780_v44 = vpop.eup %2779 }
 0x3e7   : > { %v775_v45 = vsel %vm768_vm3, %v2780_v44, 0.0 }
 0x3e8   : > { %776 = vadd.xlane.f32.xlu0 %v775_v45 }
 0x44b   : > { %v938_v46 = vpop.xlane.xlu1 %937 }
 0x44c   : > { %v939_v47 = vsub.f32 %v935_v38, %v938_v46 }
 0x44e   : > { %v940_v48 = vmul.f32 1.442695, %v939_v47 }
 0x44f   : > { %v1171_v13 = vpop.permute.xlu1 %1170 }
 0x450   : > { %2781 = vpow2.f32 %v940_v48 }
 0x45a   : > { %v2782_v49 = vpop.eup %2781 }
 0x45b   : > { %v942_v50 = vsel %vm768_vm3, %v2782_v49, 0.0 }
 0x45c   : > { %943 = vadd.xlane.f32.xlu0 %v942_v50 }
 0x472   : > { %947 = vrot.lane.b32.xlu0 %v3141_v28, %s2917_s17 }
 0x475   : > { %v777_v51 = vpop.xlane.xlu0 %776 }
 0x476   : > { %2783 = vrcp.f32 %v777_v51  ;;  %1172 = vrot.lane.b32.xlu0 %v3143_v29, %s2918_s19 }
 0x480   : > { %v2784_v52 = vpop.eup %2783 }
 0x481   : > { %v779_v53 = vmul.f32 %v2784_v52, %v2780_v44 }
 0x483   : > { %2442 = vmatmul.mubr.msk.f32.vlgmr.msra.gmra.mrb[4].mxu1 %vm780_vm4, %v779_v53 }
 0x484   : > { %2451 = vmatprep.mubr.msk.f32.mxu1 %vm2916_vm1, %v2915_v59 }
 0x4e9   : > { %v944_v61 = vpop.xlane.xlu0 %943 }
 0x4ea   : > { %2785 = vrcp.f32 %v944_v61 }
 0x4ed   : > { %v948_v62 = vpop.permute.xlu0 %947 }
 0x4ee   : > { %2450 = vmatpush3.msk.msra.mxu1 %vm456_vm0, %v948_v62 }
 0x4ef   : > { %2580 = vmatprep.subr.bf16.mxu1 %v2914_v6 }
 0x4f1   : > { %v1173_v11 = vpop.permute.xlu0 %1172 }
 0x4f4   : > { %v2786_v1 = vpop.eup %2785 }
 0x4f5   : > { %v946_v3 = vmul.f32 %v2786_v1, %v2782_v49 }
 0x4f7   : > { %2452 = vmatmul.mubr.msk.f32.vlgmr.msra.gmra.mrb[6].mxu1 %vm780_vm4, %v946_v3 }
 0x4f8   : > { %2582 = vmatpush3.bf16.msra.mxu1 %v2581_v2  ;;  %2473 = vmatprep.mubr.msk.f32.mxu1 %vm2916_vm1, %v2915_v59 }
 0x4f9   : > { %2583 = vmatprep.subr.bf16.mxu1 %v2914_v6 }
 0x4fc   : > { %2585 = vmatpush3.bf16.msra.mxu1 %v2584_v7 }
 0x4fd   : > { %2481 = vmatprep.subr.mxu1 %v2915_v59 }
 0x556   : > { %v853_v8 = vpop.f32.mrb[4].mxu1 }
 0x557   : > { %v2443_v9 = vpop.f32.mrb[5].mxu1  ;;  %2474 = vmatmul.mubr.msk.f32.vlgmr.msra.gmra.mrb[8].mxu1 %vm690_vm2, %v853_v8 }
 0x558   : > { %2483 = vmatprep.mubr.msk.f32.mxu1 %vm2916_vm1, %v2915_v59 }
 0x5ca   : > { %v1020_v10 = vpop.f32.mrb[6].mxu1 }
 0x5cb   : > { %v2453_v12 = vpop.f32.mrb[7].mxu1  ;;  %2463 = vmatmul.mubr.msk.f32.vlgmr.msra.gmra.mrb[4].mxu0 %vm690_vm2, %v1020_v10 }
 0x5cc   : > { %2477 = vmatpush3.xpose.msk.msra.mxu0 %vm690_vm2, %v1173_v11  ;;  %2478 = vmatprep.mubr.msk.f32.mxu0 %vm2916_vm1, %v2915_v59  ;;  %v1691_v11 = vld [vmem:[#allocation4 + $0x8] sm:$0xff] }
 0x5cd   : > { %2586 = vmatprep.subr.bf16.mxu0 %v2914_v6  ;;  %v1695_v12 = vld [vmem:[#allocation4 + $0x28] sm:$0xff] }
 0x5cf   : > { %2479 = vmatmul.mubr.msk.f32.vlgmr.msra.gmra.mrb[6].mxu0 %vm690_vm2, %v1171_v13  ;;  %v1693_v13 = vld [vmem:[#allocation4 + $0x18] sm:$0xff] }
 0x5d0   : > { %2494 = vmatprep.mubr.msk.f32.mxu0 %vm2916_vm1, %v2915_v59 }
 0x62a   : > { %v1166_v14 = vpop.f32.mrb[8].mxu1 }
 0x62b   : > { %v2475_v15 = vpop.f32.mrb[9].mxu1 }
 0x62c   : > { %v1697_v15 = vld [vmem:[#allocation4 + $0x38] sm:$0xff] }
 0x69e   : > { %v1093_v16 = vpop.f32.mrb[4].mxu0 }
 0x69f   : > { %v3221_v17 = vadd.f32 %v1166_v14, %v1093_v16  ;;  %v2464_v18 = vpop.f32.mrb[5].mxu0  ;;  %v2598_v14 = vpack.c.bf16 %v1695_v12, %v1691_v11  ;;  %v1690_v16 = vld [vmem:[#allocation4] sm:$0xff]  ;;  %v1731_v11 = vld [vmem:[#allocation4 + $0x148] sm:$0xff] }
 0x6a2   : > { %v1244_v19 = vpop.f32.mrb[6].mxu0 }
 0x6a3   : > { %v1248_v20 = vmul.f32 0.17677669, %v1244_v19  ;;  %v2480_v21 = vpop.f32.mrb[7].mxu0  ;;  %v1692_v19 = vld [vmem:[#allocation4 + $0x10] sm:$0xff] }
 0x6a4   : > { %v1699_v21 = vld [vmem:[#allocation4 + $0x48] sm:$0xff] }
 0x6a5   : > { %v1249_v22 = vsel %vm768_vm3, %v1248_v20, -inf }
 0x6a6   : > { %1250 = vmax.xlane.f32.xlu0 %v1249_v22 }
 0x6bc   : > { %1260 = vrot.lane.b32.xlu0 %v3141_v28, %s2918_s19 }
 0x6c0   : > { %1411 = vrot.lane.b32.xlu0 %v3139_v27, %s2919_s22  ;;  %v682_v27 = vld [vmem:[%s3321_s4 + $0x40] sm:$0xff] }
 0x6c1   : > { %v2587_v35 = vpack.c.bf16 %v683_v33, %v682_v27  ;;  %v1700_v27 = vld [vmem:[#allocation4 + $0x50] sm:$0xff] }
 0x6c3   : > { %2588 = vmatpush3.bf16.msra.mxu0 %v2587_v35  ;;  %v1707_v35 = vld [vmem:[#allocation4 + $0x88] sm:$0xff] }
 0x6c4   : > { %2589 = vmatprep.subr.bf16.mxu0 %v2914_v6 }
 0x6c7   : > { %2591 = vmatpush3.bf16.msra.mxu0 %v2590_v37  ;;  %v2636_v37 = vpack.c.bf16 %v1704_v34, %v1700_v27  ;;  %v1742_v27 = vld [vmem:[#allocation4 + $0x1a0] sm:$0xff]  ;;  %v1744_v34 = vld [vmem:[#allocation4 + $0x1b0] sm:$0xff] }
 0x6c8   : > { %2592 = vmatprep.subr.bf16.mxu0 %v2914_v6 }
 0x733   : > { %v1251_v23 = vpop.xlane.xlu0 %1250 }
 0x734   : > { %v1252_v24 = vsub.f32 %v1248_v20, %v1251_v23  ;;  %v1696_v20 = vld [vmem:[#allocation4 + $0x30] sm:$0xff]  ;;  %v1703_v23 = vld [vmem:[#allocation4 + $0x68] sm:$0xff] }
 0x735   : > { %v2632_v22 = vpack.c.bf16 %v1696_v20, %v1692_v19  ;;  %v1732_v19 = vld [vmem:[#allocation4 + $0x150] sm:$0xff] }
 0x736   : > { %v1253_v25 = vmul.f32 1.442695, %v1252_v24  ;;  %v1701_v24 = vld [vmem:[#allocation4 + $0x58] sm:$0xff] }
 0x737   : > { %v1261_v30 = vpop.permute.xlu0 %1260 }
 0x738   : > { %2787 = vpow2.f32 %v1253_v25  ;;  %2482 = vmatpush3.msk.msra.mxu1 %vm456_vm0, %v1261_v30  ;;  %v2602_v25 = vpack.c.bf16 %v1703_v23, %v1699_v21  ;;  %v1736_v21 = vld [vmem:[#allocation4 + $0x170] sm:$0xff]  ;;  %v1743_v23 = vld [vmem:[#allocation4 + $0x1a8] sm:$0xff] }
 0x739   : > { %2497 = vmatprep.subr.mxu1 %v2915_v59 }
 0x73b   : > { %v1412_v41 = vpop.permute.xlu0 %1411 }
 0x742   : > { %v2788_v31 = vpop.eup %2787 }
 0x743   : > { %v1255_v32 = vsel %vm768_vm3, %v2788_v31, 0.0 }
 0x744   : > { %1256 = vadd.xlane.f32.xlu1 %v1255_v32  ;;  %v1702_v32 = vld [vmem:[#allocation4 + $0x60] sm:$0xff] }
 0x755   : > { %1413 = vrot.lane.b32.xlu1 %v3143_v29, %s2919_s22 }
 0x7d1   : > { %v1257_v29 = vpop.xlane.xlu1 %1256 }
 0x7d2   : > { %2789 = vrcp.f32 %v1257_v29  ;;  %v2606_v29 = vpack.c.bf16 %v1711_v36, %v1707_v35  ;;  %v1747_v36 = vld [vmem:[#allocation4 + $0x1c8] sm:$0xff] }
 0x7d5   : > { %v1414_v40 = vpop.permute.xlu1 %1413 }
 0x7dc   : > { %v2790_v38 = vpop.eup %2789 }
 0x7dd   : > { %v1259_v39 = vmul.f32 %v2790_v38, %v2788_v31  ;;  %v1698_v31 = vld [vmem:[#allocation4 + $0x40] sm:$0xff]  ;;  %v1709_v38 = vld [vmem:[#allocation4 + $0x98] sm:$0xff] }
 0x7de   : > { %v2604_v33 = vpack.c.bf16 %v1702_v32, %v1698_v31  ;;  %v1738_v31 = vld [vmem:[#allocation4 + $0x180] sm:$0xff] }
 0x7df   : > { %2484 = vmatmul.mubr.msk.f32.vlgmr.msra.gmra.mrb[10].mxu1 %vm780_vm4, %v1259_v39  ;;  %v1713_v39 = vld [vmem:[#allocation4 + $0xb8] sm:$0xff]  ;;  %v2624_v35 = vpack.c.bf16 %v1742_v27, %v1738_v31  ;;  %v1960_v31 = vld [vmem:[#allocation6 + $0xb0] sm:$0xff] }
 0x7e0   : > { %2498 = vmatpush3.xpose.msk.msra.mxu1 %vm690_vm2, %v1414_v40  ;;  %2499 = vmatprep.mubr.msk.f32.mxu1 %vm2916_vm1, %v2915_v59  ;;  %v1706_v40 = vld [vmem:[#allocation4 + $0x80] sm:$0xff]  ;;  %v1992_v27 = vld [vmem:[#allocation6 + $0x1b0] sm:$0xff] }
 0x7e1   : > { %2502 = vmatprep.subr.mxu1 %v2915_v59 }
 0x7e3   : > { %2500 = vmatmul.mubr.msk.f32.vlgmr.msra.gmra.mrb[12].mxu1 %vm690_vm2, %v1412_v41  ;;  %v2638_v41 = vpack.c.bf16 %v1713_v39, %v1709_v38 }
 0x7e4   : > { %2504 = vmatprep.mubr.msk.f32.mxu1 %vm2916_vm1, %v2915_v59 }
 0x8b2   : > { %v1333_v42 = vpop.f32.mrb[10].mxu1 }
 0x8b3   : > { %v2485_v43 = vpop.f32.mrb[11].mxu1  ;;  %2495 = vmatmul.mubr.msk.f32.vlgmr.msra.gmra.mrb[8].mxu0 %vm690_vm2, %v1333_v42  ;;  %v1710_v42 = vld [vmem:[#allocation4 + $0xa0] sm:$0xff] }
 0x8b4   : > { %2515 = vmatprep.mubr.msk.f32.mxu0 %vm2916_vm1, %v2915_v59  ;;  %2594 = vmatpush3.bf16.msra.mxu0 %v2593_v56  ;;  %v1708_v43 = vld [vmem:[#allocation4 + $0x90] sm:$0xff]  ;;  %v1714_v56 = vld [vmem:[#allocation4 + $0xc0] sm:$0xff] }
 0x8b5   : > { %2595 = vmatprep.subr.bf16.mxu0 %v2914_v6 }
 0x8b6   : > { %v1485_v44 = vpop.f32.mrb[12].mxu1 }
 0x8b7   : > { %v1489_v45 = vmul.f32 0.17677669, %v1485_v44  ;;  %v2501_v46 = vpop.f32.mrb[13].mxu1  ;;  %v1712_v44 = vld [vmem:[#allocation4 + $0xb0] sm:$0xff] }
 0x8b8   : > { %v2640_v46 = vpack.c.bf16 %v1712_v44, %v1708_v43  ;;  %v1748_v44 = vld [vmem:[#allocation4 + $0x1d0] sm:$0xff] }
 0x8b9   : > { %v1490_v47 = vsel %vm768_vm3, %v1489_v45, -inf }
 0x8ba   : > { %1491 = vmax.xlane.f32.xlu0 %v1490_v47 }
 0x8d0   : > { %1501 = vrot.lane.b32.xlu0 %v3141_v28, %s2919_s22  ;;  %v688_v28 = vld [vmem:[%s3321_s4 + $0x70] sm:$0xff] }
 0x8d1   : > { %v2596_v58 = vpack.c.bf16 %v689_v57, %v688_v28  ;;  %v1721_v28 = vld [vmem:[#allocation4 + $0xf8] sm:$0xff]  ;;  %v1718_v57 = vld [vmem:[#allocation4 + $0xe0] sm:$0xff] }
 0x8d3   : > { %2597 = vmatpush3.bf16.msra.mxu0 %v2596_v58  ;;  %v2642_v58 = vpack.c.bf16 %v1721_v28, %v1717_v54 }
 0x947   : > { %v1492_v48 = vpop.xlane.xlu0 %1491 }
 0x948   : > { %v1493_v49 = vsub.f32 %v1489_v45, %v1492_v48  ;;  %v2608_v45 = vpack.c.bf16 %v1710_v42, %v1706_v40  ;;  %v1753_v40 = vld [vmem:[#allocation4 + $0x1f8] sm:$0xff]  ;;  %v1750_v42 = vld [vmem:[#allocation4 + $0x1e0] sm:$0xff] }
 0x94a   : > { %v1494_v50 = vmul.f32 1.442695, %v1493_v49 }
 0x94b   : > { %v1502_v51 = vpop.permute.xlu0 %1501 }
 0x94c   : > { %2791 = vpow2.f32 %v1494_v50  ;;  %2503 = vmatpush3.msk.msra.mxu1 %vm456_vm0, %v1502_v51 }
 0x94d   : > { %2599 = vmatprep.subr.bf16.mxu1 %v2598_v14  ;;  %v1733_v14 = vld [vmem:[#allocation4 + $0x158] sm:$0xff] }
 0x956   : > { %v2792_v52 = vpop.eup %2791 }
 0x957   : > { %v1496_v53 = vsel %vm768_vm3, %v2792_v52, 0.0 }
 0x958   : > { %1497 = vadd.xlane.f32.xlu1 %v1496_v53  ;;  %v1719_v53 = vld [vmem:[#allocation4 + $0xe8] sm:$0xff] }
 0x986   : > { %v1406_v60 = vpop.f32.mrb[8].mxu0 }
 0x987   : > { %v1410_v61 = vadd.f32 %v1406_v60, %v3221_v17  ;;  %v2496_v62 = vpop.f32.mrb[9].mxu0  ;;  %v2630_v17 = vpack.c.bf16 %v1697_v15, %v1693_v13  ;;  %v2612_v60 = vpack.c.bf16 %v1718_v57, %v1714_v56  ;;  %v1735_v13 = vld [vmem:[#allocation4 + $0x168] sm:$0xff]  ;;  %v1737_v15 = vld [vmem:[#allocation4 + $0x178] sm:$0xff]  ;;  %v2271_v57 = vld [vmem:[%s3323_s6] ss:$0 sm:$0xff] }
 0x988   : > { %v1720_v62 = vld [vmem:[#allocation4 + $0xf0] sm:$0xff] }
 0x989   : > { %2631 = vmatprep.subr.bf16.mxu0 %v2630_v17  ;;  %v1730_v17 = vld [vmem:[#allocation4 + $0x140] sm:$0xff] }
 0x9e5   : > { %v1498_v63 = vpop.xlane.xlu1 %1497 }
 0x9e6   : > { %2793 = vrcp.f32 %v1498_v63 }
 0x9f0   : > { %v2794_v0 = vpop.eup %2793 }
 0x9f1   : > { %v1500_v1 = vmul.f32 %v2794_v0, %v2792_v52  ;;  %v1715_v52 = vld [vmem:[#allocation4 + $0xc8] sm:$0xff] }
 0x9f2   : > { %v2610_v55 = vpack.c.bf16 %v1719_v53, %v1715_v52  ;;  %v1723_v0 = vld [vmem:[#allocation4 + $0x108] sm:$0xff] }
 0x9f3   : > { %2505 = vmatmul.mubr.msk.f32.vlgmr.msra.gmra.mrb[14].mxu1 %vm780_vm4, %v1500_v1  ;;  %v1727_v1 = vld [vmem:[#allocation4 + $0x128] sm:$0xff] }
 0x9f4   : > { %1840 = vmatprep.mubr.f32.mxu1 %v2915_v59  ;;  %v1987_v53 = vld [vmem:[#allocation6 + $0x188] sm:$0xff] }
 0xac6   : > { %v1574_v2 = vpop.f32.mrb[14].mxu1 }
 0xac7   : > { %v2506_v3 = vpop.f32.mrb[15].mxu1  ;;  %2516 = vmatmul.mubr.msk.f32.vlgmr.msra.gmra.mrb[10].mxu0 %vm690_vm2, %v1574_v2  ;;  %v1725_v2 = vld [vmem:[#allocation4 + $0x118] sm:$0xff] }
 0xac8   : > { %1911 = vmatprep.mubr.f32.mxu0 %v2915_v59  ;;  %v1694_v59 = vld [vmem:[#allocation4 + $0x20] sm:$0xff]  ;;  %2633 = vmatpush1.bf16.msra.mxu0 %v2632_v22  ;;  %v2614_v3 = vpack.c.bf16 %v1727_v1, %v1723_v0  ;;  %v1739_v22 = vld [vmem:[#allocation4 + $0x188] sm:$0xff] }
 0xac9   : > { %v2600_v18 = vpack.c.bf16 %v1694_v59, %v1690_v16  ;;  %v2618_v16 = vpack.c.bf16 %v1735_v13, %v1731_v11  ;;  %v2650_v59 = vpack.c.bf16 %v1737_v15, %v1733_v14  ;;  %v1970_v0 = vld [vmem:[#allocation6 + $0x100] sm:$0xff]  ;;  %v1971_v1 = vld [vmem:[#allocation6 + $0x108] sm:$0xff]  ;;  %v1972_v14 = vld [vmem:[#allocation6 + $0x110] sm:$0xff] }
 0xaca   : > { %v1973_v15 = vld [vmem:[#allocation6 + $0x118] sm:$0xff] }
 0xacb   : > { %2601 = vmatpush1.bf16.msra.mxu1 %v2600_v18  ;;  %v1734_v18 = vld [vmem:[#allocation4 + $0x160] sm:$0xff] }
 0xacc   : > { %2603 = vmatprep.subr.bf16.mxu1 %v2602_v25  ;;  %v2620_v20 = vpack.c.bf16 %v1734_v18, %v1730_v17  ;;  %v1741_v25 = vld [vmem:[#allocation4 + $0x198] sm:$0xff]  ;;  %v1991_v17 = vld [vmem:[#allocation6 + $0x1a8] sm:$0xff] }
 0xacf   : > { %2605 = vmatpush1.bf16.msra.mxu1 %v2604_v33  ;;  %v1740_v33 = vld [vmem:[#allocation4 + $0x190] sm:$0xff] }
 0xad0   : > { %2607 = vmatprep.subr.bf16.mxu1 %v2606_v29  ;;  %v1749_v29 = vld [vmem:[#allocation4 + $0x1d8] sm:$0xff]  ;;  %v2656_v38 = vpack.c.bf16 %v1744_v34, %v1740_v33 }
 0xad1   : > { %v2658_v43 = vpack.c.bf16 %v1753_v40, %v1749_v29  ;;  %v1993_v34 = vld [vmem:[#allocation6 + $0x1b8] sm:$0xff] }
 0xad3   : > { %2609 = vmatpush1.bf16.msra.mxu1 %v2608_v45  ;;  %v1752_v45 = vld [vmem:[#allocation4 + $0x1f0] sm:$0xff] }
 0xad4   : > { %2611 = vmatprep.subr.bf16.mxu1 %v2610_v55 }
 0xad7   : > { %2613 = vmatpush1.bf16.msra.mxu1 %v2612_v60  ;;  %v2272_v60 = vld [vmem:[%s3324_s7] ss:$0 sm:$0xff] }
 0xad8   : > { %2615 = vmatprep.subr.bf16.mxu1 %v2614_v3  ;;  %v1957_v3 = vld [vmem:[#allocation6 + $0x98] sm:$0xff] }
 0xb9a   : > { %v1647_v6 = vpop.f32.mrb[10].mxu0 }
 0xb9b   : > { %v1651_v5 = vadd.f32 %v1647_v6, %v1410_v61  ;;  %v2517_v7 = vpop.f32.mrb[11].mxu0  ;;  %v1716_v61 = vld [vmem:[#allocation4 + $0xd0] sm:$0xff]  ;;  %v1729_v6 = vld [vmem:[#allocation4 + $0x138] sm:$0xff] }
 0xb9c   : > { %v2644_v63 = vpack.c.bf16 %v1720_v62, %v1716_v61  ;;  %v2646_v7 = vpack.c.bf16 %v1729_v6, %v1725_v2  ;;  %v1938_v61 = vld [vmem:[#allocation6] sm:$0xff]  ;;  %v1939_v62 = vld [vmem:[#allocation6 + $0x8] sm:$0xff]  ;;  %v1956_v2 = vld [vmem:[#allocation6 + $0x90] sm:$0xff] }
 0xb9d   : > { %v1659_v8 = vadd.f32 %v2270_v4, %v1651_v5  ;;  %v1722_v4 = vld [vmem:[#allocation4 + $0x100] sm:$0xff]  ;;  %v1988_v6 = vld [vmem:[#allocation6 + $0x190] sm:$0xff] }
 0xb9e   : > { %v1726_v5 = vld [vmem:[#allocation4 + $0x120] sm:$0xff] }
 0xb9f   : > { %v1660_v9 = vadd.f32 %v1659_v8, %v3131_v26  ;;  %v1705_v26 = vld [vmem:[#allocation4 + $0x78] sm:$0xff]  ;;  %v2616_v8 = vpack.c.bf16 %v1726_v5, %v1722_v4 }
 0xba0   : > { %v2634_v30 = vpack.c.bf16 %v1705_v26, %v1701_v24  ;;  %v2652_v24 = vpack.c.bf16 %v1736_v21, %v1732_v19  ;;  %v2622_v26 = vpack.c.bf16 %v1743_v23, %v1739_v22  ;;  %v1989_v4 = vld [vmem:[#allocation6 + $0x198] sm:$0xff]  ;;  %v2700_v19 = vpack.c.bf16 %v1973_v15, %v1972_v14  ;;  %v1943_v23 = vld [vmem:[#allocation6 + $0x28] sm:$0xff]  ;;  %v1968_v15 = vld [vmem:[#allocation6 + $0xf0] sm:$0xff] }
 0xba1   : > { %v1663_v10 = vsel %vm456_vm0, %v1660_v9, 0.0  ;;  %2617 = vmatpush1.bf16.msra.mxu1 %v2616_v8  ;;  %v2696_v8 = vpack.c.bf16 %v1971_v1, %v1970_v0  ;;  %v2698_v13 = vpack.c.bf16 %v1989_v4, %v1988_v6  ;;  %v1981_v0 = vld [vmem:[#allocation6 + $0x158] sm:$0xff]  ;;  %v1998_v6 = vld [vmem:[#allocation6 + $0x1e0] sm:$0xff] }
 0xba2   : > { %1664 = vadd.xlane.f32.xlu1 %v1663_v10  ;;  %2635 = vmatprep.subr.bf16.mxu0 %v2634_v30  ;;  %v1728_v10 = vld [vmem:[#allocation4 + $0x130] sm:$0xff]  ;;  %v1745_v30 = vld [vmem:[#allocation4 + $0x1b8] sm:$0xff] }
 0xba3   : > { %2637 = vmatpush1.bf16.msra.mxu0 %v2636_v37  ;;  %2619 = vmatprep.subr.bf16.mxu1 %v2618_v16  ;;  %v2654_v32 = vpack.c.bf16 %v1745_v30, %v1741_v25  ;;  %v1751_v37 = vld [vmem:[#allocation4 + $0x1e8] sm:$0xff]  ;;  %v1958_v16 = vld [vmem:[#allocation6 + $0xa0] sm:$0xff] }
 0xba4   : > { %2639 = vmatprep.subr.bf16.mxu0 %v2638_v41  ;;  %v2626_v39 = vpack.c.bf16 %v1751_v37, %v1747_v36  ;;  %v1746_v41 = vld [vmem:[#allocation4 + $0x1c0] sm:$0xff]  ;;  %v1945_v36 = vld [vmem:[#allocation6 + $0x38] sm:$0xff]  ;;  %v2706_v37 = vpack.c.bf16 %v1993_v34, %v1992_v27 }
 0xba5   : > { %2621 = vmatpush1.bf16.msra.mxu1 %v2620_v20  ;;  %v1942_v20 = vld [vmem:[#allocation6 + $0x20] sm:$0xff] }
 0xba6   : > { %2623 = vmatprep.subr.bf16.mxu1 %v2622_v26  ;;  %v1975_v26 = vld [vmem:[#allocation6 + $0x128] sm:$0xff]  ;;  %v2672_v25 = vpack.c.bf16 %v1943_v23, %v1942_v20  ;;  %v1985_v23 = vld [vmem:[#allocation6 + $0x178] sm:$0xff] }
 0xba7   : > { %2641 = vmatpush1.bf16.msra.mxu0 %v2640_v46  ;;  %v2628_v46 = vpack.c.bf16 %v1750_v42, %v1746_v41  ;;  %v1962_v41 = vld [vmem:[#allocation6 + $0xc0] sm:$0xff]  ;;  %v1963_v42 = vld [vmem:[#allocation6 + $0xc8] sm:$0xff] }
 0xba8   : > { %2643 = vmatprep.subr.bf16.mxu0 %v2642_v58 }
 0xba9   : > { %2625 = vmatpush1.bf16.msra.mxu1 %v2624_v35  ;;  %v1944_v35 = vld [vmem:[#allocation6 + $0x30] sm:$0xff] }
 0xbaa   : > { %2627 = vmatprep.subr.bf16.mxu1 %v2626_v39  ;;  %v2676_v29 = vpack.c.bf16 %v1945_v36, %v1944_v35  ;;  %v1977_v39 = vld [vmem:[#allocation6 + $0x138] sm:$0xff] }
 0xbab   : > { %2645 = vmatpush1.bf16.msra.mxu0 %v2644_v63 }
 0xbac   : > { %2647 = vmatprep.subr.bf16.mxu0 %v2646_v7  ;;  %v2664_v7 = vpack.c.bf16 %v1939_v62, %v1938_v61 }
 0xbad   : > { %2629 = vmatpush1.bf16.msra.mxu1 %v2628_v46  ;;  %v1946_v46 = vld [vmem:[#allocation6 + $0x40] sm:$0xff] }
 0xc2f   : > { %v1665_v47 = vpop.xlane.xlu1 %1664 }
 0xc30   : > { %v1666_v48 = vmul.f32 0.0078125, %v1665_v47  ;;  %v2660_v47 = vpack.c.bf16 %v1752_v45, %v1748_v44  ;;  %v2678_v44 = vpack.c.bf16 %v1963_v42, %v1962_v41  ;;  %v1995_v45 = vld [vmem:[#allocation6 + $0x1c8] sm:$0xff] }
 0xc32   : > { %v3286_v49 = vsub.f32 %v1660_v9, %v1666_v48  ;;  %v1724_v9 = vld [vmem:[#allocation4 + $0x110] sm:$0xff]  ;;  %v1954_v48 = vld [vmem:[#allocation6 + $0x80] sm:$0xff] }
 0xc33   : > { %v2648_v12 = vpack.c.bf16 %v1728_v10, %v1724_v9  ;;  %v1940_v9 = vld [vmem:[#allocation6 + $0x10] sm:$0xff]  ;;  %v1941_v10 = vld [vmem:[#allocation6 + $0x18] sm:$0xff] }
 0xc34   : > { %v1668_v50 = vmul.f32 %v3286_v49, %v3286_v49  ;;  %v2668_v18 = vpack.c.bf16 %v1941_v10, %v1940_v9 }
 0xc35   : > { %2649 = vmatpush1.bf16.msra.mxu0 %v2648_v12  ;;  %v2666_v12 = vpack.c.bf16 %v1957_v3, %v1956_v2  ;;  %v1966_v2 = vld [vmem:[#allocation6 + $0xe0] sm:$0xff]  ;;  %v1967_v3 = vld [vmem:[#allocation6 + $0xe8] sm:$0xff] }
 0xc36   : > { %v1669_v51 = vsel %vm456_vm0, %v1668_v50, 0.0  ;;  %2651 = vmatprep.subr.bf16.mxu0 %v2650_v59  ;;  %v1955_v50 = vld [vmem:[#allocation6 + $0x88] sm:$0xff]  ;;  %v2686_v4 = vpack.c.bf16 %v1967_v3, %v1966_v2 }
 0xc37   : > { %1670 = vadd.xlane.f32.xlu1 %v1669_v51  ;;  %v1986_v51 = vld [vmem:[#allocation6 + $0x180] sm:$0xff]  ;;  %v2662_v52 = vpack.c.bf16 %v1955_v50, %v1954_v48  ;;  %v1959_v59 = vld [vmem:[#allocation6 + $0xa8] sm:$0xff] }
 0xc38   : > { %v2694_v54 = vpack.c.bf16 %v1987_v53, %v1986_v51  ;;  %v2670_v21 = vpack.c.bf16 %v1959_v59, %v1958_v16  ;;  %v1978_v51 = vld [vmem:[#allocation6 + $0x140] sm:$0xff]  ;;  %v1969_v16 = vld [vmem:[#allocation6 + $0xf8] sm:$0xff]  ;;  %v2000_v59 = vld [vmem:[#allocation6 + $0x1f0] sm:$0xff] }
 0xc39   : > { %2653 = vmatpush1.bf16.msra.mxu0 %v2652_v24  ;;  %2663 = vmatprep.subr.bf16.mxu1 %v2662_v52  ;;  %v1974_v24 = vld [vmem:[#allocation6 + $0x120] sm:$0xff]  ;;  %v1979_v52 = vld [vmem:[#allocation6 + $0x148] sm:$0xff] }
 0xc3a   : > { %2655 = vmatprep.subr.bf16.mxu0 %v2654_v32  ;;  %v2704_v30 = vpack.c.bf16 %v1975_v26, %v1974_v24  ;;  %v1961_v32 = vld [vmem:[#allocation6 + $0xb8] sm:$0xff]  ;;  %v2712_v53 = vpack.c.bf16 %v1979_v52, %v1978_v51  ;;  %v1756_v26 = vlaneseq }
 0xc3b   : > { %v2674_v33 = vpack.c.bf16 %v1961_v32, %v1960_v31  ;;  %v1754_v32 = vld [vmem:[%s3326_s9] sm:$0xf] }
 0xc3d   : > { %2657 = vmatpush1.bf16.msra.mxu0 %v2656_v38  ;;  %v1976_v38 = vld [vmem:[#allocation6 + $0x130] sm:$0xff] }
 0xc3e   : > { %2659 = vmatprep.subr.bf16.mxu0 %v2658_v43  ;;  %v2708_v40 = vpack.c.bf16 %v1977_v39, %v1976_v38  ;;  %v1994_v43 = vld [vmem:[#allocation6 + $0x1c0] sm:$0xff] }
 0xc3f   : > { %v2710_v48 = vpack.c.bf16 %v1995_v45, %v1994_v43 }
 0xc41   : > { %2661 = vmatpush1.bf16.msra.mxu0 %v2660_v47  ;;  %v1947_v47 = vld [vmem:[#allocation6 + $0x48] sm:$0xff] }
 0xc42   : > { %2695 = vmatprep.subr.bf16.mxu0 %v2694_v54  ;;  %v2680_v50 = vpack.c.bf16 %v1947_v47, %v1946_v46  ;;  %v1964_v54 = vld [vmem:[#allocation6 + $0xd0] sm:$0xff] }
 0xcc4   : > { %v1671_v55 = vpop.xlane.xlu1 %1670 }
 0xcc5   : > { %v1672_v28 = vmul.f32 0.0078125, %v1671_v55  ;;  %v1965_v55 = vld [vmem:[#allocation6 + $0xd8] sm:$0xff] }
 0xcc7   : > { %v1673_v56 = vadd.f32 1e-05, %v1672_v28  ;;  %v1996_v28 = vld [vmem:[#allocation6 + $0x1d0] sm:$0xff] }
 0xcc9   : > { %2795 = vrsqrt.f32 %v1673_v56  ;;  %v2682_v56 = vpack.c.bf16 %v1965_v55, %v1964_v54 }
 0xcd3   : > { %v2796_v58 = vpop.eup %2795 }
 0xcd4   : > { %v1675_v63 = vmul.f32 %v2796_v58, %v3286_v49  ;;  %v1990_v49 = vld [vmem:[#allocation6 + $0x1a0] sm:$0xff]  ;;  %v1948_v58 = vld [vmem:[#allocation6 + $0x50] sm:$0xff] }
 0xcd5   : > { %v2702_v22 = vpack.c.bf16 %v1991_v17, %v1990_v49  ;;  %v2690_v49 = vpack.c.bf16 %v1969_v16, %v1968_v15  ;;  %v2001_v17 = vld [vmem:[#allocation6 + $0x1f8] sm:$0xff] }
 0xcd6   : > { %v1682_v5 = vmul.f32 %v2271_v57, %v1675_v63  ;;  %v1997_v57 = vld [vmem:[#allocation6 + $0x1d8] sm:$0xff]  ;;  %v1980_v63 = vld [vmem:[#allocation6 + $0x150] sm:$0xff]  ;;  %v2722_v20 = vpack.c.bf16 %v2001_v17, %v2000_v59 }
 0xcd7   : > { %v2714_v61 = vpack.c.bf16 %v1997_v57, %v1996_v28  ;;  %v2716_v1 = vpack.c.bf16 %v1981_v0, %v1980_v63 }
 0xcd8   : > { %v3298_v11 = vadd.f32 %v2272_v60, %v1682_v5  ;;  %v1949_v60 = vld [vmem:[#allocation6 + $0x58] sm:$0xff]  ;;  %v1999_v5 = vld [vmem:[#allocation6 + $0x1e8] sm:$0xff] }
 0xcd9   : > { %v2684_v62 = vpack.c.bf16 %v1949_v60, %v1948_v58  ;;  %v2718_v9 = vpack.c.bf16 %v1999_v5, %v1998_v6  ;;  %v2273_v6 = vld [vmem:[%s3328_s11] ss:$0 sm:$0xff] }
 0xcda   : > { %1841 = vmatmul.mubr.f32.vlgmr.msra.gmra.mrb[16].mxu1 %v3298_v11  ;;  %1912 = vmatmul.mubr.f32.vlgmr.msra.gmra.mrb[12].mxu0 %v3298_v11 }
 0xcdb   : > { %2665 = vmatpush3.bf16.msra.mxu1 %v2664_v7  ;;  %2697 = vmatpush3.bf16.msra.mxu0 %v2696_v8  ;;  %v1950_v7 = vld [vmem:[#allocation6 + $0x60] sm:$0xff]  ;;  %v1951_v8 = vld [vmem:[#allocation6 + $0x68] sm:$0xff] }
 0xcdc   : > { %2667 = vmatprep.subr.bf16.mxu1 %v2666_v12  ;;  %2699 = vmatprep.subr.bf16.mxu0 %v2698_v13  ;;  %v2688_v10 = vpack.c.bf16 %v1951_v8, %v1950_v7  ;;  %v1982_v12 = vld [vmem:[#allocation6 + $0x160] sm:$0xff]  ;;  %v1983_v13 = vld [vmem:[#allocation6 + $0x168] sm:$0xff] }
 0xcdd   : > { %v2720_v14 = vpack.c.bf16 %v1983_v13, %v1982_v12 }
 0xcdf   : > { %2669 = vmatpush3.bf16.msra.mxu1 %v2668_v18  ;;  %2701 = vmatpush3.bf16.msra.mxu0 %v2700_v19  ;;  %v1952_v18 = vld [vmem:[#allocation6 + $0x70] sm:$0xff]  ;;  %v1953_v19 = vld [vmem:[#allocation6 + $0x78] sm:$0xff] }
 0xce0   : > { %2671 = vmatprep.subr.bf16.mxu1 %v2670_v21  ;;  %2703 = vmatprep.subr.bf16.mxu0 %v2702_v22  ;;  %v2692_v21 = vpack.c.bf16 %v1953_v19, %v1952_v18  ;;  %v1984_v22 = vld [vmem:[#allocation6 + $0x170] sm:$0xff] }
 0xce1   : > { %v2724_v24 = vpack.c.bf16 %v1985_v23, %v1984_v22 }
 0xce3   : > { %2673 = vmatpush3.bf16.msra.mxu1 %v2672_v25  ;;  %2705 = vmatpush3.bf16.msra.mxu0 %v2704_v30  ;;  %v1757_v25 = vshrl.u32 %v1756_v26, 7 }
 0xce4   : > { %2675 = vmatprep.subr.bf16.mxu1 %v2674_v33  ;;  %2707 = vmatprep.subr.bf16.mxu0 %v2706_v37 }
 0xce5   : > { %v1758_v30 = vsub.s32 0, %v1757_v25  ;;  %v1766_v31 = vsub.s32 2, %v1757_v25  ;;  %v1762_v27 = vsub.s32 1, %v1757_v25  ;;  %v1770_v33 = vsub.s32 3, %v1757_v25 }
 0xce7   : > { %2677 = vmatpush3.bf16.msra.mxu1 %v2676_v29  ;;  %2709 = vmatpush3.bf16.msra.mxu0 %v2708_v40  ;;  %v1759_v34 = vrot.slane %v1754_v32, %v1758_v30  ;;  %v1767_v35 = vrot.slane %v1754_v32, %v1766_v31  ;;  %v1763_v36 = vrot.slane %v1754_v32, %v1762_v27 }
 0xce8   : > { %2679 = vmatprep.subr.bf16.mxu1 %v2678_v44  ;;  %2711 = vmatprep.subr.bf16.mxu0 %v2710_v48  ;;  %v1771_v37 = vrot.slane %v1754_v32, %v1770_v33 }
 0xceb   : > { %2681 = vmatpush3.bf16.msra.mxu1 %v2680_v50  ;;  %2713 = vmatpush3.bf16.msra.mxu0 %v2712_v53 }
 0xcec   : > { %2683 = vmatprep.subr.bf16.mxu1 %v2682_v56  ;;  %2715 = vmatprep.subr.bf16.mxu0 %v2714_v61 }
 0xcef   : > { %2685 = vmatpush3.bf16.msra.mxu1 %v2684_v62  ;;  %2717 = vmatpush3.bf16.msra.mxu0 %v2716_v1 }
 0xcf0   : > { %2687 = vmatprep.subr.bf16.mxu1 %v2686_v4  ;;  %2719 = vmatprep.subr.bf16.mxu0 %v2718_v9 }
 0xcf3   : > { %2689 = vmatpush3.bf16.msra.mxu1 %v2688_v10  ;;  %2721 = vmatpush3.bf16.msra.mxu0 %v2720_v14 }
 0xcf4   : > { %2691 = vmatprep.subr.bf16.mxu1 %v2690_v49  ;;  %2723 = vmatprep.subr.bf16.mxu0 %v2722_v20 }
 0xcf7   : > { %2693 = vmatpush3.bf16.msra.mxu1 %v2692_v21  ;;  %2725 = vmatpush3.bf16.msra.mxu0 %v2724_v24 }
 0xdad   : > { %v1842_v29 = vpop.f32.mrb[16].mxu1  ;;  %v1913_v38 = vpop.f32.mrb[12].mxu0 }
 0xdae   : > { %v1843_v39 = vadd.f32 %v1842_v29, %v1759_v34  ;;  %v1914_v40 = vadd.f32 %v1913_v38, %v1767_v35  ;;  %v1844_v41 = vpop.f32.mrb[17].mxu1  ;;  %v1915_v42 = vpop.f32.mrb[13].mxu0 }
 0xdaf   : > { %v1845_v43 = vadd.f32 %v1844_v41, %v1763_v36  ;;  %v1916_v44 = vadd.f32 %v1915_v42, %v1771_v37 }
 0xdb0   : > { %v1922_v45 = vmul.f32 0.70710677, %v1843_v39  ;;  %v1924_v46 = vmul.f32 0.70710677, %v1914_v40  ;;  %v1918_v57 = vmul.f32 0.5, %v1843_v39  ;;  %v1920_v61 = vmul.f32 0.5, %v1914_v40 }
 0xdb1   : > { %v1923_v47 = vmul.f32 0.70710677, %v1845_v43  ;;  %v1925_v48 = vmul.f32 0.70710677, %v1916_v44  ;;  %v1919_v28 = vmul.f32 0.5, %v1845_v43  ;;  %v1921_v58 = vmul.f32 0.5, %v1916_v44 }
 0xdb2   : > { %2797 = verf.f32 %v1922_v45 }
 0xdb3   : > { %2799 = verf.f32 %v1924_v46 }
 0xdb4   : > { %2801 = verf.f32 %v1923_v47 }
 0xdb5   : > { %2803 = verf.f32 %v1925_v48 }
 0xdbc   : > { %v2798_v50 = vpop.eup %2797 }
 0xdbd   : > { %v2800_v51 = vpop.eup %2799  ;;  %v1930_v53 = vadd.f32 1.0, %v2798_v50 }
 0xdbe   : > { %v2802_v52 = vpop.eup %2801  ;;  %v1932_v55 = vadd.f32 1.0, %v2800_v51 }
 0xdbf   : > { %v2804_v54 = vpop.eup %2803  ;;  %v1931_v56 = vadd.f32 1.0, %v2802_v52  ;;  %v1934_v63 = vmul.f32 %v1930_v53, %v1918_v57 }
 0xdc0   : > { %v1933_v60 = vadd.f32 1.0, %v2804_v54  ;;  %v1936_v1 = vmul.f32 %v1932_v55, %v1920_v61 }
 0xdc1   : > { %v1935_v62 = vmul.f32 %v1931_v56, %v1919_v28 }
 0xdc2   : > { %v1937_v0 = vmul.f32 %v1933_v60, %v1921_v58 }
 0xdc3   : > { %2073 = vmatprep.mubr.f32.mxu1 %v1935_v62 }
 0xdc4   : > { %2143 = vmatprep.mubr.f32.mxu0 %v1937_v0  ;;  %2074 = vmatmul.mubr.f32.vlgmr.msra.gmra.mrb[18].mxu1 %v1934_v63 }
 0xdc5   : > { %2144 = vmatmul.mubr.f32.vlgmr.msra.gmra.mrb[14].mxu0 %v1936_v1 }
 0xe97   : > { %v2361_v2 = vpop.f32.mrb[18].mxu1 }
 0xe98   : > { %v2396_v3 = vpop.f32.mrb[14].mxu0  ;;  %v2362_v4 = vpop.f32.mrb[19].mxu1 }
 0xe99   : > { %v2363_v5 = vadd.f32 %v2362_v4, %v2361_v2  ;;  %v2397_v7 = vpop.f32.mrb[15].mxu0 }
 0xe9a   : > { %v2398_v8 = vadd.f32 %v2397_v7, %v2396_v3 }
 0xe9b   : > { %v2076_v9 = vadd.f32 %v2363_v5, %v2273_v6 }
 0xe9d   : > { %v2146_v10 = vadd.f32 %v2398_v8, %v2076_v9 }
 0xe9f   : > { %v2149_v12 = vadd.f32 %v2146_v10, %v3298_v11 }
 0xea1   : > { %2150 = vst [vmem:[%s452_s16] sm:$0x7] %v2149_v12 }
 0xea2 PF: > { %s3342_s17 = sld [smem:[#allocation9_spill]] }
 0xea8   : > { %s24_s21 = sadd.s32 1, %s3342_s17  }
 0xea9   : > { %p21_p5 = scmp.ge.s32.totalorder %s24_s21, 18  }
 0xeab   :  { %23 = sbr.rel (!%p21_p5) target bundleno = 2 (0x2), region = 111 }
 0xeb2   :  { %2170 = vsyncpa [#allocation3], 1 }
 0xeb3   :  { %2172 = vsyncpa [#allocation3 + $0x1], 1 }
 0xeb4   :  { %2173 = vsyncpa [#allocation5], 1 }

// kernel: encoder_stack_pallas.5
= control target key start
LH: loop header
LB: loop body
LE: loop exit
PB: predicated region body
PF: predicated region fallthrough
CT: control target
= control target key end

     0   :  { %s2766_s21 = smov 0   ;;  %s3522_s0 = inlined_call_operand.vmem [shape: f32[16,3,128], index: 0, kind: input, shape index: {}]   ;;  %s3523_s1 = inlined_call_operand.vmem [shape: f32[1,128], index: 1, kind: input, shape index: {}]   ;;  %s3524_s2 = inlined_call_operand.vmem [shape: f32[1,128], index: 2, kind: input, shape index: {}]   ;;  %s3525_s3 = inlined_call_operand.vmem [shape: f32[128,384], index: 3, kind: input, shape index: {}]   ;;  %s3526_s4 = inlined_call_operand.vmem [shape: f32[128,128], index: 4, kind: input, shape index: {}]   ;;  %s3527_s5 = inlined_call_operand.vmem [shape: f32[1,128], index: 5, kind: input, shape index: {}]   ;;  %s3528_s6 = inlined_call_operand.vmem [shape: f32[1,128], index: 6, kind: input, shape index: {}]   ;;  %s3529_s7 = inlined_call_operand.vmem [shape: f32[1,128], index: 7, kind: input, shape index: {}]   ;;  %s3530_s8 = inlined_call_operand.vmem [shape: f32[128,512], index: 8, kind: input, shape index: {}]   ;;  %s3531_s9 = inlined_call_operand.vmem [shape: f32[1,512], index: 9, kind: input, shape index: {}]   ;;  %s3532_s10 = inlined_call_operand.vmem [shape: f32[512,128], index: 10, kind: input, shape index: {}]   ;;  %s3533_s11 = inlined_call_operand.vmem [shape: f32[1,128], index: 11, kind: input, shape index: {}]   ;;  %s3534_s12 = inlined_call_operand.vmem [shape: f32[16,3,128], index: 12, kind: output, shape index: {}]  }
   0x1 LB: > { %s2160_s22 = sadd.s32 4294967295, %s2693_s21   ;;  %p2164_p0 = scmp.ge.s32.totalorder %s2693_s21, 1  ;;  %s2693_s21 = sphi %s2766_s21, %s22_s21  }
   0x2   : > { %p361_p1 = scmp.lt.s32.totalorder %s2693_s21, 17 }
   0x4   : > { %p362_p2 = pnand %p2164_p0, %p361_p1 }
   0x5   : > { %p401_p3 = scmp.lt.s32.totalorder (!%p362_p2), %s2160_s22, 15  ;;  %vm412_vm0 = vcmask (!%p362_p2), 1042432   ;;  %v442_v2 = vld [vmem:[%s3525_s3 + $0x8] sm:$0xff] (!%p362_p2)  ;;  %v445_v3 = vld [vmem:[%s3525_s3 + $0x20] sm:$0xff] (!%p362_p2)  ;;  %v2695_v6 = vmov (!%p362_p2), 0.0|0.0   ;;  %v444_v7 = vld [vmem:[%s3525_s3 + $0x18] sm:$0xff] (!%p362_p2) }
   0x6   : > { %365 = sbr.rel (%p362_p2) target bundleno = 3665 (0xe51), region = 68  ;;  %v441_v4 = vld [vmem:[%s3525_s3] sm:$0xff] (!%p362_p2)  ;;  %v2437_v5 = vpack.c.bf16 (!%p362_p2), %v445_v3, %v442_v2  ;;  %2469 = vmatprep.subr.bf16.mxu1 (!%p362_p2), %v2695_v6  ;;  %v443_v8 = vld [vmem:[%s3525_s3 + $0x10] sm:$0xff] (!%p362_p2)  ;;  %v446_v9 = vld [vmem:[%s3525_s3 + $0x28] sm:$0xff] (!%p362_p2)  ;;  %v2696_v59 = vmov (!%p362_p2), 0.0   ;;  %vm2697_vm1 = vmmov (!%p362_p2), 0  }
   0x7   : > { %v2439_v10 = vpack.c.bf16 (!%p362_p2), %v444_v7, %v441_v4  ;;  %v2470_v11 = vpack.c.bf16 (!%p362_p2), %v446_v9, %v443_v8  ;;  %v448_v12 = vld [vmem:[%s3525_s3 + $0x38] sm:$0xff] (!%p362_p2)  ;;  %v451_v13 = vld [vmem:[%s3525_s3 + $0x50] sm:$0xff] (!%p362_p2)  ;;  %v450_v16 = vld [vmem:[%s3525_s3 + $0x48] sm:$0xff] (!%p362_p2)  ;;  %553 = vmatprep.mubr.f32.mxu0 (!%p362_p2), %v2696_v59  ;;  %2350 = vmatprep.mubr.msk.f32.mxu1 (!%p362_p2), %vm2697_vm1, %v2696_v59  ;;  %vm646_vm2 = vcmask (!%p362_p2), 261120   ;;  %s2698_s19 = smov (!%p362_p2), 96   ;;  %vm724_vm3 = vcmask (!%p362_p2), 18432  }
   0x8   : > { %v447_v14 = vld [vmem:[%s3525_s3 + $0x30] sm:$0xff] (!%p362_p2)  ;;  %2438 = vmatprep.subr.bf16.mxu0 (!%p362_p2), %v2437_v5  ;;  %v2441_v15 = vpack.c.bf16 (!%p362_p2), %v451_v13, %v448_v12  ;;  %v449_v17 = vld [vmem:[%s3525_s3 + $0x40] sm:$0xff] (!%p362_p2)  ;;  %v452_v18 = vld [vmem:[%s3525_s3 + $0x58] sm:$0xff] (!%p362_p2)  ;;  %s2699_s20 = smov (!%p362_p2), 64   ;;  %vm736_vm4 = vcmask (!%p362_p2), 23552  }
   0x9   : > { %2440 = vmatpush1.bf16.msra.mxu0 (!%p362_p2), %v2439_v10  ;;  %2471 = vmatpush3.bf16.msra.mxu1 (!%p362_p2), %v2470_v11  ;;  %v2443_v19 = vpack.c.bf16 (!%p362_p2), %v450_v16, %v447_v14  ;;  %v2473_v20 = vpack.c.bf16 (!%p362_p2), %v452_v18, %v449_v17  ;;  %v454_v21 = vld [vmem:[%s3525_s3 + $0x68] sm:$0xff] (!%p362_p2)  ;;  %v457_v22 = vld [vmem:[%s3525_s3 + $0x80] sm:$0xff] (!%p362_p2)  ;;  %v456_v25 = vld [vmem:[%s3525_s3 + $0x78] sm:$0xff] (!%p362_p2) }
   0xa   : > { %v453_v23 = vld [vmem:[%s3525_s3 + $0x60] sm:$0xff] (!%p362_p2)  ;;  %2442 = vmatprep.subr.bf16.mxu0 (!%p362_p2), %v2441_v15  ;;  %2472 = vmatprep.subr.bf16.mxu1 (!%p362_p2), %v2695_v6  ;;  %v2445_v24 = vpack.c.bf16 (!%p362_p2), %v457_v22, %v454_v21  ;;  %v455_v26 = vld [vmem:[%s3525_s3 + $0x70] sm:$0xff] (!%p362_p2)  ;;  %v458_v27 = vld [vmem:[%s3525_s3 + $0x88] sm:$0xff] (!%p362_p2) }
   0xb   : > { %v2447_v28 = vpack.c.bf16 (!%p362_p2), %v456_v25, %v453_v23  ;;  %v2476_v29 = vpack.c.bf16 (!%p362_p2), %v458_v27, %v455_v26  ;;  %v460_v35 = vld [vmem:[%s3525_s3 + $0x98] sm:$0xff] (!%p362_p2)  ;;  %v463_v36 = vld [vmem:[%s3525_s3 + $0xb0] sm:$0xff] (!%p362_p2)  ;;  %v462_v39 = vld [vmem:[%s3525_s3 + $0xa8] sm:$0xff] (!%p362_p2) }
   0xc   : > { %v2449_v37 = vpack.c.bf16 (!%p362_p2), %v463_v36, %v460_v35  ;;  %v459_v38 = vld [vmem:[%s3525_s3 + $0x90] sm:$0xff] (!%p362_p2)  ;;  %v461_v40 = vld [vmem:[%s3525_s3 + $0xa0] sm:$0xff] (!%p362_p2)  ;;  %v464_v42 = vld [vmem:[%s3525_s3 + $0xb8] sm:$0xff] (!%p362_p2) }
   0xd   : > { %s3536_s22 = smov (!%p401_p3, %s2160_s22), 15  ;;  %2444 = vmatpush1.bf16.msra.mxu0 %v2443_v19  ;;  %2474 = vmatpush3.bf16.msra.mxu1 %v2473_v20  ;;  %v2451_v41 = vpack.c.bf16 %v462_v39, %v459_v38  ;;  %v2479_v43 = vpack.c.bf16 %v464_v42, %v461_v40  ;;  %v466_v44 = vld [vmem:[%s3525_s3 + $0xc8] sm:$0xff]  ;;  %v469_v45 = vld [vmem:[%s3525_s3 + $0xe0] sm:$0xff]  ;;  %v468_v48 = vld [vmem:[%s3525_s3 + $0xd8] sm:$0xff] }
   0xe   : > { %s2165_s23 = sshll.u32 %s3536_s22, 2  ;;  %2446 = vmatprep.subr.bf16.mxu0 %v2445_v24  ;;  %2475 = vmatprep.subr.bf16.mxu1 %v2695_v6  ;;  %v2453_v46 = vpack.c.bf16 %v469_v45, %v466_v44  ;;  %v465_v47 = vld [vmem:[%s3525_s3 + $0xc0] sm:$0xff]  ;;  %v467_v49 = vld [vmem:[%s3525_s3 + $0xd0] sm:$0xff]  ;;  %v470_v51 = vld [vmem:[%s3525_s3 + $0xe8] sm:$0xff] }
   0xf   : > { %s404_s26 = scalar_lea.vmem %s3522_s0, %s2165_s23  ;;  %v2455_v50 = vpack.c.bf16 %v468_v48, %v465_v47  ;;  %v472_v52 = vld [vmem:[%s3525_s3 + $0xf8] sm:$0xff]  ;;  %v475_v53 = vld [vmem:[%s3525_s3 + $0x110] sm:$0xff]  ;;  %v2482_v54 = vpack.c.bf16 %v470_v51, %v467_v49  ;;  %v474_v57 = vld [vmem:[%s3525_s3 + $0x108] sm:$0xff] }
  0x10   : > { %v409_v0 = vld [vmem:[%s404_s26] sm:$0x7]  ;;  %v2457_v55 = vpack.c.bf16 %v475_v53, %v472_v52  ;;  %v471_v56 = vld [vmem:[%s3525_s3 + $0xf0] sm:$0xff]  ;;  %v476_v61 = vld [vmem:[%s3525_s3 + $0x118] sm:$0xff]  ;;  %s2700_s26 = smov 32  }
  0x11   : > { %v413_v1 = vsel %vm412_vm0, %v409_v0, 0.0  ;;  %2448 = vmatpush1.bf16.msra.mxu0 %v2447_v28  ;;  %2477 = vmatpush3.bf16.msra.mxu1 %v2476_v29  ;;  %v473_v58 = vld [vmem:[%s3525_s3 + $0x100] sm:$0xff]  ;;  %v2459_v60 = vpack.c.bf16 %v474_v57, %v471_v56  ;;  %v478_v62 = vld [vmem:[%s3525_s3 + $0x128] sm:$0xff]  ;;  %v480_v3 = vld [vmem:[%s3525_s3 + $0x138] sm:$0xff] }
  0x12   : > { %414 = vadd.xlane.f32.xlu0 %v413_v1  ;;  %2478 = vmatprep.subr.bf16.mxu1 %v2695_v6  ;;  %v481_v63 = vld [vmem:[%s3525_s3 + $0x140] sm:$0xff]  ;;  %v479_v4 = vld [vmem:[%s3525_s3 + $0x130] sm:$0xff]  ;;  %v482_v5 = vld [vmem:[%s3525_s3 + $0x148] sm:$0xff] }
  0x13   : > { %2450 = vmatprep.subr.bf16.mxu0 %v2449_v37  ;;  %v2461_v1 = vpack.c.bf16 %v481_v63, %v478_v62  ;;  %v477_v2 = vld [vmem:[%s3525_s3 + $0x120] sm:$0xff]  ;;  %v484_v7 = vld [vmem:[%s3525_s3 + $0x158] sm:$0xff]  ;;  %v487_v8 = vld [vmem:[%s3525_s3 + $0x170] sm:$0xff]  ;;  %v2488_v10 = vpack.c.bf16 %v482_v5, %v479_v4 }
  0x14   : > { %v2463_v9 = vpack.c.bf16 %v480_v3, %v477_v2  ;;  %v2465_v11 = vpack.c.bf16 %v487_v8, %v484_v7  ;;  %v483_v12 = vld [vmem:[%s3525_s3 + $0x150] sm:$0xff]  ;;  %v486_v13 = vld [vmem:[%s3525_s3 + $0x168] sm:$0xff]  ;;  %v485_v14 = vld [vmem:[%s3525_s3 + $0x160] sm:$0xff] }
  0x15   : > { %2452 = vmatpush1.bf16.msra.mxu0 %v2451_v41  ;;  %2480 = vmatpush3.bf16.msra.mxu1 %v2479_v43  ;;  %v488_v15 = vld [vmem:[%s3525_s3 + $0x178] sm:$0xff]  ;;  %v2467_v16 = vpack.c.bf16 %v486_v13, %v483_v12  ;;  %v2167_v22 = vld [vmem:[%s3523_s1] ss:$0 sm:$0xff]  ;;  %v636_v56 = vld [vmem:[%s3526_s4 + $0x30] sm:$0xff] }
  0x16   : > { %2481 = vmatprep.subr.bf16.mxu1 %v2695_v6  ;;  %2454 = vmatprep.subr.bf16.mxu0 %v2453_v46  ;;  %v2491_v17 = vpack.c.bf16 %v488_v15, %v485_v14  ;;  %v2168_v24 = vld [vmem:[%s3524_s2] ss:$0 sm:$0xff]  ;;  %v632_v4 = vld [vmem:[%s3526_s4 + $0x10] sm:$0xff]  ;;  %v633_v5 = vld [vmem:[%s3526_s4 + $0x18] sm:$0xff] }
  0x17   : > { %v630_v63 = vld [vmem:[%s3526_s4] sm:$0xff]  ;;  %v2503_v7 = vpack.c.bf16 %v633_v5, %v632_v4 }
  0x18   : > { %v2189_v4 = vld [vmem:[%s3527_s5] ss:$0 sm:$0xff] }
  0x19   : > { %2456 = vmatpush1.bf16.msra.mxu0 %v2455_v50  ;;  %2483 = vmatpush3.bf16.msra.mxu1 %v2482_v54  ;;  %v634_v54 = vld [vmem:[%s3526_s4 + $0x20] sm:$0xff] }
  0x1a   : > { %2458 = vmatprep.subr.bf16.mxu0 %v2457_v55  ;;  %2484 = vmatprep.subr.bf16.mxu1 %v2695_v6  ;;  %v635_v55 = vld [vmem:[%s3526_s4 + $0x28] sm:$0xff] }
  0x1b   : > { %v2494_v57 = vpack.c.bf16 %v635_v55, %v634_v54  ;;  %v642_v54 = vld [vmem:[%s3526_s4 + $0x60] sm:$0xff]  ;;  %v643_v55 = vld [vmem:[%s3526_s4 + $0x68] sm:$0xff] }
  0x1d   : > { %2460 = vmatpush1.bf16.msra.mxu0 %v2459_v60 }
  0x1e   : > { %2462 = vmatprep.subr.bf16.mxu0 %v2461_v1 }
  0x21   : > { %2464 = vmatpush1.bf16.msra.mxu0 %v2463_v9 }
  0x22   : > { %2466 = vmatprep.subr.bf16.mxu0 %v2465_v11 }
  0x25   : > { %2468 = vmatpush1.bf16.msra.mxu0 %v2467_v16 }
  0x26   : > { %2363 = vmatprep.subr.mxu0 %v2696_v59 }
  0x9f   : > { %v415_v30 = vpop.xlane.xlu0 %414 }
  0xa0   : > { %v417_v31 = vmul.f32 0.0078125, %v415_v30 }
  0xa2   : > { %v2841_v32 = vsub.f32 %v409_v0, %v417_v31  ;;  %v2485_v0 = vpack.c.bf16 %v476_v61, %v473_v58  ;;  %v637_v58 = vld [vmem:[%s3526_s4 + $0x38] sm:$0xff] }
  0xa3   : > { %v2497_v60 = vpack.c.bf16 %v637_v58, %v636_v56  ;;  %v2512_v56 = vpack.c.bf16 %v643_v55, %v642_v54  ;;  %v1673_v54 = vld [vmem:[%s3530_s8 + $0xd8] sm:$0xff] }
  0xa4   : > { %v419_v33 = vmul.f32 %v2841_v32, %v2841_v32  ;;  %2486 = vmatpush3.bf16.msra.mxu1 %v2485_v0  ;;  %v631_v0 = vld [vmem:[%s3526_s4 + $0x8] sm:$0xff] }
  0xa5   : > { %2487 = vmatprep.subr.bf16.mxu1 %v2695_v6  ;;  %v2500_v2 = vpack.c.bf16 %v631_v0, %v630_v63 }
  0xa6   : > { %v420_v34 = vsel %vm412_vm0, %v419_v33, 0.0 }
  0xa7   : > { %421 = vadd.xlane.f32.xlu0 %v420_v34 }
  0xa8   : > { %2489 = vmatpush3.bf16.msra.mxu1 %v2488_v10 }
  0xa9   : > { %2490 = vmatprep.subr.bf16.mxu1 %v2695_v6 }
  0xac   : > { %2492 = vmatpush3.bf16.msra.mxu1 %v2491_v17 }
  0xad   : > { %2353 = vmatprep.subr.mxu1 %v2696_v59 }
 0x134   : > { %v422_v18 = vpop.xlane.xlu0 %421 }
 0x135   : > { %v423_v19 = vmul.f32 0.0078125, %v422_v18 }
 0x137   : > { %v424_v20 = vadd.f32 1e-05, %v423_v19 }
 0x139   : > { %2659 = vrsqrt.f32 %v424_v20 }
 0x143   : > { %v2660_v21 = vpop.eup %2659 }
 0x144   : > { %v426_v23 = vmul.f32 %v2660_v21, %v2841_v32 }
 0x146   : > { %v433_v25 = vmul.f32 %v2167_v22, %v426_v23 }
 0x148   : > { %v2952_v26 = vadd.f32 %v2168_v24, %v433_v25 }
 0x14a   : > { %554 = vmatmul.mubr.f32.vlgmr.msra.gmra.mrb[0].mxu0 %v2952_v26  ;;  %2351 = vmatmul.mubr.f32.vlgmr.msra.gmra.mrb[0].mxu1 %v2952_v26 }
 0x14b   : > { %2355 = vmatprep.mubr.msk.f32.mxu1 %vm2697_vm1, %v2696_v59  ;;  %2365 = vmatprep.mubr.msk.f32.mxu0 %vm2697_vm1, %v2696_v59 }
 0x21d   : > { %v2960_v27 = vpop.f32.mrb[0].mxu0  ;;  %v2962_v28 = vpop.f32.mrb[0].mxu1 }
 0x21e   : > { %v2964_v29 = vpop.f32.mrb[1].mxu0  ;;  %v2352_v30 = vpop.f32.mrb[1].mxu1 }
 0x21f   : > { %815 = vrot.lane.b32.xlu1 %v2964_v29, %s2698_s19  ;;  %2354 = vmatpush3.xpose.msk.msra.mxu1 %vm646_vm2, %v2964_v29 }
 0x220   : > { %2358 = vmatprep.subr.mxu1 %v2696_v59 }
 0x222   : > { %2356 = vmatmul.mubr.msk.f32.vlgmr.msra.gmra.mrb[2].mxu1 %vm646_vm2, %v2960_v27 }
 0x223   : > { %813 = vrot.lane.b32.xlu1 %v2960_v27, %s2698_s19  ;;  %2359 = vmatpush3.msk.msra.mxu1 %vm412_vm0, %v2962_v28 }
 0x224   : > { %2360 = vmatprep.mubr.msk.f32.mxu1 %vm2697_vm1, %v2696_v59  ;;  %2368 = vmatprep.subr.mxu1 %v2696_v59 }
 0x291   : > { %v816_v31 = vpop.permute.xlu1 %815 }
 0x292   : > { %2364 = vmatpush3.xpose.msk.msra.mxu0 %vm646_vm2, %v816_v31 }
 0x293   : > { %2493 = vmatprep.subr.bf16.mxu0 %v2695_v6 }
 0x295   : > { %v814_v32 = vpop.permute.xlu1 %813 }
 0x296   : > { %2366 = vmatmul.mubr.msk.f32.vlgmr.msra.gmra.mrb[2].mxu0 %vm646_vm2, %v814_v32 }
 0x297   : > { %2381 = vmatprep.mubr.msk.f32.mxu0 %vm2697_vm1, %v2696_v59  ;;  %2495 = vmatpush3.bf16.msra.mxu0 %v2494_v57  ;;  %v645_v57 = vld [vmem:[%s3526_s4 + $0x78] sm:$0xff] }
 0x298   : > { %2496 = vmatprep.subr.bf16.mxu0 %v2695_v6 }
 0x29b   : > { %2498 = vmatpush3.bf16.msra.mxu0 %v2497_v60 }
 0x29c   : > { %2395 = vmatprep.subr.mxu0 %v2696_v59 }
 0x2f5   : > { %v719_v33 = vpop.f32.mrb[2].mxu1 }
 0x2f6   : > { %v723_v34 = vmul.f32 0.17677669, %v719_v33  ;;  %v2357_v35 = vpop.f32.mrb[3].mxu1  ;;  %v639_v33 = vld [vmem:[%s3526_s4 + $0x48] sm:$0xff] }
 0x2f8   : > { %v725_v36 = vsel %vm724_vm3, %v723_v34, -inf }
 0x2f9   : > { %726 = vmax.xlane.f32.xlu0 %v725_v36  ;;  %v641_v36 = vld [vmem:[%s3526_s4 + $0x58] sm:$0xff] }
 0x369   : > { %v887_v37 = vpop.f32.mrb[2].mxu0 }
 0x36a   : > { %v891_v38 = vmul.f32 0.17677669, %v887_v37  ;;  %v2367_v39 = vpop.f32.mrb[3].mxu0 }
 0x36c   : > { %v892_v40 = vsel %vm724_vm3, %v891_v38, -inf }
 0x36d   : > { %893 = vmax.xlane.f32.xlu1 %v892_v40 }
 0x37e   : > { %1126 = vrot.lane.b32.xlu1 %v2960_v27, %s2699_s20 }
 0x386   : > { %v727_v41 = vpop.xlane.xlu0 %726 }
 0x387   : > { %v728_v42 = vsub.f32 %v723_v34, %v727_v41  ;;  %v640_v34 = vld [vmem:[%s3526_s4 + $0x50] sm:$0xff] }
 0x388   : > { %v2509_v37 = vpack.c.bf16 %v641_v36, %v640_v34  ;;  %v1660_v34 = vld [vmem:[%s3530_s8 + $0x70] sm:$0xff]  ;;  %v1667_v36 = vld [vmem:[%s3530_s8 + $0xa8] sm:$0xff] }
 0x389   : > { %v729_v43 = vmul.f32 1.442695, %v728_v42 }
 0x38b   : > { %2661 = vpow2.f32 %v729_v43 }
 0x395   : > { %v2662_v44 = vpop.eup %2661 }
 0x396   : > { %v731_v45 = vsel %vm724_vm3, %v2662_v44, 0.0 }
 0x397   : > { %732 = vadd.xlane.f32.xlu0 %v731_v45 }
 0x3fa   : > { %v894_v46 = vpop.xlane.xlu1 %893 }
 0x3fb   : > { %v895_v47 = vsub.f32 %v891_v38, %v894_v46 }
 0x3fd   : > { %v896_v48 = vmul.f32 1.442695, %v895_v47 }
 0x3fe   : > { %v1127_v13 = vpop.permute.xlu1 %1126 }
 0x3ff   : > { %2663 = vpow2.f32 %v896_v48 }
 0x409   : > { %v2664_v49 = vpop.eup %2663 }
 0x40a   : > { %v898_v50 = vsel %vm724_vm3, %v2664_v49, 0.0 }
 0x40b   : > { %899 = vadd.xlane.f32.xlu0 %v898_v50 }
 0x421   : > { %903 = vrot.lane.b32.xlu0 %v2962_v28, %s2698_s19 }
 0x424   : > { %v733_v51 = vpop.xlane.xlu0 %732 }
 0x425   : > { %2665 = vrcp.f32 %v733_v51  ;;  %1128 = vrot.lane.b32.xlu0 %v2964_v29, %s2699_s20 }
 0x42f   : > { %v2666_v52 = vpop.eup %2665 }
 0x430   : > { %v735_v53 = vmul.f32 %v2666_v52, %v2662_v44 }
 0x432   : > { %2361 = vmatmul.mubr.msk.f32.vlgmr.msra.gmra.mrb[4].mxu1 %vm736_vm4, %v735_v53 }
 0x433   : > { %2370 = vmatprep.mubr.msk.f32.mxu1 %vm2697_vm1, %v2696_v59 }
 0x498   : > { %v900_v61 = vpop.xlane.xlu0 %899 }
 0x499   : > { %2667 = vrcp.f32 %v900_v61 }
 0x49c   : > { %v904_v62 = vpop.permute.xlu0 %903 }
 0x49d   : > { %2369 = vmatpush3.msk.msra.mxu1 %vm412_vm0, %v904_v62 }
 0x49e   : > { %2499 = vmatprep.subr.bf16.mxu1 %v2695_v6 }
 0x4a0   : > { %v1129_v11 = vpop.permute.xlu0 %1128 }
 0x4a3   : > { %v2668_v1 = vpop.eup %2667 }
 0x4a4   : > { %v902_v3 = vmul.f32 %v2668_v1, %v2664_v49 }
 0x4a6   : > { %2371 = vmatmul.mubr.msk.f32.vlgmr.msra.gmra.mrb[6].mxu1 %vm736_vm4, %v902_v3 }
 0x4a7   : > { %2501 = vmatpush3.bf16.msra.mxu1 %v2500_v2  ;;  %2392 = vmatprep.mubr.msk.f32.mxu1 %vm2697_vm1, %v2696_v59 }
 0x4a8   : > { %2502 = vmatprep.subr.bf16.mxu1 %v2695_v6 }
 0x4ab   : > { %2504 = vmatpush3.bf16.msra.mxu1 %v2503_v7 }
 0x4ac   : > { %2400 = vmatprep.subr.mxu1 %v2696_v59 }
 0x505   : > { %v809_v8 = vpop.f32.mrb[4].mxu1 }
 0x506   : > { %v2362_v9 = vpop.f32.mrb[5].mxu1  ;;  %2393 = vmatmul.mubr.msk.f32.vlgmr.msra.gmra.mrb[8].mxu1 %vm646_vm2, %v809_v8 }
 0x507   : > { %2402 = vmatprep.mubr.msk.f32.mxu1 %vm2697_vm1, %v2696_v59 }
 0x579   : > { %v976_v10 = vpop.f32.mrb[6].mxu1 }
 0x57a   : > { %v2372_v12 = vpop.f32.mrb[7].mxu1  ;;  %2382 = vmatmul.mubr.msk.f32.vlgmr.msra.gmra.mrb[4].mxu0 %vm646_vm2, %v976_v10 }
 0x57b   : > { %2396 = vmatpush3.xpose.msk.msra.mxu0 %vm646_vm2, %v1129_v11  ;;  %2397 = vmatprep.mubr.msk.f32.mxu0 %vm2697_vm1, %v2696_v59  ;;  %v1647_v11 = vld [vmem:[%s3530_s8 + $0x8] sm:$0xff]  ;;  %v1649_v12 = vld [vmem:[%s3530_s8 + $0x18] sm:$0xff] }
 0x57c   : > { %2505 = vmatprep.subr.bf16.mxu0 %v2695_v6 }
 0x57e   : > { %2398 = vmatmul.mubr.msk.f32.vlgmr.msra.gmra.mrb[6].mxu0 %vm646_vm2, %v1127_v13 }
 0x57f   : > { %2413 = vmatprep.mubr.msk.f32.mxu0 %vm2697_vm1, %v2696_v59 }
 0x5d9   : > { %v1122_v14 = vpop.f32.mrb[8].mxu1 }
 0x5da   : > { %v2394_v15 = vpop.f32.mrb[9].mxu1 }
 0x5db   : > { %v1650_v15 = vld [vmem:[%s3530_s8 + $0x20] sm:$0xff] }
 0x64d   : > { %v1049_v16 = vpop.f32.mrb[4].mxu0 }
 0x64e   : > { %v3042_v17 = vadd.f32 %v1122_v14, %v1049_v16  ;;  %v2383_v18 = vpop.f32.mrb[5].mxu0  ;;  %v1646_v14 = vld [vmem:[%s3530_s8] sm:$0xff] }
 0x64f   : > { %v1648_v18 = vld [vmem:[%s3530_s8 + $0x10] sm:$0xff] }
 0x651   : > { %v1200_v19 = vpop.f32.mrb[6].mxu0 }
 0x652   : > { %v1204_v20 = vmul.f32 0.17677669, %v1200_v19  ;;  %v2399_v21 = vpop.f32.mrb[7].mxu0  ;;  %v1652_v19 = vld [vmem:[%s3530_s8 + $0x30] sm:$0xff] }
 0x653   : > { %v2551_v21 = vpack.c.bf16 %v1652_v19, %v1648_v18  ;;  %v1688_v18 = vld [vmem:[%s3530_s8 + $0x150] sm:$0xff] }
 0x654   : > { %v1205_v22 = vsel %vm724_vm3, %v1204_v20, -inf }
 0x655   : > { %1206 = vmax.xlane.f32.xlu0 %v1205_v22  ;;  %v1659_v22 = vld [vmem:[%s3530_s8 + $0x68] sm:$0xff] }
 0x66b   : > { %1216 = vrot.lane.b32.xlu0 %v2962_v28, %s2699_s20 }
 0x66f   : > { %1367 = vrot.lane.b32.xlu0 %v2960_v27, %s2700_s26  ;;  %v638_v27 = vld [vmem:[%s3526_s4 + $0x40] sm:$0xff] }
 0x670   : > { %v2506_v35 = vpack.c.bf16 %v639_v33, %v638_v27  ;;  %v1656_v27 = vld [vmem:[%s3530_s8 + $0x50] sm:$0xff] }
 0x672   : > { %2507 = vmatpush3.bf16.msra.mxu0 %v2506_v35  ;;  %v1663_v35 = vld [vmem:[%s3530_s8 + $0x88] sm:$0xff] }
 0x673   : > { %2508 = vmatprep.subr.bf16.mxu0 %v2695_v6 }
 0x676   : > { %2510 = vmatpush3.bf16.msra.mxu0 %v2509_v37  ;;  %v2555_v37 = vpack.c.bf16 %v1660_v34, %v1656_v27  ;;  %v1698_v27 = vld [vmem:[%s3530_s8 + $0x1a0] sm:$0xff]  ;;  %v1700_v34 = vld [vmem:[%s3530_s8 + $0x1b0] sm:$0xff] }
 0x677   : > { %2511 = vmatprep.subr.bf16.mxu0 %v2695_v6 }
 0x6e2   : > { %v1207_v23 = vpop.xlane.xlu0 %1206 }
 0x6e3   : > { %v1208_v24 = vsub.f32 %v1204_v20, %v1207_v23  ;;  %v1655_v20 = vld [vmem:[%s3530_s8 + $0x48] sm:$0xff]  ;;  %v1657_v23 = vld [vmem:[%s3530_s8 + $0x58] sm:$0xff] }
 0x6e5   : > { %v1209_v25 = vmul.f32 1.442695, %v1208_v24  ;;  %v1661_v24 = vld [vmem:[%s3530_s8 + $0x78] sm:$0xff] }
 0x6e6   : > { %v1217_v30 = vpop.permute.xlu0 %1216 }
 0x6e7   : > { %2669 = vpow2.f32 %v1209_v25  ;;  %2401 = vmatpush3.msk.msra.mxu1 %vm412_vm0, %v1217_v30  ;;  %v2521_v25 = vpack.c.bf16 %v1659_v22, %v1655_v20  ;;  %v2553_v30 = vpack.c.bf16 %v1661_v24, %v1657_v23  ;;  %v1692_v20 = vld [vmem:[%s3530_s8 + $0x170] sm:$0xff]  ;;  %v1699_v22 = vld [vmem:[%s3530_s8 + $0x1a8] sm:$0xff] }
 0x6e8   : > { %2416 = vmatprep.subr.mxu1 %v2696_v59  ;;  %v2571_v23 = vpack.c.bf16 %v1692_v20, %v1688_v18 }
 0x6ea   : > { %v1368_v41 = vpop.permute.xlu0 %1367 }
 0x6f1   : > { %v2670_v31 = vpop.eup %2669 }
 0x6f2   : > { %v1211_v32 = vsel %vm724_vm3, %v2670_v31, 0.0 }
 0x6f3   : > { %1212 = vadd.xlane.f32.xlu1 %v1211_v32  ;;  %v1658_v32 = vld [vmem:[%s3530_s8 + $0x60] sm:$0xff] }
 0x704   : > { %1369 = vrot.lane.b32.xlu1 %v2964_v29, %s2700_s26 }
 0x780   : > { %v1213_v29 = vpop.xlane.xlu1 %1212 }
 0x781   : > { %2671 = vrcp.f32 %v1213_v29  ;;  %v2525_v29 = vpack.c.bf16 %v1667_v36, %v1663_v35  ;;  %v1703_v36 = vld [vmem:[%s3530_s8 + $0x1c8] sm:$0xff] }
 0x784   : > { %v1370_v40 = vpop.permute.xlu1 %1369 }
 0x78b   : > { %v2672_v38 = vpop.eup %2671 }
 0x78c   : > { %v1215_v39 = vmul.f32 %v2672_v38, %v2670_v31  ;;  %v1654_v31 = vld [vmem:[%s3530_s8 + $0x40] sm:$0xff]  ;;  %v1665_v38 = vld [vmem:[%s3530_s8 + $0x98] sm:$0xff] }
 0x78d   : > { %v2523_v33 = vpack.c.bf16 %v1658_v32, %v1654_v31  ;;  %v1694_v31 = vld [vmem:[%s3530_s8 + $0x180] sm:$0xff] }
 0x78e   : > { %2403 = vmatmul.mubr.msk.f32.vlgmr.msra.gmra.mrb[10].mxu1 %vm736_vm4, %v1215_v39  ;;  %v1669_v39 = vld [vmem:[%s3530_s8 + $0xb8] sm:$0xff]  ;;  %v2543_v35 = vpack.c.bf16 %v1698_v27, %v1694_v31  ;;  %v1916_v31 = vld [vmem:[%s3532_s10 + $0xb0] sm:$0xff] }
 0x78f   : > { %2417 = vmatpush3.xpose.msk.msra.mxu1 %vm646_vm2, %v1370_v40  ;;  %2418 = vmatprep.mubr.msk.f32.mxu1 %vm2697_vm1, %v2696_v59  ;;  %v1662_v40 = vld [vmem:[%s3530_s8 + $0x80] sm:$0xff]  ;;  %v1948_v27 = vld [vmem:[%s3532_s10 + $0x1b0] sm:$0xff] }
 0x790   : > { %2421 = vmatprep.subr.mxu1 %v2696_v59 }
 0x792   : > { %2419 = vmatmul.mubr.msk.f32.vlgmr.msra.gmra.mrb[12].mxu1 %vm646_vm2, %v1368_v41  ;;  %v2557_v41 = vpack.c.bf16 %v1669_v39, %v1665_v38 }
 0x793   : > { %2423 = vmatprep.mubr.msk.f32.mxu1 %vm2697_vm1, %v2696_v59 }
 0x861   : > { %v1289_v42 = vpop.f32.mrb[10].mxu1 }
 0x862   : > { %v2404_v43 = vpop.f32.mrb[11].mxu1  ;;  %2414 = vmatmul.mubr.msk.f32.vlgmr.msra.gmra.mrb[8].mxu0 %vm646_vm2, %v1289_v42  ;;  %v1666_v42 = vld [vmem:[%s3530_s8 + $0xa0] sm:$0xff] }
 0x863   : > { %2434 = vmatprep.mubr.msk.f32.mxu0 %vm2697_vm1, %v2696_v59  ;;  %2513 = vmatpush3.bf16.msra.mxu0 %v2512_v56  ;;  %v1664_v43 = vld [vmem:[%s3530_s8 + $0x90] sm:$0xff]  ;;  %v1670_v56 = vld [vmem:[%s3530_s8 + $0xc0] sm:$0xff] }
 0x864   : > { %2514 = vmatprep.subr.bf16.mxu0 %v2695_v6 }
 0x865   : > { %v1441_v44 = vpop.f32.mrb[12].mxu1 }
 0x866   : > { %v1445_v45 = vmul.f32 0.17677669, %v1441_v44  ;;  %v2420_v46 = vpop.f32.mrb[13].mxu1  ;;  %v1668_v44 = vld [vmem:[%s3530_s8 + $0xb0] sm:$0xff] }
 0x867   : > { %v2559_v46 = vpack.c.bf16 %v1668_v44, %v1664_v43  ;;  %v1704_v44 = vld [vmem:[%s3530_s8 + $0x1d0] sm:$0xff] }
 0x868   : > { %v1446_v47 = vsel %vm724_vm3, %v1445_v45, -inf }
 0x869   : > { %1447 = vmax.xlane.f32.xlu0 %v1446_v47 }
 0x87f   : > { %1457 = vrot.lane.b32.xlu0 %v2962_v28, %s2700_s26  ;;  %v644_v28 = vld [vmem:[%s3526_s4 + $0x70] sm:$0xff]  ;;  %s408_s26 = scalar_lea.vmem %s3534_s12, %s2165_s23 }
 0x880   : > { %v2515_v58 = vpack.c.bf16 %v645_v57, %v644_v28  ;;  %v1677_v28 = vld [vmem:[%s3530_s8 + $0xf8] sm:$0xff]  ;;  %v1674_v57 = vld [vmem:[%s3530_s8 + $0xe0] sm:$0xff] }
 0x882   : > { %2516 = vmatpush3.bf16.msra.mxu0 %v2515_v58  ;;  %v2561_v58 = vpack.c.bf16 %v1677_v28, %v1673_v54 }
 0x8f6   : > { %v1448_v48 = vpop.xlane.xlu0 %1447 }
 0x8f7   : > { %v1449_v49 = vsub.f32 %v1445_v45, %v1448_v48  ;;  %v2527_v45 = vpack.c.bf16 %v1666_v42, %v1662_v40  ;;  %v1709_v40 = vld [vmem:[%s3530_s8 + $0x1f8] sm:$0xff]  ;;  %v1706_v42 = vld [vmem:[%s3530_s8 + $0x1e0] sm:$0xff] }
 0x8f9   : > { %v1450_v50 = vmul.f32 1.442695, %v1449_v49 }
 0x8fa   : > { %v1458_v51 = vpop.permute.xlu0 %1457 }
 0x8fb   : > { %2673 = vpow2.f32 %v1450_v50  ;;  %2422 = vmatpush3.msk.msra.mxu1 %vm412_vm0, %v1458_v51 }
 0x905   : > { %v2674_v52 = vpop.eup %2673 }
 0x906   : > { %v1452_v53 = vsel %vm724_vm3, %v2674_v52, 0.0 }
 0x907   : > { %1453 = vadd.xlane.f32.xlu1 %v1452_v53  ;;  %v1675_v53 = vld [vmem:[%s3530_s8 + $0xe8] sm:$0xff] }
 0x935   : > { %v1362_v60 = vpop.f32.mrb[8].mxu0 }
 0x936   : > { %v1366_v61 = vadd.f32 %v1362_v60, %v3042_v17  ;;  %v2415_v62 = vpop.f32.mrb[9].mxu0  ;;  %v2519_v17 = vpack.c.bf16 %v1650_v15, %v1646_v14  ;;  %v2531_v60 = vpack.c.bf16 %v1674_v57, %v1670_v56  ;;  %v2190_v57 = vld [vmem:[%s3528_s6] ss:$0 sm:$0xff] }
 0x937   : > { %v1676_v62 = vld [vmem:[%s3530_s8 + $0xf0] sm:$0xff] }
 0x994   : > { %v1454_v63 = vpop.xlane.xlu1 %1453 }
 0x995   : > { %2675 = vrcp.f32 %v1454_v63 }
 0x99f   : > { %v2676_v0 = vpop.eup %2675 }
 0x9a0   : > { %v1456_v1 = vmul.f32 %v2676_v0, %v2674_v52  ;;  %v1671_v52 = vld [vmem:[%s3530_s8 + $0xc8] sm:$0xff] }
 0x9a1   : > { %v2529_v55 = vpack.c.bf16 %v1675_v53, %v1671_v52  ;;  %v1679_v0 = vld [vmem:[%s3530_s8 + $0x108] sm:$0xff] }
 0x9a2   : > { %2424 = vmatmul.mubr.msk.f32.vlgmr.msra.gmra.mrb[14].mxu1 %vm736_vm4, %v1456_v1  ;;  %v1683_v1 = vld [vmem:[%s3530_s8 + $0x128] sm:$0xff] }
 0x9a3   : > { %1796 = vmatprep.mubr.f32.mxu1 %v2696_v59  ;;  %v1943_v53 = vld [vmem:[%s3532_s10 + $0x188] sm:$0xff] }
 0xa75   : > { %v1530_v2 = vpop.f32.mrb[14].mxu1 }
 0xa76   : > { %v2425_v3 = vpop.f32.mrb[15].mxu1  ;;  %2435 = vmatmul.mubr.msk.f32.vlgmr.msra.gmra.mrb[10].mxu0 %vm646_vm2, %v1530_v2  ;;  %v1681_v2 = vld [vmem:[%s3530_s8 + $0x118] sm:$0xff] }
 0xa77   : > { %1867 = vmatprep.mubr.f32.mxu0 %v2696_v59  ;;  %v1651_v59 = vld [vmem:[%s3530_s8 + $0x28] sm:$0xff]  ;;  %v2533_v3 = vpack.c.bf16 %v1683_v1, %v1679_v0  ;;  %v1926_v0 = vld [vmem:[%s3532_s10 + $0x100] sm:$0xff] }
 0xa78   : > { %v2517_v13 = vpack.c.bf16 %v1651_v59, %v1647_v11  ;;  %v1687_v11 = vld [vmem:[%s3530_s8 + $0x148] sm:$0xff] }
 0xa79   : > { %v1927_v1 = vld [vmem:[%s3532_s10 + $0x108] sm:$0xff] }
 0xa7a   : > { %2518 = vmatprep.subr.bf16.mxu1 %v2517_v13  ;;  %v1689_v13 = vld [vmem:[%s3530_s8 + $0x158] sm:$0xff] }
 0xa7b   : > { %2520 = vmatpush1.bf16.msra.mxu1 %v2519_v17  ;;  %v1690_v17 = vld [vmem:[%s3530_s8 + $0x160] sm:$0xff] }
 0xa7c   : > { %2522 = vmatprep.subr.bf16.mxu1 %v2521_v25  ;;  %v1697_v25 = vld [vmem:[%s3530_s8 + $0x198] sm:$0xff] }
 0xa7f   : > { %2524 = vmatpush1.bf16.msra.mxu1 %v2523_v33  ;;  %v1696_v33 = vld [vmem:[%s3530_s8 + $0x190] sm:$0xff] }
 0xa80   : > { %2526 = vmatprep.subr.bf16.mxu1 %v2525_v29  ;;  %v1705_v29 = vld [vmem:[%s3530_s8 + $0x1d8] sm:$0xff]  ;;  %v2575_v38 = vpack.c.bf16 %v1700_v34, %v1696_v33 }
 0xa81   : > { %v2577_v43 = vpack.c.bf16 %v1709_v40, %v1705_v29  ;;  %v1949_v34 = vld [vmem:[%s3532_s10 + $0x1b8] sm:$0xff] }
 0xa83   : > { %2528 = vmatpush1.bf16.msra.mxu1 %v2527_v45  ;;  %v1708_v45 = vld [vmem:[%s3530_s8 + $0x1f0] sm:$0xff] }
 0xa84   : > { %2530 = vmatprep.subr.bf16.mxu1 %v2529_v55 }
 0xa87   : > { %2532 = vmatpush1.bf16.msra.mxu1 %v2531_v60  ;;  %v2191_v60 = vld [vmem:[%s3529_s7] ss:$0 sm:$0xff] }
 0xa88   : > { %2534 = vmatprep.subr.bf16.mxu1 %v2533_v3  ;;  %v1913_v3 = vld [vmem:[%s3532_s10 + $0x98] sm:$0xff] }
 0xb49   : > { %v1603_v6 = vpop.f32.mrb[10].mxu0 }
 0xb4a   : > { %v1607_v5 = vadd.f32 %v1603_v6, %v1366_v61  ;;  %v2436_v7 = vpop.f32.mrb[11].mxu0  ;;  %v1672_v61 = vld [vmem:[%s3530_s8 + $0xd0] sm:$0xff]  ;;  %v1685_v6 = vld [vmem:[%s3530_s8 + $0x138] sm:$0xff] }
 0xb4b   : > { %v2563_v63 = vpack.c.bf16 %v1676_v62, %v1672_v61  ;;  %v2565_v7 = vpack.c.bf16 %v1685_v6, %v1681_v2  ;;  %v1894_v61 = vld [vmem:[%s3532_s10] sm:$0xff]  ;;  %v1895_v62 = vld [vmem:[%s3532_s10 + $0x8] sm:$0xff]  ;;  %v1912_v2 = vld [vmem:[%s3532_s10 + $0x90] sm:$0xff] }
 0xb4c   : > { %v1615_v8 = vadd.f32 %v2189_v4, %v1607_v5  ;;  %v1678_v4 = vld [vmem:[%s3530_s8 + $0x100] sm:$0xff]  ;;  %v1945_v6 = vld [vmem:[%s3532_s10 + $0x198] sm:$0xff] }
 0xb4d   : > { %v1682_v5 = vld [vmem:[%s3530_s8 + $0x120] sm:$0xff] }
 0xb4e   : > { %v1616_v9 = vadd.f32 %v1615_v8, %v2952_v26  ;;  %v1653_v26 = vld [vmem:[%s3530_s8 + $0x38] sm:$0xff]  ;;  %v2535_v8 = vpack.c.bf16 %v1682_v5, %v1678_v4  ;;  %v2583_v5 = vpack.c.bf16 %v1895_v62, %v1894_v61 }
 0xb4f   : > { %v2549_v16 = vpack.c.bf16 %v1653_v26, %v1649_v12  ;;  %v1691_v12 = vld [vmem:[%s3530_s8 + $0x168] sm:$0xff]  ;;  %v1693_v26 = vld [vmem:[%s3530_s8 + $0x178] sm:$0xff] }
 0xb50   : > { %v1619_v10 = vsel %vm412_vm0, %v1616_v9, 0.0  ;;  %2536 = vmatpush1.bf16.msra.mxu1 %v2535_v8  ;;  %v2537_v14 = vpack.c.bf16 %v1691_v12, %v1687_v11  ;;  %v2569_v15 = vpack.c.bf16 %v1693_v26, %v1689_v13  ;;  %v1896_v8 = vld [vmem:[%s3532_s10 + $0x10] sm:$0xff]  ;;  %v2585_v11 = vpack.c.bf16 %v1913_v3, %v1912_v2  ;;  %v1929_v13 = vld [vmem:[%s3532_s10 + $0x118] sm:$0xff]  ;;  %v1914_v26 = vld [vmem:[%s3532_s10 + $0xa0] sm:$0xff] }
 0xb51   : > { %1620 = vadd.xlane.f32.xlu1 %v1619_v10  ;;  %2550 = vmatprep.subr.bf16.mxu0 %v2549_v16  ;;  %v1684_v10 = vld [vmem:[%s3530_s8 + $0x130] sm:$0xff]  ;;  %v1686_v16 = vld [vmem:[%s3530_s8 + $0x140] sm:$0xff]  ;;  %v1923_v3 = vld [vmem:[%s3532_s10 + $0xe8] sm:$0xff] }
 0xb52   : > { %2552 = vmatpush1.bf16.msra.mxu0 %v2551_v21  ;;  %v2539_v19 = vpack.c.bf16 %v1690_v17, %v1686_v16  ;;  %v1695_v21 = vld [vmem:[%s3530_s8 + $0x188] sm:$0xff]  ;;  %2538 = vmatprep.subr.bf16.mxu1 %v2537_v14  ;;  %v1928_v12 = vld [vmem:[%s3532_s10 + $0x110] sm:$0xff]  ;;  %v1922_v2 = vld [vmem:[%s3532_s10 + $0xe0] sm:$0xff] }
 0xb53   : > { %2554 = vmatprep.subr.bf16.mxu0 %v2553_v30  ;;  %v2541_v24 = vpack.c.bf16 %v1699_v22, %v1695_v21  ;;  %v1701_v30 = vld [vmem:[%s3530_s8 + $0x1b8] sm:$0xff]  ;;  %v1915_v14 = vld [vmem:[%s3532_s10 + $0xa8] sm:$0xff]  ;;  %v2619_v18 = vpack.c.bf16 %v1929_v13, %v1928_v12  ;;  %v1924_v13 = vld [vmem:[%s3532_s10 + $0xf0] sm:$0xff] }
 0xb54   : > { %v2573_v32 = vpack.c.bf16 %v1701_v30, %v1697_v25  ;;  %2540 = vmatpush1.bf16.msra.mxu1 %v2539_v19  ;;  %v1947_v16 = vld [vmem:[%s3532_s10 + $0x1a8] sm:$0xff]  ;;  %v1898_v19 = vld [vmem:[%s3532_s10 + $0x20] sm:$0xff]  ;;  %v2589_v20 = vpack.c.bf16 %v1915_v14, %v1914_v26  ;;  %v1925_v26 = vld [vmem:[%s3532_s10 + $0xf8] sm:$0xff] }
 0xb55   : > { %2542 = vmatprep.subr.bf16.mxu1 %v2541_v24  ;;  %v1899_v22 = vld [vmem:[%s3532_s10 + $0x28] sm:$0xff]  ;;  %v1956_v14 = vld [vmem:[%s3532_s10 + $0x1f0] sm:$0xff] }
 0xb56   : > { %2556 = vmatpush1.bf16.msra.mxu0 %v2555_v37  ;;  %v1707_v37 = vld [vmem:[%s3530_s8 + $0x1e8] sm:$0xff]  ;;  %v2591_v25 = vpack.c.bf16 %v1899_v22, %v1898_v19  ;;  %v1941_v22 = vld [vmem:[%s3532_s10 + $0x178] sm:$0xff] }
 0xb57   : > { %2558 = vmatprep.subr.bf16.mxu0 %v2557_v41  ;;  %v2545_v39 = vpack.c.bf16 %v1707_v37, %v1703_v36  ;;  %v1702_v41 = vld [vmem:[%s3530_s8 + $0x1c0] sm:$0xff]  ;;  %v1931_v24 = vld [vmem:[%s3532_s10 + $0x128] sm:$0xff]  ;;  %v1901_v36 = vld [vmem:[%s3532_s10 + $0x38] sm:$0xff]  ;;  %v2625_v37 = vpack.c.bf16 %v1949_v34, %v1948_v27 }
 0xb58   : > { %2544 = vmatpush1.bf16.msra.mxu1 %v2543_v35  ;;  %v1900_v35 = vld [vmem:[%s3532_s10 + $0x30] sm:$0xff] }
 0xb59   : > { %2546 = vmatprep.subr.bf16.mxu1 %v2545_v39  ;;  %v2595_v29 = vpack.c.bf16 %v1901_v36, %v1900_v35  ;;  %v1933_v39 = vld [vmem:[%s3532_s10 + $0x138] sm:$0xff] }
 0xb5a   : > { %2560 = vmatpush1.bf16.msra.mxu0 %v2559_v46  ;;  %v2547_v46 = vpack.c.bf16 %v1706_v42, %v1702_v41  ;;  %v1918_v41 = vld [vmem:[%s3532_s10 + $0xc0] sm:$0xff]  ;;  %v1919_v42 = vld [vmem:[%s3532_s10 + $0xc8] sm:$0xff] }
 0xb5b   : > { %2562 = vmatprep.subr.bf16.mxu0 %v2561_v58 }
 0xb5c   : > { %2548 = vmatpush1.bf16.msra.mxu1 %v2547_v46  ;;  %v1902_v46 = vld [vmem:[%s3532_s10 + $0x40] sm:$0xff] }
 0xb5e   : > { %2564 = vmatpush1.bf16.msra.mxu0 %v2563_v63 }
 0xb5f   : > { %2566 = vmatprep.subr.bf16.mxu0 %v2565_v7  ;;  %v2615_v7 = vpack.c.bf16 %v1927_v1, %v1926_v0  ;;  %v1937_v0 = vld [vmem:[%s3532_s10 + $0x158] sm:$0xff] }
 0xbde   : > { %v1621_v47 = vpop.xlane.xlu1 %1620 }
 0xbdf   : > { %v1622_v48 = vmul.f32 0.0078125, %v1621_v47  ;;  %v2579_v47 = vpack.c.bf16 %v1708_v45, %v1704_v44  ;;  %v2597_v44 = vpack.c.bf16 %v1919_v42, %v1918_v41  ;;  %v1951_v45 = vld [vmem:[%s3532_s10 + $0x1c8] sm:$0xff] }
 0xbe1   : > { %v3179_v49 = vsub.f32 %v1616_v9, %v1622_v48  ;;  %v1680_v9 = vld [vmem:[%s3530_s8 + $0x110] sm:$0xff]  ;;  %v1910_v48 = vld [vmem:[%s3532_s10 + $0x80] sm:$0xff] }
 0xbe2   : > { %v2567_v59 = vpack.c.bf16 %v1684_v10, %v1680_v9  ;;  %v1897_v9 = vld [vmem:[%s3532_s10 + $0x18] sm:$0xff] }
 0xbe3   : > { %v1624_v50 = vmul.f32 %v3179_v49, %v3179_v49  ;;  %v2587_v17 = vpack.c.bf16 %v1897_v9, %v1896_v8 }
 0xbe4   : > { %2568 = vmatpush1.bf16.msra.mxu0 %v2567_v59 }
 0xbe5   : > { %v1625_v51 = vsel %vm412_vm0, %v1624_v50, 0.0  ;;  %2570 = vmatprep.subr.bf16.mxu0 %v2569_v15  ;;  %v1911_v50 = vld [vmem:[%s3532_s10 + $0x88] sm:$0xff]  ;;  %v1946_v15 = vld [vmem:[%s3532_s10 + $0x1a0] sm:$0xff] }
 0xbe6   : > { %1626 = vadd.xlane.f32.xlu1 %v1625_v51  ;;  %v1942_v51 = vld [vmem:[%s3532_s10 + $0x180] sm:$0xff]  ;;  %v2581_v52 = vpack.c.bf16 %v1911_v50, %v1910_v48  ;;  %v2621_v21 = vpack.c.bf16 %v1947_v16, %v1946_v15  ;;  %v2609_v15 = vpack.c.bf16 %v1925_v26, %v1924_v13  ;;  %v1957_v16 = vld [vmem:[%s3532_s10 + $0x1f8] sm:$0xff] }
 0xbe7   : > { %v2613_v54 = vpack.c.bf16 %v1943_v53, %v1942_v51  ;;  %v1934_v51 = vld [vmem:[%s3532_s10 + $0x140] sm:$0xff]  ;;  %v2641_v19 = vpack.c.bf16 %v1957_v16, %v1956_v14 }
 0xbe8   : > { %2572 = vmatpush1.bf16.msra.mxu0 %v2571_v23  ;;  %2582 = vmatprep.subr.bf16.mxu1 %v2581_v52  ;;  %v1930_v23 = vld [vmem:[%s3532_s10 + $0x120] sm:$0xff]  ;;  %v1935_v52 = vld [vmem:[%s3532_s10 + $0x148] sm:$0xff] }
 0xbe9   : > { %2574 = vmatprep.subr.bf16.mxu0 %v2573_v32  ;;  %v2623_v30 = vpack.c.bf16 %v1931_v24, %v1930_v23  ;;  %v1917_v32 = vld [vmem:[%s3532_s10 + $0xb8] sm:$0xff]  ;;  %v2631_v53 = vpack.c.bf16 %v1935_v52, %v1934_v51  ;;  %v1712_v24 = vlaneseq }
 0xbea   : > { %v2593_v33 = vpack.c.bf16 %v1917_v32, %v1916_v31  ;;  %v1710_v32 = vld [vmem:[%s3531_s9] sm:$0xf] }
 0xbec   : > { %2576 = vmatpush1.bf16.msra.mxu0 %v2575_v38  ;;  %v1932_v38 = vld [vmem:[%s3532_s10 + $0x130] sm:$0xff] }
 0xbed   : > { %2578 = vmatprep.subr.bf16.mxu0 %v2577_v43  ;;  %v2627_v40 = vpack.c.bf16 %v1933_v39, %v1932_v38  ;;  %v1950_v43 = vld [vmem:[%s3532_s10 + $0x1c0] sm:$0xff] }
 0xbee   : > { %v2629_v48 = vpack.c.bf16 %v1951_v45, %v1950_v43 }
 0xbf0   : > { %2580 = vmatpush1.bf16.msra.mxu0 %v2579_v47  ;;  %v1903_v47 = vld [vmem:[%s3532_s10 + $0x48] sm:$0xff] }
 0xbf1   : > { %2614 = vmatprep.subr.bf16.mxu0 %v2613_v54  ;;  %v2599_v50 = vpack.c.bf16 %v1903_v47, %v1902_v46  ;;  %v1920_v54 = vld [vmem:[%s3532_s10 + $0xd0] sm:$0xff] }
 0xc73   : > { %v1627_v55 = vpop.xlane.xlu1 %1626 }
 0xc74   : > { %v1628_v28 = vmul.f32 0.0078125, %v1627_v55  ;;  %v1921_v55 = vld [vmem:[%s3532_s10 + $0xd8] sm:$0xff] }
 0xc76   : > { %v1629_v56 = vadd.f32 1e-05, %v1628_v28  ;;  %v1952_v28 = vld [vmem:[%s3532_s10 + $0x1d0] sm:$0xff] }
 0xc78   : > { %2677 = vrsqrt.f32 %v1629_v56  ;;  %v2601_v56 = vpack.c.bf16 %v1921_v55, %v1920_v54 }
 0xc82   : > { %v2678_v58 = vpop.eup %2677 }
 0xc83   : > { %v1631_v63 = vmul.f32 %v2678_v58, %v3179_v49  ;;  %v1944_v49 = vld [vmem:[%s3532_s10 + $0x190] sm:$0xff] }
 0xc84   : > { %v2617_v59 = vpack.c.bf16 %v1945_v6, %v1944_v49  ;;  %v1904_v58 = vld [vmem:[%s3532_s10 + $0x50] sm:$0xff]  ;;  %v1954_v49 = vld [vmem:[%s3532_s10 + $0x1e0] sm:$0xff]  ;;  %v2605_v6 = vpack.c.bf16 %v1923_v3, %v1922_v2 }
 0xc85   : > { %v1638_v4 = vmul.f32 %v2190_v57, %v1631_v63  ;;  %v1953_v57 = vld [vmem:[%s3532_s10 + $0x1d8] sm:$0xff]  ;;  %v1936_v63 = vld [vmem:[%s3532_s10 + $0x150] sm:$0xff] }
 0xc86   : > { %v2633_v61 = vpack.c.bf16 %v1953_v57, %v1952_v28  ;;  %v2635_v1 = vpack.c.bf16 %v1937_v0, %v1936_v63 }
 0xc87   : > { %v3353_v10 = vadd.f32 %v2191_v60, %v1638_v4  ;;  %v1905_v60 = vld [vmem:[%s3532_s10 + $0x58] sm:$0xff]  ;;  %v1955_v4 = vld [vmem:[%s3532_s10 + $0x1e8] sm:$0xff] }
 0xc88   : > { %v2603_v62 = vpack.c.bf16 %v1905_v60, %v1904_v58  ;;  %v2637_v8 = vpack.c.bf16 %v1955_v4, %v1954_v49  ;;  %v2192_v49 = vld [vmem:[%s3533_s11] ss:$0 sm:$0xff] }
 0xc89   : > { %1797 = vmatmul.mubr.f32.vlgmr.msra.gmra.mrb[16].mxu1 %v3353_v10  ;;  %1868 = vmatmul.mubr.f32.vlgmr.msra.gmra.mrb[12].mxu0 %v3353_v10 }
 0xc8a   : > { %2584 = vmatpush3.bf16.msra.mxu1 %v2583_v5  ;;  %2616 = vmatpush3.bf16.msra.mxu0 %v2615_v7  ;;  %v1906_v5 = vld [vmem:[%s3532_s10 + $0x60] sm:$0xff]  ;;  %v1907_v7 = vld [vmem:[%s3532_s10 + $0x68] sm:$0xff] }
 0xc8b   : > { %2586 = vmatprep.subr.bf16.mxu1 %v2585_v11  ;;  %2618 = vmatprep.subr.bf16.mxu0 %v2617_v59  ;;  %v2607_v9 = vpack.c.bf16 %v1907_v7, %v1906_v5  ;;  %v1938_v11 = vld [vmem:[%s3532_s10 + $0x160] sm:$0xff]  ;;  %v1939_v59 = vld [vmem:[%s3532_s10 + $0x168] sm:$0xff] }
 0xc8c   : > { %v2639_v12 = vpack.c.bf16 %v1939_v59, %v1938_v11 }
 0xc8e   : > { %2588 = vmatpush3.bf16.msra.mxu1 %v2587_v17  ;;  %2620 = vmatpush3.bf16.msra.mxu0 %v2619_v18  ;;  %v1908_v17 = vld [vmem:[%s3532_s10 + $0x70] sm:$0xff]  ;;  %v1909_v18 = vld [vmem:[%s3532_s10 + $0x78] sm:$0xff] }
 0xc8f   : > { %2590 = vmatprep.subr.bf16.mxu1 %v2589_v20  ;;  %2622 = vmatprep.subr.bf16.mxu0 %v2621_v21  ;;  %v2611_v20 = vpack.c.bf16 %v1909_v18, %v1908_v17  ;;  %v1940_v21 = vld [vmem:[%s3532_s10 + $0x170] sm:$0xff] }
 0xc90   : > { %v2643_v23 = vpack.c.bf16 %v1941_v22, %v1940_v21 }
 0xc92   : > { %2592 = vmatpush3.bf16.msra.mxu1 %v2591_v25  ;;  %2624 = vmatpush3.bf16.msra.mxu0 %v2623_v30  ;;  %v1713_v25 = vshrl.u32 %v1712_v24, 7 }
 0xc93   : > { %2594 = vmatprep.subr.bf16.mxu1 %v2593_v33  ;;  %2626 = vmatprep.subr.bf16.mxu0 %v2625_v37 }
 0xc94   : > { %v1714_v30 = vsub.s32 0, %v1713_v25  ;;  %v1722_v31 = vsub.s32 2, %v1713_v25  ;;  %v1718_v27 = vsub.s32 1, %v1713_v25  ;;  %v1726_v33 = vsub.s32 3, %v1713_v25 }
 0xc96   : > { %2596 = vmatpush3.bf16.msra.mxu1 %v2595_v29  ;;  %2628 = vmatpush3.bf16.msra.mxu0 %v2627_v40  ;;  %v1715_v34 = vrot.slane %v1710_v32, %v1714_v30  ;;  %v1723_v35 = vrot.slane %v1710_v32, %v1722_v31  ;;  %v1719_v36 = vrot.slane %v1710_v32, %v1718_v27 }
 0xc97   : > { %2598 = vmatprep.subr.bf16.mxu1 %v2597_v44  ;;  %2630 = vmatprep.subr.bf16.mxu0 %v2629_v48  ;;  %v1727_v37 = vrot.slane %v1710_v32, %v1726_v33 }
 0xc9a   : > { %2600 = vmatpush3.bf16.msra.mxu1 %v2599_v50  ;;  %2632 = vmatpush3.bf16.msra.mxu0 %v2631_v53 }
 0xc9b   : > { %2602 = vmatprep.subr.bf16.mxu1 %v2601_v56  ;;  %2634 = vmatprep.subr.bf16.mxu0 %v2633_v61 }
 0xc9e   : > { %2604 = vmatpush3.bf16.msra.mxu1 %v2603_v62  ;;  %2636 = vmatpush3.bf16.msra.mxu0 %v2635_v1 }
 0xc9f   : > { %2606 = vmatprep.subr.bf16.mxu1 %v2605_v6  ;;  %2638 = vmatprep.subr.bf16.mxu0 %v2637_v8 }
 0xca2   : > { %2608 = vmatpush3.bf16.msra.mxu1 %v2607_v9  ;;  %2640 = vmatpush3.bf16.msra.mxu0 %v2639_v12 }
 0xca3   : > { %2610 = vmatprep.subr.bf16.mxu1 %v2609_v15  ;;  %2642 = vmatprep.subr.bf16.mxu0 %v2641_v19 }
 0xca6   : > { %2612 = vmatpush3.bf16.msra.mxu1 %v2611_v20  ;;  %2644 = vmatpush3.bf16.msra.mxu0 %v2643_v23 }
 0xd5c   : > { %v1798_v29 = vpop.f32.mrb[16].mxu1  ;;  %v1869_v38 = vpop.f32.mrb[12].mxu0 }
 0xd5d   : > { %v1799_v39 = vadd.f32 %v1798_v29, %v1715_v34  ;;  %v1870_v40 = vadd.f32 %v1869_v38, %v1723_v35  ;;  %v1800_v41 = vpop.f32.mrb[17].mxu1  ;;  %v1871_v42 = vpop.f32.mrb[13].mxu0 }
 0xd5e   : > { %v1801_v43 = vadd.f32 %v1800_v41, %v1719_v36  ;;  %v1872_v44 = vadd.f32 %v1871_v42, %v1727_v37 }
 0xd5f   : > { %v1878_v45 = vmul.f32 0.70710677, %v1799_v39  ;;  %v1880_v46 = vmul.f32 0.70710677, %v1870_v40  ;;  %v1874_v57 = vmul.f32 0.5, %v1799_v39  ;;  %v1876_v61 = vmul.f32 0.5, %v1870_v40 }
 0xd60   : > { %v1879_v47 = vmul.f32 0.70710677, %v1801_v43  ;;  %v1881_v48 = vmul.f32 0.70710677, %v1872_v44  ;;  %v1875_v28 = vmul.f32 0.5, %v1801_v43  ;;  %v1877_v58 = vmul.f32 0.5, %v1872_v44 }
 0xd61   : > { %2679 = verf.f32 %v1878_v45 }
 0xd62   : > { %2681 = verf.f32 %v1880_v46 }
 0xd63   : > { %2683 = verf.f32 %v1879_v47 }
 0xd64   : > { %2685 = verf.f32 %v1881_v48 }
 0xd6b   : > { %v2680_v50 = vpop.eup %2679 }
 0xd6c   : > { %v2682_v51 = vpop.eup %2681  ;;  %v1886_v53 = vadd.f32 1.0, %v2680_v50 }
 0xd6d   : > { %v2684_v52 = vpop.eup %2683  ;;  %v1888_v55 = vadd.f32 1.0, %v2682_v51 }
 0xd6e   : > { %v2686_v54 = vpop.eup %2685  ;;  %v1887_v56 = vadd.f32 1.0, %v2684_v52  ;;  %v1890_v63 = vmul.f32 %v1886_v53, %v1874_v57 }
 0xd6f   : > { %v1889_v60 = vadd.f32 1.0, %v2686_v54  ;;  %v1892_v1 = vmul.f32 %v1888_v55, %v1876_v61 }
 0xd70   : > { %v1891_v62 = vmul.f32 %v1887_v56, %v1875_v28 }
 0xd71   : > { %v1893_v0 = vmul.f32 %v1889_v60, %v1877_v58 }
 0xd72   : > { %2029 = vmatprep.mubr.f32.mxu1 %v1891_v62 }
 0xd73   : > { %2099 = vmatprep.mubr.f32.mxu0 %v1893_v0  ;;  %2030 = vmatmul.mubr.f32.vlgmr.msra.gmra.mrb[18].mxu1 %v1890_v63 }
 0xd74   : > { %2100 = vmatmul.mubr.f32.vlgmr.msra.gmra.mrb[14].mxu0 %v1892_v1 }
 0xe46   : > { %v2280_v2 = vpop.f32.mrb[18].mxu1 }
 0xe47   : > { %v2315_v3 = vpop.f32.mrb[14].mxu0  ;;  %v2281_v6 = vpop.f32.mrb[19].mxu1 }
 0xe48   : > { %v2282_v4 = vadd.f32 %v2281_v6, %v2280_v2  ;;  %v2316_v5 = vpop.f32.mrb[15].mxu0 }
 0xe49   : > { %v2317_v7 = vadd.f32 %v2316_v5, %v2315_v3 }
 0xe4a   : > { %v2032_v8 = vadd.f32 %v2282_v4, %v2192_v49 }
 0xe4c   : > { %v2102_v9 = vadd.f32 %v2317_v7, %v2032_v8 }
 0xe4e   : > { %v2105_v11 = vadd.f32 %v2102_v9, %v3353_v10 }
 0xe50   : > { %2106 = vst [vmem:[%s408_s26] sm:$0x7] %v2105_v11 }
 0xe51 PF: > { %s22_s21 = sadd.s32 1, %s2693_s21  }
 0xe52   : > { %p19_p4 = scmp.ge.s32.totalorder %s22_s21, 18  }
 0xe54   :  { %21 = sbr.rel (!%p19_p4) target bundleno = 1 (0x1), region = 98 }

</bundles_post_ra>
